<compile_context>
chip_gen: v7x
topology: tpu7x:2x2x1
jax: 0.10.0
libtpu: 0.0.40
codegen_flags: <defaults>
</compile_context>

<pallas_src>
import functools

import jax
import jax.numpy as jnp
from jax import lax
from jax.experimental import pallas as pl
from jax.experimental.pallas import tpu as pltpu


def _leaky_relu(x, slope=0.01):
    return jnp.where(x >= 0, x, slope * x)


def _round_up(v, m):
    return (v + m - 1) // m * m


def _tree_add(parts):
    parts = list(parts)
    while len(parts) > 1:
        nxt = [parts[i] + parts[i + 1] for i in range(0, len(parts) - 1, 2)]
        if len(parts) % 2:
            nxt.append(parts[-1])
        parts = nxt
    return parts[0]


# ----------------------------------------------------------------------------
# Fused kernel: initial MLP + stacked LRU layers + mean aggregation + final MLP
# One grid step = Bt skeleton sequences, time/joint-major rows:
#   x block  : (L, J, Bt, Fp)  -> flattened to (M, Fp), M = L*J*Bt, rows (l, j, b)
#   seq_scr  : (M, Dp) f32     residual / working activations
#   uh_scr   : (M, Dp) f32     U = seq @ B, overwritten in place with H
#   out block: (Bt, Op)
# ----------------------------------------------------------------------------
def _encoder_kernel(x_ref, w1_ref, b1_ref, w2_ref, b2_ref,
                    a_ref, bm_ref, cm_ref, dv_ref,
                    w3_ref, b3_ref, w4_ref, b4_ref,
                    out_ref, seq_scr, uh_scr, *,
                    num_layers, seq_len, joints, batch_tile):
    L, J, Bt = seq_len, joints, batch_tile
    BJ = J * Bt                          # rows per timestep (multiple of 8)
    M = L * BJ                           # total rows per block
    Dp = w2_ref.shape[1]
    f32, bf16 = jnp.float32, jnp.bfloat16

    # ---- initial MLP: Linear(F->D) -> LeakyReLU -> Linear(D->D) on all M rows ----
    x = x_ref[...].reshape(M, -1)        # merge of full tiles (Bt multiple of 8)
    u = jnp.dot(x.astype(bf16), w1_ref[...],
                preferred_element_type=f32) + b1_ref[...]
    u = _leaky_relu(u)
    seq_scr[...] = jnp.dot(u.astype(bf16), w2_ref[...],
                           preferred_element_type=f32) + b2_ref[...]

    # ---- stacked LRU layers ----
    for layer in range(num_layers):      # static unroll over (small) layer count
        a_l = a_ref[layer]               # (1, Dp) f32
        dv_l = dv_ref[layer]             # (1, Dp) f32

        # Hoisted input projection: one (M, Dp) MXU matmul, written to scratch.
        uh_scr[...] = jnp.dot(seq_scr[...].astype(bf16), bm_ref[layer],
                              preferred_element_type=f32)

        # Diagonal recurrence on (Bt*J, Dp) state; time slabs are contiguous
        # (time-major rows).  H overwrites U in place -> no stack / relayout,
        # live ranges bounded by the scratch buffer.
        def _step(t, h):
            off = pl.multiple_of(t * BJ, BJ)
            h = a_l * h + uh_scr[pl.ds(off, BJ), :]
            uh_scr[pl.ds(off, BJ), :] = h
            return h
        lax.fori_loop(0, L, _step, jnp.zeros((BJ, Dp), f32), unroll=True)

        # Hoisted output projection + gated skip: one (M, Dp) MXU matmul.
        y = jnp.dot(uh_scr[...].astype(bf16), cm_ref[layer],
                    preferred_element_type=f32)
        prev = seq_scr[...]
        seq_scr[...] = jax.nn.gelu(y + dv_l * prev, approximate=True) + prev

    # ---- temporal aggregation: mean over L (contiguous time slabs) ----
    def _mean_step(t, acc):
        off = pl.multiple_of(t * BJ, BJ)
        return acc + seq_scr[pl.ds(off, BJ), :]
    z = lax.fori_loop(0, L, _mean_step, jnp.zeros((BJ, Dp), f32),
                      unroll=True) * (1.0 / L)        # (BJ, Dp), rows (j, b)

    # ---- final MLP: Linear(J*D -> 2*O) -> LeakyReLU -> Linear(2*O -> O) ----
    # J independent (Bt, Dp) @ (Dp, H3p) matmuls on contiguous joint slabs of z,
    # tree-added (no M=1 matmuls, no serial MXU-pop -> VPU-add chain).
    parts = [jnp.dot(z[j * Bt:(j + 1) * Bt].astype(bf16), w3_ref[j],
                     preferred_element_type=f32) for j in range(J)]
    h3 = _leaky_relu(_tree_add(parts) + b3_ref[...])                  # (Bt, H3p)
    out_ref[...] = jnp.dot(h3.astype(bf16), w4_ref[...],
                           preferred_element_type=f32) + b4_ref[...]  # (Bt, Op)


def _const_spec(shape):
    zero = (0,) * len(shape)
    return pl.BlockSpec(shape, lambda b: zero)


def lru_skeleton_encoder(x, kp, *, num_layers, output_dim, batch_tile=8):
    """x: (B, L, J, F) float32, kp: packed/padded params. Returns (B, output_dim)."""
    B, L, J, F = x.shape
    Fp = kp['w1'].shape[0]
    Dp = kp['w2'].shape[1]
    Op = kp['w4'].shape[1]

    # Bt must be a multiple of 8 so the (Bt, *) block dims, the in-kernel tile
    # merges, and the per-timestep / per-joint slices stay (8,128)-aligned.
    Bt = max(8, _round_up(batch_tile, 8))
    B_pad = _round_up(B, Bt)

    # One-time HBM prep: pad features/batch, then go time/joint-major so every
    # in-kernel access is a contiguous, tile-aligned slab (no in-kernel relayout).
    x_p = jnp.pad(x, ((0, B_pad - B), (0, 0), (0, 0), (0, Fp - F)))
    x_t = jnp.transpose(x_p, (1, 2, 0, 3))                           # (L, J, B_pad, Fp)

    kernel = functools.partial(_encoder_kernel, num_layers=num_layers,
                               seq_len=L, joints=J, batch_tile=Bt)
    M = L * J * Bt

    out = pl.pallas_call(
        kernel,
        out_shape=jax.ShapeDtypeStruct((B_pad, Op), jnp.float32),
        grid_spec=pltpu.PrefetchScalarGridSpec(
            num_scalar_prefetch=0,
            grid=(B_pad // Bt,),
            in_specs=[
                # Bt sequences per grid step, time/joint-major, contiguous DMA.
                pl.BlockSpec((L, J, Bt, Fp), lambda b: (0, 0, b, 0)),
                _const_spec(kp['w1'].shape), _const_spec(kp['b1'].shape),
                _const_spec(kp['w2'].shape), _const_spec(kp['b2'].shape),
                _const_spec(kp['a'].shape), _const_spec(kp['Bm'].shape),
                _const_spec(kp['Cm'].shape), _const_spec(kp['dv'].shape),
                _const_spec(kp['w3'].shape), _const_spec(kp['b3'].shape),
                _const_spec(kp['w4'].shape), _const_spec(kp['b4'].shape),
            ],
            out_specs=pl.BlockSpec((Bt, Op), lambda b: (b, 0)),
            scratch_shapes=[
                pltpu.VMEM((M, Dp), jnp.float32),   # seq (residual / working)
                pltpu.VMEM((M, Dp), jnp.float32),   # U -> H (in-place recurrence)
            ],
        ),
        compiler_params=pltpu.CompilerParams(
            dimension_semantics=("parallel",),
            # 48 MiB fits v7x's 64 MiB VMEM; v5e/v6e can raise this and use a
            # larger batch_tile.
            vmem_limit_bytes=48 * 1024 * 1024,
        ),
    )(x_t, kp['w1'], kp['b1'], kp['w2'], kp['b2'],
      kp['a'], kp['Bm'], kp['Cm'], kp['dv'],
      kp['w3'], kp['b3'], kp['w4'], kp['b4'])

    return out[:B, :output_dim]


# ----------------------------------------------------------------------------
# Parameter construction (logical) and packing (lane-aligned padding + bf16).
# All pad entries are zero, which leaves the logical computation unchanged
# (padded channels stay exactly 0 through every layer).
# ----------------------------------------------------------------------------
def init_params(key, joint_count, input_dim, state_dim, output_dim, num_layers):
    ks = jax.random.split(key, 12)
    D, O, J, F = state_dim, output_dim, joint_count, input_dim
    return {
        'w1': jax.random.normal(ks[0], (F, D), jnp.float32) * 0.2,
        'b1': jax.random.normal(ks[1], (1, D), jnp.float32) * 0.01,
        'w2': jax.random.normal(ks[2], (D, D), jnp.float32) * 0.1,
        'b2': jax.random.normal(ks[3], (1, D), jnp.float32) * 0.01,
        'a':  jax.random.uniform(ks[4], (num_layers, D), jnp.float32, 0.7, 0.95),
        'Bm': jax.random.normal(ks[5], (num_layers, D, D), jnp.float32) * 0.1,
        'Cm': jax.random.normal(ks[6], (num_layers, D, D), jnp.float32) * 0.1,
        'dv': jax.random.normal(ks[7], (num_layers, D), jnp.float32) * 0.1,
        'w3': jax.random.normal(ks[8], (J * D, 2 * O), jnp.float32) * 0.05,
        'b3': jax.random.normal(ks[9], (1, 2 * O), jnp.float32) * 0.01,
        'w4': jax.random.normal(ks[10], (2 * O, O), jnp.float32) * 0.1,
        'b4': jax.random.normal(ks[11], (1, O), jnp.float32) * 0.01,
    }


def pack_params(p, *, joint_count, input_dim, state_dim, output_dim, num_layers):
    J, F, D, O = joint_count, input_dim, state_dim, output_dim
    Fp = _round_up(F, 8)
    Dp = _round_up(D, 128)
    H3 = 2 * O
    H3p = _round_up(H3, 128)
    Op = _round_up(O, 128)
    f32, bf16 = jnp.float32, jnp.bfloat16

    def pad2(w, r, c):
        return jnp.pad(w, ((0, r - w.shape[0]), (0, c - w.shape[1])))

    w3 = p['w3'].reshape(J, D, H3)
    w3 = jnp.pad(w3, ((0, 0), (0, Dp - D), (0, H3p - H3)))           # (J, Dp, H3p)

    return {
        'w1': pad2(p['w1'], Fp, Dp).astype(bf16),
        'b1': pad2(p['b1'], 1, Dp).astype(f32),
        'w2': pad2(p['w2'], Dp, Dp).astype(bf16),
        'b2': pad2(p['b2'], 1, Dp).astype(f32),
        'a':  jnp.pad(p['a'], ((0, 0), (0, Dp - D))).reshape(num_layers, 1, Dp).astype(f32),
        'Bm': jnp.pad(p['Bm'], ((0, 0), (0, Dp - D), (0, Dp - D))).astype(bf16),
        'Cm': jnp.pad(p['Cm'], ((0, 0), (0, Dp - D), (0, Dp - D))).astype(bf16),
        'dv': jnp.pad(p['dv'], ((0, 0), (0, Dp - D))).reshape(num_layers, 1, Dp).astype(f32),
        'w3': w3.astype(bf16),
        'b3': pad2(p['b3'], 1, H3p).astype(f32),
        'w4': pad2(p['w4'], H3p, Op).astype(bf16),
        'b4': pad2(p['b4'], 1, Op).astype(f32),
    }


# ----------------------------------------------------------------------------
# Plain-JAX reference (same padded/bf16 params) for a sanity check.
# ----------------------------------------------------------------------------
def reference_forward(x, kp, *, num_layers, output_dim):
    B, L, J, F = x.shape
    Fp = kp['w1'].shape[0]
    Dp = kp['w2'].shape[1]
    bf16, f32 = jnp.bfloat16, jnp.float32
    xp = jnp.pad(x, ((0, 0), (0, 0), (0, 0), (0, Fp - F)))

    def mm(a, w):
        return jnp.dot(a.astype(bf16), w, preferred_element_type=f32)

    u = mm(xp.reshape(-1, Fp), kp['w1']) + kp['b1']
    u = _leaky_relu(u)
    u = mm(u, kp['w2']) + kp['b2']
    seq = u.reshape(B, L, J, Dp)
    for l in range(num_layers):
        a, dv = kp['a'][l], kp['dv'][l]
        U = mm(seq.reshape(-1, Dp), kp['Bm'][l]).reshape(B, L, J, Dp)
        h = jnp.zeros((B, J, Dp), f32)
        hs = []
        for t in range(L):
            h = a * h + U[:, t]
            hs.append(h)
        H = jnp.stack(hs, axis=1)
        y = mm(H.reshape(-1, Dp), kp['Cm'][l]).reshape(B, L, J, Dp)
        seq = jax.nn.gelu(y + dv * seq, approximate=True) + seq
    z = jnp.mean(seq, axis=1)                                         # (B, J, Dp)
    h3 = kp['b3'] + jnp.einsum('bjd,jdh->bh', z.astype(bf16), kp['w3'],
                               preferred_element_type=f32)
    h3 = _leaky_relu(h3)
    out = mm(h3, kp['w4']) + kp['b4']
    return out[:, :output_dim]


if __name__ == "__main__":
    B, L, J = 16, 8, 4         # batch, sequence length, joints
    F = 6                      # input_dim
    D = 32                     # state_dim
    O = 16                     # output_dim
    NUM_LAYERS = 2             # temporal_layers_count
    BT = 8                     # sequences per grid step -> M = 256 rows, grid = 2

    key = jax.random.PRNGKey(0)
    pkey, xkey = jax.random.split(key)
    params = init_params(pkey, joint_count=J, input_dim=F, state_dim=D,
                         output_dim=O, num_layers=NUM_LAYERS)
    packed = pack_params(params, joint_count=J, input_dim=F, state_dim=D,
                         output_dim=O, num_layers=NUM_LAYERS)
    x = jax.random.normal(xkey, (B, L, J, F), jnp.float32)

    y = lru_skeleton_encoder(x, packed, num_layers=NUM_LAYERS, output_dim=O,
                             batch_tile=BT)
    y = jax.block_until_ready(y)
    assert y.shape == (B, O) and y.dtype == jnp.float32

    y_ref = jax.block_until_ready(
        reference_forward(x, packed, num_layers=NUM_LAYERS, output_dim=O))
    max_err = float(jnp.max(jnp.abs(y - y_ref)))
    assert max_err < 2e-2, f"kernel vs reference mismatch: max abs err {max_err}"

    print("KERNEL_OK")
</pallas_src>

<mosaic_0001>
module attributes {stable_mosaic.version = 11 : i64} {
  func.func @_encoder_kernel(%arg0: i32, %arg1: memref<8x4x8x8xf32, #tpu.memory_space<vmem>>, %arg2: memref<8x128xbf16, #tpu.memory_space<vmem>>, %arg3: memref<1x128xf32, #tpu.memory_space<vmem>>, %arg4: memref<128x128xbf16, #tpu.memory_space<vmem>>, %arg5: memref<1x128xf32, #tpu.memory_space<vmem>>, %arg6: memref<2x1x128xf32, #tpu.memory_space<vmem>>, %arg7: memref<2x128x128xbf16, #tpu.memory_space<vmem>>, %arg8: memref<2x128x128xbf16, #tpu.memory_space<vmem>>, %arg9: memref<2x1x128xf32, #tpu.memory_space<vmem>>, %arg10: memref<4x128x128xbf16, #tpu.memory_space<vmem>>, %arg11: memref<1x128xf32, #tpu.memory_space<vmem>>, %arg12: memref<128x128xbf16, #tpu.memory_space<vmem>>, %arg13: memref<1x128xf32, #tpu.memory_space<vmem>>, %arg14: memref<8x128xf32, #tpu.memory_space<vmem>>, %arg15: memref<256x128xf32, #tpu.memory_space<vmem>>, %arg16: memref<256x128xf32, #tpu.memory_space<vmem>>) attributes {dimension_semantics = [#tpu.dimension_semantics<parallel>], iteration_bounds = array<i64: 2>, scalar_prefetch = 0 : i64, scratch_operands = 2 : i64, tpu.core_type = #tpu.core_type<tc>, window_params = [{transform_indices = @transform_0, window_bounds = array<i64: 8, 4, 8, 8>}, {pipeline_mode = #tpu.pipeline_mode<synchronous>, transform_indices = @transform_1, window_bounds = array<i64: 8, 128>}, {pipeline_mode = #tpu.pipeline_mode<synchronous>, transform_indices = @transform_2, window_bounds = array<i64: 1, 128>}, {pipeline_mode = #tpu.pipeline_mode<synchronous>, transform_indices = @transform_3, window_bounds = array<i64: 128, 128>}, {pipeline_mode = #tpu.pipeline_mode<synchronous>, transform_indices = @transform_4, window_bounds = array<i64: 1, 128>}, {pipeline_mode = #tpu.pipeline_mode<synchronous>, transform_indices = @transform_5, window_bounds = array<i64: 2, 1, 128>}, {pipeline_mode = #tpu.pipeline_mode<synchronous>, transform_indices = @transform_6, window_bounds = array<i64: 2, 128, 128>}, {pipeline_mode = #tpu.pipeline_mode<synchronous>, transform_indices = @transform_7, window_bounds = array<i64: 2, 128, 128>}, {pipeline_mode = #tpu.pipeline_mode<synchronous>, transform_indices = @transform_8, window_bounds = array<i64: 2, 1, 128>}, {pipeline_mode = #tpu.pipeline_mode<synchronous>, transform_indices = @transform_9, window_bounds = array<i64: 4, 128, 128>}, {pipeline_mode = #tpu.pipeline_mode<synchronous>, transform_indices = @transform_10, window_bounds = array<i64: 1, 128>}, {pipeline_mode = #tpu.pipeline_mode<synchronous>, transform_indices = @transform_11, window_bounds = array<i64: 128, 128>}, {pipeline_mode = #tpu.pipeline_mode<synchronous>, transform_indices = @transform_12, window_bounds = array<i64: 1, 128>}, {transform_indices = @transform_13, window_bounds = array<i64: 8, 128>}]} {
    %c0 = arith.constant 0 : index
    %c0_0 = arith.constant 0 : index
    %c0_1 = arith.constant 0 : index
    %c0_2 = arith.constant 0 : index
    %0 = vector.load %arg1[%c0, %c0_0, %c0_1, %c0_2] : memref<8x4x8x8xf32, #tpu.memory_space<vmem>>, vector<8x4x8x8xf32>
    %1 = vector.shape_cast %0 : vector<8x4x8x8xf32> to vector<256x8xf32>
    %2 = arith.truncf %1 : vector<256x8xf32> to vector<256x8xbf16>
    %c0_3 = arith.constant 0 : index
    %c0_4 = arith.constant 0 : index
    %3 = vector.load %arg2[%c0_3, %c0_4] : memref<8x128xbf16, #tpu.memory_space<vmem>>, vector<8x128xbf16>
    %cst = arith.constant dense<0.000000e+00> : vector<256x128xf32>
    %4 = tpu.matmul %2, %3, %cst {dimension_numbers = #tpu.dot_dimension_numbers<[1], [0], [0], [1], [0, 0, 1, 1], [], []>} : vector<256x8xbf16>, vector<8x128xbf16>, vector<256x128xf32> -> vector<256x128xf32>
    %c0_5 = arith.constant 0 : index
    %c0_6 = arith.constant 0 : index
    %5 = vector.load %arg3[%c0_5, %c0_6] : memref<1x128xf32, #tpu.memory_space<vmem>>, vector<1x128xf32>
    %6 = vector.broadcast %5 : vector<1x128xf32> to vector<256x128xf32>
    %7 = arith.addf %4, %6 : vector<256x128xf32>
    %cst_7 = arith.constant 0.000000e+00 : f32
    %8 = vector.broadcast %cst_7 : f32 to vector<256x128xf32>
    %9 = arith.cmpf oge, %7, %8 : vector<256x128xf32>
    %cst_8 = arith.constant 0.00999999977 : f32
    %10 = vector.broadcast %cst_8 : f32 to vector<256x128xf32>
    %11 = arith.mulf %10, %7 : vector<256x128xf32>
    %12 = arith.select %9, %7, %11 : vector<256x128xi1>, vector<256x128xf32>
    %13 = arith.truncf %12 : vector<256x128xf32> to vector<256x128xbf16>
    %c0_9 = arith.constant 0 : index
    %c0_10 = arith.constant 0 : index
    %14 = vector.load %arg4[%c0_9, %c0_10] : memref<128x128xbf16, #tpu.memory_space<vmem>>, vector<128x128xbf16>
    %cst_11 = arith.constant dense<0.000000e+00> : vector<256x128xf32>
    %15 = tpu.matmul %13, %14, %cst_11 {dimension_numbers = #tpu.dot_dimension_numbers<[1], [0], [0], [1], [0, 0, 1, 1], [], []>} : vector<256x128xbf16>, vector<128x128xbf16>, vector<256x128xf32> -> vector<256x128xf32>
    %c0_12 = arith.constant 0 : index
    %c0_13 = arith.constant 0 : index
    %16 = vector.load %arg5[%c0_12, %c0_13] : memref<1x128xf32, #tpu.memory_space<vmem>>, vector<1x128xf32>
    %17 = vector.broadcast %16 : vector<1x128xf32> to vector<256x128xf32>
    %18 = arith.addf %15, %17 : vector<256x128xf32>
    %c0_14 = arith.constant 0 : index
    %c0_15 = arith.constant 0 : index
    %19 = vector.load %arg15[%c0_14, %c0_15] : memref<256x128xf32, #tpu.memory_space<vmem>>, vector<256x128xf32>
    tpu.vector_store %arg15[%c0_14, %c0_15], %18 {strides = array<i32>} : memref<256x128xf32, #tpu.memory_space<vmem>>, vector<256x128xf32>,
    %c0_16 = arith.constant 0 : index
    %c0_17 = arith.constant 0 : index
    %c0_18 = arith.constant 0 : index
    %20 = vector.load %arg6[%c0_16, %c0_17, %c0_18] : memref<2x1x128xf32, #tpu.memory_space<vmem>>, vector<1x1x128xf32>
    %21 = vector.shape_cast %20 : vector<1x1x128xf32> to vector<1x128xf32>
    %c0_19 = arith.constant 0 : index
    %c0_20 = arith.constant 0 : index
    %c0_21 = arith.constant 0 : index
    %22 = vector.load %arg9[%c0_19, %c0_20, %c0_21] : memref<2x1x128xf32, #tpu.memory_space<vmem>>, vector<1x1x128xf32>
    %23 = vector.shape_cast %22 : vector<1x1x128xf32> to vector<1x128xf32>
    %c0_22 = arith.constant 0 : index
    %c0_23 = arith.constant 0 : index
    %24 = vector.load %arg15[%c0_22, %c0_23] : memref<256x128xf32, #tpu.memory_space<vmem>>, vector<256x128xf32>
    %25 = arith.truncf %24 : vector<256x128xf32> to vector<256x128xbf16>
    %c0_24 = arith.constant 0 : index
    %c0_25 = arith.constant 0 : index
    %c0_26 = arith.constant 0 : index
    %26 = vector.load %arg7[%c0_24, %c0_25, %c0_26] : memref<2x128x128xbf16, #tpu.memory_space<vmem>>, vector<1x128x128xbf16>
    %27 = vector.shape_cast %26 : vector<1x128x128xbf16> to vector<128x128xbf16>
    %cst_27 = arith.constant dense<0.000000e+00> : vector<256x128xf32>
    %28 = tpu.matmul %25, %27, %cst_27 {dimension_numbers = #tpu.dot_dimension_numbers<[1], [0], [0], [1], [0, 0, 1, 1], [], []>} : vector<256x128xbf16>, vector<128x128xbf16>, vector<256x128xf32> -> vector<256x128xf32>
    %c0_28 = arith.constant 0 : index
    %c0_29 = arith.constant 0 : index
    %29 = vector.load %arg16[%c0_28, %c0_29] : memref<256x128xf32, #tpu.memory_space<vmem>>, vector<256x128xf32>
    tpu.vector_store %arg16[%c0_28, %c0_29], %28 {strides = array<i32>} : memref<256x128xf32, #tpu.memory_space<vmem>>, vector<256x128xf32>,
    %cst_30 = arith.constant 0.000000e+00 : f32
    %30 = vector.broadcast %cst_30 : f32 to vector<32x128xf32>
    %c0_i32 = arith.constant 0 : i32
    %c32_i32 = arith.constant 32 : i32
    %31 = arith.muli %c0_i32, %c32_i32 : i32
    %32 = tpu.assume_multiple %31, 32 : i32
    %33 = vector.broadcast %21 : vector<1x128xf32> to vector<32x128xf32>
    %34 = arith.mulf %33, %30 : vector<32x128xf32>
    %35 = arith.index_cast %32 : i32 to index
    %c0_31 = arith.constant 0 : index
    %36 = vector.load %arg16[%35, %c0_31] : memref<256x128xf32, #tpu.memory_space<vmem>>, vector<32x128xf32>
    %37 = arith.addf %34, %36 : vector<32x128xf32>
    %38 = arith.index_cast %32 : i32 to index
    %c0_32 = arith.constant 0 : index
    %39 = vector.load %arg16[%38, %c0_32] : memref<256x128xf32, #tpu.memory_space<vmem>>, vector<32x128xf32>
    tpu.vector_store %arg16[%38, %c0_32], %37 {strides = array<i32>} : memref<256x128xf32, #tpu.memory_space<vmem>>, vector<32x128xf32>,
    %c1_i32 = arith.constant 1 : i32
    %c32_i32_33 = arith.constant 32 : i32
    %40 = arith.muli %c1_i32, %c32_i32_33 : i32
    %41 = tpu.assume_multiple %40, 32 : i32
    %42 = vector.broadcast %21 : vector<1x128xf32> to vector<32x128xf32>
    %43 = arith.mulf %42, %37 : vector<32x128xf32>
    %44 = arith.index_cast %41 : i32 to index
    %c0_34 = arith.constant 0 : index
    %45 = vector.load %arg16[%44, %c0_34] : memref<256x128xf32, #tpu.memory_space<vmem>>, vector<32x128xf32>
    %46 = arith.addf %43, %45 : vector<32x128xf32>
    %47 = arith.index_cast %41 : i32 to index
    %c0_35 = arith.constant 0 : index
    %48 = vector.load %arg16[%47, %c0_35] : memref<256x128xf32, #tpu.memory_space<vmem>>, vector<32x128xf32>
    tpu.vector_store %arg16[%47, %c0_35], %46 {strides = array<i32>} : memref<256x128xf32, #tpu.memory_space<vmem>>, vector<32x128xf32>,
    %c2_i32 = arith.constant 2 : i32
    %c32_i32_36 = arith.constant 32 : i32
    %49 = arith.muli %c2_i32, %c32_i32_36 : i32
    %50 = tpu.assume_multiple %49, 32 : i32
    %51 = vector.broadcast %21 : vector<1x128xf32> to vector<32x128xf32>
    %52 = arith.mulf %51, %46 : vector<32x128xf32>
    %53 = arith.index_cast %50 : i32 to index
    %c0_37 = arith.constant 0 : index
    %54 = vector.load %arg16[%53, %c0_37] : memref<256x128xf32, #tpu.memory_space<vmem>>, vector<32x128xf32>
    %55 = arith.addf %52, %54 : vector<32x128xf32>
    %56 = arith.index_cast %50 : i32 to index
    %c0_38 = arith.constant 0 : index
    %57 = vector.load %arg16[%56, %c0_38] : memref<256x128xf32, #tpu.memory_space<vmem>>, vector<32x128xf32>
    tpu.vector_store %arg16[%56, %c0_38], %55 {strides = array<i32>} : memref<256x128xf32, #tpu.memory_space<vmem>>, vector<32x128xf32>,
    %c3_i32 = arith.constant 3 : i32
    %c32_i32_39 = arith.constant 32 : i32
    %58 = arith.muli %c3_i32, %c32_i32_39 : i32
    %59 = tpu.assume_multiple %58, 32 : i32
    %60 = vector.broadcast %21 : vector<1x128xf32> to vector<32x128xf32>
    %61 = arith.mulf %60, %55 : vector<32x128xf32>
    %62 = arith.index_cast %59 : i32 to index
    %c0_40 = arith.constant 0 : index
    %63 = vector.load %arg16[%62, %c0_40] : memref<256x128xf32, #tpu.memory_space<vmem>>, vector<32x128xf32>
    %64 = arith.addf %61, %63 : vector<32x128xf32>
    %65 = arith.index_cast %59 : i32 to index
    %c0_41 = arith.constant 0 : index
    %66 = vector.load %arg16[%65, %c0_41] : memref<256x128xf32, #tpu.memory_space<vmem>>, vector<32x128xf32>
    tpu.vector_store %arg16[%65, %c0_41], %64 {strides = array<i32>} : memref<256x128xf32, #tpu.memory_space<vmem>>, vector<32x128xf32>,
    %c4_i32 = arith.constant 4 : i32
    %c32_i32_42 = arith.constant 32 : i32
    %67 = arith.muli %c4_i32, %c32_i32_42 : i32
    %68 = tpu.assume_multiple %67, 32 : i32
    %69 = vector.broadcast %21 : vector<1x128xf32> to vector<32x128xf32>
    %70 = arith.mulf %69, %64 : vector<32x128xf32>
    %71 = arith.index_cast %68 : i32 to index
    %c0_43 = arith.constant 0 : index
    %72 = vector.load %arg16[%71, %c0_43] : memref<256x128xf32, #tpu.memory_space<vmem>>, vector<32x128xf32>
    %73 = arith.addf %70, %72 : vector<32x128xf32>
    %74 = arith.index_cast %68 : i32 to index
    %c0_44 = arith.constant 0 : index
    %75 = vector.load %arg16[%74, %c0_44] : memref<256x128xf32, #tpu.memory_space<vmem>>, vector<32x128xf32>
    tpu.vector_store %arg16[%74, %c0_44], %73 {strides = array<i32>} : memref<256x128xf32, #tpu.memory_space<vmem>>, vector<32x128xf32>,
    %c5_i32 = arith.constant 5 : i32
    %c32_i32_45 = arith.constant 32 : i32
    %76 = arith.muli %c5_i32, %c32_i32_45 : i32
    %77 = tpu.assume_multiple %76, 32 : i32
    %78 = vector.broadcast %21 : vector<1x128xf32> to vector<32x128xf32>
    %79 = arith.mulf %78, %73 : vector<32x128xf32>
    %80 = arith.index_cast %77 : i32 to index
    %c0_46 = arith.constant 0 : index
    %81 = vector.load %arg16[%80, %c0_46] : memref<256x128xf32, #tpu.memory_space<vmem>>, vector<32x128xf32>
    %82 = arith.addf %79, %81 : vector<32x128xf32>
    %83 = arith.index_cast %77 : i32 to index
    %c0_47 = arith.constant 0 : index
    %84 = vector.load %arg16[%83, %c0_47] : memref<256x128xf32, #tpu.memory_space<vmem>>, vector<32x128xf32>
    tpu.vector_store %arg16[%83, %c0_47], %82 {strides = array<i32>} : memref<256x128xf32, #tpu.memory_space<vmem>>, vector<32x128xf32>,
    %c6_i32 = arith.constant 6 : i32
    %c32_i32_48 = arith.constant 32 : i32
    %85 = arith.muli %c6_i32, %c32_i32_48 : i32
    %86 = tpu.assume_multiple %85, 32 : i32
    %87 = vector.broadcast %21 : vector<1x128xf32> to vector<32x128xf32>
    %88 = arith.mulf %87, %82 : vector<32x128xf32>
    %89 = arith.index_cast %86 : i32 to index
    %c0_49 = arith.constant 0 : index
    %90 = vector.load %arg16[%89, %c0_49] : memref<256x128xf32, #tpu.memory_space<vmem>>, vector<32x128xf32>
    %91 = arith.addf %88, %90 : vector<32x128xf32>
    %92 = arith.index_cast %86 : i32 to index
    %c0_50 = arith.constant 0 : index
    %93 = vector.load %arg16[%92, %c0_50] : memref<256x128xf32, #tpu.memory_space<vmem>>, vector<32x128xf32>
    tpu.vector_store %arg16[%92, %c0_50], %91 {strides = array<i32>} : memref<256x128xf32, #tpu.memory_space<vmem>>, vector<32x128xf32>,
    %c7_i32 = arith.constant 7 : i32
    %c32_i32_51 = arith.constant 32 : i32
    %94 = arith.muli %c7_i32, %c32_i32_51 : i32
    %95 = tpu.assume_multiple %94, 32 : i32
    %96 = vector.broadcast %21 : vector<1x128xf32> to vector<32x128xf32>
    %97 = arith.mulf %96, %91 : vector<32x128xf32>
    %98 = arith.index_cast %95 : i32 to index
    %c0_52 = arith.constant 0 : index
    %99 = vector.load %arg16[%98, %c0_52] : memref<256x128xf32, #tpu.memory_space<vmem>>, vector<32x128xf32>
    %100 = arith.addf %97, %99 : vector<32x128xf32>
    %101 = arith.index_cast %95 : i32 to index
    %c0_53 = arith.constant 0 : index
    %102 = vector.load %arg16[%101, %c0_53] : memref<256x128xf32, #tpu.memory_space<vmem>>, vector<32x128xf32>
    tpu.vector_store %arg16[%101, %c0_53], %100 {strides = array<i32>} : memref<256x128xf32, #tpu.memory_space<vmem>>, vector<32x128xf32>,
    %c8_i32 = arith.constant 8 : i32
    %c0_54 = arith.constant 0 : index
    %c0_55 = arith.constant 0 : index
    %103 = vector.load %arg16[%c0_54, %c0_55] : memref<256x128xf32, #tpu.memory_space<vmem>>, vector<256x128xf32>
    %104 = arith.truncf %103 : vector<256x128xf32> to vector<256x128xbf16>
    %c0_56 = arith.constant 0 : index
    %c0_57 = arith.constant 0 : index
    %c0_58 = arith.constant 0 : index
    %105 = vector.load %arg8[%c0_56, %c0_57, %c0_58] : memref<2x128x128xbf16, #tpu.memory_space<vmem>>, vector<1x128x128xbf16>
    %106 = vector.shape_cast %105 : vector<1x128x128xbf16> to vector<128x128xbf16>
    %cst_59 = arith.constant dense<0.000000e+00> : vector<256x128xf32>
    %107 = tpu.matmul %104, %106, %cst_59 {dimension_numbers = #tpu.dot_dimension_numbers<[1], [0], [0], [1], [0, 0, 1, 1], [], []>} : vector<256x128xbf16>, vector<128x128xbf16>, vector<256x128xf32> -> vector<256x128xf32>
    %c0_60 = arith.constant 0 : index
    %c0_61 = arith.constant 0 : index
    %108 = vector.load %arg15[%c0_60, %c0_61] : memref<256x128xf32, #tpu.memory_space<vmem>>, vector<256x128xf32>
    %109 = vector.broadcast %23 : vector<1x128xf32> to vector<256x128xf32>
    %110 = arith.mulf %109, %108 : vector<256x128xf32>
    %111 = arith.addf %107, %110 : vector<256x128xf32>
    %112 = arith.mulf %111, %111 : vector<256x128xf32>
    %113 = arith.mulf %111, %112 : vector<256x128xf32>
    %cst_62 = arith.constant 4.471500e-02 : f32
    %114 = vector.broadcast %cst_62 : f32 to vector<256x128xf32>
    %115 = arith.mulf %114, %113 : vector<256x128xf32>
    %116 = arith.addf %111, %115 : vector<256x128xf32>
    %cst_63 = arith.constant 0.797884583 : f32
    %117 = vector.broadcast %cst_63 : f32 to vector<256x128xf32>
    %118 = arith.mulf %117, %116 : vector<256x128xf32>
    %119 = math.tanh %118 : vector<256x128xf32>
    %cst_64 = arith.constant 1.000000e+00 : f32
    %120 = vector.broadcast %cst_64 : f32 to vector<256x128xf32>
    %121 = arith.addf %120, %119 : vector<256x128xf32>
    %cst_65 = arith.constant 5.000000e-01 : f32
    %122 = vector.broadcast %cst_65 : f32 to vector<256x128xf32>
    %123 = arith.mulf %122, %121 : vector<256x128xf32>
    %124 = arith.mulf %111, %123 : vector<256x128xf32>
    %125 = arith.addf %124, %108 : vector<256x128xf32>
    %c0_66 = arith.constant 0 : index
    %c0_67 = arith.constant 0 : index
    %126 = vector.load %arg15[%c0_66, %c0_67] : memref<256x128xf32, #tpu.memory_space<vmem>>, vector<256x128xf32>
    tpu.vector_store %arg15[%c0_66, %c0_67], %125 {strides = array<i32>} : memref<256x128xf32, #tpu.memory_space<vmem>>, vector<256x128xf32>,
    %c1 = arith.constant 1 : index
    %c0_68 = arith.constant 0 : index
    %c0_69 = arith.constant 0 : index
    %127 = vector.load %arg6[%c1, %c0_68, %c0_69] : memref<2x1x128xf32, #tpu.memory_space<vmem>>, vector<1x1x128xf32>
    %128 = vector.shape_cast %127 : vector<1x1x128xf32> to vector<1x128xf32>
    %c1_70 = arith.constant 1 : index
    %c0_71 = arith.constant 0 : index
    %c0_72 = arith.constant 0 : index
    %129 = vector.load %arg9[%c1_70, %c0_71, %c0_72] : memref<2x1x128xf32, #tpu.memory_space<vmem>>, vector<1x1x128xf32>
    %130 = vector.shape_cast %129 : vector<1x1x128xf32> to vector<1x128xf32>
    %c0_73 = arith.constant 0 : index
    %c0_74 = arith.constant 0 : index
    %131 = vector.load %arg15[%c0_73, %c0_74] : memref<256x128xf32, #tpu.memory_space<vmem>>, vector<256x128xf32>
    %132 = arith.truncf %131 : vector<256x128xf32> to vector<256x128xbf16>
    %c1_75 = arith.constant 1 : index
    %c0_76 = arith.constant 0 : index
    %c0_77 = arith.constant 0 : index
    %133 = vector.load %arg7[%c1_75, %c0_76, %c0_77] : memref<2x128x128xbf16, #tpu.memory_space<vmem>>, vector<1x128x128xbf16>
    %134 = vector.shape_cast %133 : vector<1x128x128xbf16> to vector<128x128xbf16>
    %cst_78 = arith.constant dense<0.000000e+00> : vector<256x128xf32>
    %135 = tpu.matmul %132, %134, %cst_78 {dimension_numbers = #tpu.dot_dimension_numbers<[1], [0], [0], [1], [0, 0, 1, 1], [], []>} : vector<256x128xbf16>, vector<128x128xbf16>, vector<256x128xf32> -> vector<256x128xf32>
    %c0_79 = arith.constant 0 : index
    %c0_80 = arith.constant 0 : index
    %136 = vector.load %arg16[%c0_79, %c0_80] : memref<256x128xf32, #tpu.memory_space<vmem>>, vector<256x128xf32>
    tpu.vector_store %arg16[%c0_79, %c0_80], %135 {strides = array<i32>} : memref<256x128xf32, #tpu.memory_space<vmem>>, vector<256x128xf32>,
    %cst_81 = arith.constant 0.000000e+00 : f32
    %137 = vector.broadcast %cst_81 : f32 to vector<32x128xf32>
    %c0_i32_82 = arith.constant 0 : i32
    %c32_i32_83 = arith.constant 32 : i32
    %138 = arith.muli %c0_i32_82, %c32_i32_83 : i32
    %139 = tpu.assume_multiple %138, 32 : i32
    %140 = vector.broadcast %128 : vector<1x128xf32> to vector<32x128xf32>
    %141 = arith.mulf %140, %137 : vector<32x128xf32>
    %142 = arith.index_cast %139 : i32 to index
    %c0_84 = arith.constant 0 : index
    %143 = vector.load %arg16[%142, %c0_84] : memref<256x128xf32, #tpu.memory_space<vmem>>, vector<32x128xf32>
    %144 = arith.addf %141, %143 : vector<32x128xf32>
    %145 = arith.index_cast %139 : i32 to index
    %c0_85 = arith.constant 0 : index
    %146 = vector.load %arg16[%145, %c0_85] : memref<256x128xf32, #tpu.memory_space<vmem>>, vector<32x128xf32>
    tpu.vector_store %arg16[%145, %c0_85], %144 {strides = array<i32>} : memref<256x128xf32, #tpu.memory_space<vmem>>, vector<32x128xf32>,
    %c1_i32_86 = arith.constant 1 : i32
    %c32_i32_87 = arith.constant 32 : i32
    %147 = arith.muli %c1_i32_86, %c32_i32_87 : i32
    %148 = tpu.assume_multiple %147, 32 : i32
    %149 = vector.broadcast %128 : vector<1x128xf32> to vector<32x128xf32>
    %150 = arith.mulf %149, %144 : vector<32x128xf32>
    %151 = arith.index_cast %148 : i32 to index
    %c0_88 = arith.constant 0 : index
    %152 = vector.load %arg16[%151, %c0_88] : memref<256x128xf32, #tpu.memory_space<vmem>>, vector<32x128xf32>
    %153 = arith.addf %150, %152 : vector<32x128xf32>
    %154 = arith.index_cast %148 : i32 to index
    %c0_89 = arith.constant 0 : index
    %155 = vector.load %arg16[%154, %c0_89] : memref<256x128xf32, #tpu.memory_space<vmem>>, vector<32x128xf32>
    tpu.vector_store %arg16[%154, %c0_89], %153 {strides = array<i32>} : memref<256x128xf32, #tpu.memory_space<vmem>>, vector<32x128xf32>,
    %c2_i32_90 = arith.constant 2 : i32
    %c32_i32_91 = arith.constant 32 : i32
    %156 = arith.muli %c2_i32_90, %c32_i32_91 : i32
    %157 = tpu.assume_multiple %156, 32 : i32
    %158 = vector.broadcast %128 : vector<1x128xf32> to vector<32x128xf32>
    %159 = arith.mulf %158, %153 : vector<32x128xf32>
    %160 = arith.index_cast %157 : i32 to index
    %c0_92 = arith.constant 0 : index
    %161 = vector.load %arg16[%160, %c0_92] : memref<256x128xf32, #tpu.memory_space<vmem>>, vector<32x128xf32>
    %162 = arith.addf %159, %161 : vector<32x128xf32>
    %163 = arith.index_cast %157 : i32 to index
    %c0_93 = arith.constant 0 : index
    %164 = vector.load %arg16[%163, %c0_93] : memref<256x128xf32, #tpu.memory_space<vmem>>, vector<32x128xf32>
    tpu.vector_store %arg16[%163, %c0_93], %162 {strides = array<i32>} : memref<256x128xf32, #tpu.memory_space<vmem>>, vector<32x128xf32>,
    %c3_i32_94 = arith.constant 3 : i32
    %c32_i32_95 = arith.constant 32 : i32
    %165 = arith.muli %c3_i32_94, %c32_i32_95 : i32
    %166 = tpu.assume_multiple %165, 32 : i32
    %167 = vector.broadcast %128 : vector<1x128xf32> to vector<32x128xf32>
    %168 = arith.mulf %167, %162 : vector<32x128xf32>
    %169 = arith.index_cast %166 : i32 to index
    %c0_96 = arith.constant 0 : index
    %170 = vector.load %arg16[%169, %c0_96] : memref<256x128xf32, #tpu.memory_space<vmem>>, vector<32x128xf32>
    %171 = arith.addf %168, %170 : vector<32x128xf32>
    %172 = arith.index_cast %166 : i32 to index
    %c0_97 = arith.constant 0 : index
    %173 = vector.load %arg16[%172, %c0_97] : memref<256x128xf32, #tpu.memory_space<vmem>>, vector<32x128xf32>
    tpu.vector_store %arg16[%172, %c0_97], %171 {strides = array<i32>} : memref<256x128xf32, #tpu.memory_space<vmem>>, vector<32x128xf32>,
    %c4_i32_98 = arith.constant 4 : i32
    %c32_i32_99 = arith.constant 32 : i32
    %174 = arith.muli %c4_i32_98, %c32_i32_99 : i32
    %175 = tpu.assume_multiple %174, 32 : i32
    %176 = vector.broadcast %128 : vector<1x128xf32> to vector<32x128xf32>
    %177 = arith.mulf %176, %171 : vector<32x128xf32>
    %178 = arith.index_cast %175 : i32 to index
    %c0_100 = arith.constant 0 : index
    %179 = vector.load %arg16[%178, %c0_100] : memref<256x128xf32, #tpu.memory_space<vmem>>, vector<32x128xf32>
    %180 = arith.addf %177, %179 : vector<32x128xf32>
    %181 = arith.index_cast %175 : i32 to index
    %c0_101 = arith.constant 0 : index
    %182 = vector.load %arg16[%181, %c0_101] : memref<256x128xf32, #tpu.memory_space<vmem>>, vector<32x128xf32>
    tpu.vector_store %arg16[%181, %c0_101], %180 {strides = array<i32>} : memref<256x128xf32, #tpu.memory_space<vmem>>, vector<32x128xf32>,
    %c5_i32_102 = arith.constant 5 : i32
    %c32_i32_103 = arith.constant 32 : i32
    %183 = arith.muli %c5_i32_102, %c32_i32_103 : i32
    %184 = tpu.assume_multiple %183, 32 : i32
    %185 = vector.broadcast %128 : vector<1x128xf32> to vector<32x128xf32>
    %186 = arith.mulf %185, %180 : vector<32x128xf32>
    %187 = arith.index_cast %184 : i32 to index
    %c0_104 = arith.constant 0 : index
    %188 = vector.load %arg16[%187, %c0_104] : memref<256x128xf32, #tpu.memory_space<vmem>>, vector<32x128xf32>
    %189 = arith.addf %186, %188 : vector<32x128xf32>
    %190 = arith.index_cast %184 : i32 to index
    %c0_105 = arith.constant 0 : index
    %191 = vector.load %arg16[%190, %c0_105] : memref<256x128xf32, #tpu.memory_space<vmem>>, vector<32x128xf32>
    tpu.vector_store %arg16[%190, %c0_105], %189 {strides = array<i32>} : memref<256x128xf32, #tpu.memory_space<vmem>>, vector<32x128xf32>,
    %c6_i32_106 = arith.constant 6 : i32
    %c32_i32_107 = arith.constant 32 : i32
    %192 = arith.muli %c6_i32_106, %c32_i32_107 : i32
    %193 = tpu.assume_multiple %192, 32 : i32
    %194 = vector.broadcast %128 : vector<1x128xf32> to vector<32x128xf32>
    %195 = arith.mulf %194, %189 : vector<32x128xf32>
    %196 = arith.index_cast %193 : i32 to index
    %c0_108 = arith.constant 0 : index
    %197 = vector.load %arg16[%196, %c0_108] : memref<256x128xf32, #tpu.memory_space<vmem>>, vector<32x128xf32>
    %198 = arith.addf %195, %197 : vector<32x128xf32>
    %199 = arith.index_cast %193 : i32 to index
    %c0_109 = arith.constant 0 : index
    %200 = vector.load %arg16[%199, %c0_109] : memref<256x128xf32, #tpu.memory_space<vmem>>, vector<32x128xf32>
    tpu.vector_store %arg16[%199, %c0_109], %198 {strides = array<i32>} : memref<256x128xf32, #tpu.memory_space<vmem>>, vector<32x128xf32>,
    %c7_i32_110 = arith.constant 7 : i32
    %c32_i32_111 = arith.constant 32 : i32
    %201 = arith.muli %c7_i32_110, %c32_i32_111 : i32
    %202 = tpu.assume_multiple %201, 32 : i32
    %203 = vector.broadcast %128 : vector<1x128xf32> to vector<32x128xf32>
    %204 = arith.mulf %203, %198 : vector<32x128xf32>
    %205 = arith.index_cast %202 : i32 to index
    %c0_112 = arith.constant 0 : index
    %206 = vector.load %arg16[%205, %c0_112] : memref<256x128xf32, #tpu.memory_space<vmem>>, vector<32x128xf32>
    %207 = arith.addf %204, %206 : vector<32x128xf32>
    %208 = arith.index_cast %202 : i32 to index
    %c0_113 = arith.constant 0 : index
    %209 = vector.load %arg16[%208, %c0_113] : memref<256x128xf32, #tpu.memory_space<vmem>>, vector<32x128xf32>
    tpu.vector_store %arg16[%208, %c0_113], %207 {strides = array<i32>} : memref<256x128xf32, #tpu.memory_space<vmem>>, vector<32x128xf32>,
    %c8_i32_114 = arith.constant 8 : i32
    %c0_115 = arith.constant 0 : index
    %c0_116 = arith.constant 0 : index
    %210 = vector.load %arg16[%c0_115, %c0_116] : memref<256x128xf32, #tpu.memory_space<vmem>>, vector<256x128xf32>
    %211 = arith.truncf %210 : vector<256x128xf32> to vector<256x128xbf16>
    %c1_117 = arith.constant 1 : index
    %c0_118 = arith.constant 0 : index
    %c0_119 = arith.constant 0 : index
    %212 = vector.load %arg8[%c1_117, %c0_118, %c0_119] : memref<2x128x128xbf16, #tpu.memory_space<vmem>>, vector<1x128x128xbf16>
    %213 = vector.shape_cast %212 : vector<1x128x128xbf16> to vector<128x128xbf16>
    %cst_120 = arith.constant dense<0.000000e+00> : vector<256x128xf32>
    %214 = tpu.matmul %211, %213, %cst_120 {dimension_numbers = #tpu.dot_dimension_numbers<[1], [0], [0], [1], [0, 0, 1, 1], [], []>} : vector<256x128xbf16>, vector<128x128xbf16>, vector<256x128xf32> -> vector<256x128xf32>
    %c0_121 = arith.constant 0 : index
    %c0_122 = arith.constant 0 : index
    %215 = vector.load %arg15[%c0_121, %c0_122] : memref<256x128xf32, #tpu.memory_space<vmem>>, vector<256x128xf32>
    %216 = vector.broadcast %130 : vector<1x128xf32> to vector<256x128xf32>
    %217 = arith.mulf %216, %215 : vector<256x128xf32>
    %218 = arith.addf %214, %217 : vector<256x128xf32>
    %219 = arith.mulf %218, %218 : vector<256x128xf32>
    %220 = arith.mulf %218, %219 : vector<256x128xf32>
    %cst_123 = arith.constant 4.471500e-02 : f32
    %221 = vector.broadcast %cst_123 : f32 to vector<256x128xf32>
    %222 = arith.mulf %221, %220 : vector<256x128xf32>
    %223 = arith.addf %218, %222 : vector<256x128xf32>
    %cst_124 = arith.constant 0.797884583 : f32
    %224 = vector.broadcast %cst_124 : f32 to vector<256x128xf32>
    %225 = arith.mulf %224, %223 : vector<256x128xf32>
    %226 = math.tanh %225 : vector<256x128xf32>
    %cst_125 = arith.constant 1.000000e+00 : f32
    %227 = vector.broadcast %cst_125 : f32 to vector<256x128xf32>
    %228 = arith.addf %227, %226 : vector<256x128xf32>
    %cst_126 = arith.constant 5.000000e-01 : f32
    %229 = vector.broadcast %cst_126 : f32 to vector<256x128xf32>
    %230 = arith.mulf %229, %228 : vector<256x128xf32>
    %231 = arith.mulf %218, %230 : vector<256x128xf32>
    %232 = arith.addf %231, %215 : vector<256x128xf32>
    %c0_127 = arith.constant 0 : index
    %c0_128 = arith.constant 0 : index
    %233 = vector.load %arg15[%c0_127, %c0_128] : memref<256x128xf32, #tpu.memory_space<vmem>>, vector<256x128xf32>
    tpu.vector_store %arg15[%c0_127, %c0_128], %232 {strides = array<i32>} : memref<256x128xf32, #tpu.memory_space<vmem>>, vector<256x128xf32>,
    %cst_129 = arith.constant 0.000000e+00 : f32
    %234 = vector.broadcast %cst_129 : f32 to vector<32x128xf32>
    %c0_i32_130 = arith.constant 0 : i32
    %c32_i32_131 = arith.constant 32 : i32
    %235 = arith.muli %c0_i32_130, %c32_i32_131 : i32
    %236 = tpu.assume_multiple %235, 32 : i32
    %237 = arith.index_cast %236 : i32 to index
    %c0_132 = arith.constant 0 : index
    %238 = vector.load %arg15[%237, %c0_132] : memref<256x128xf32, #tpu.memory_space<vmem>>, vector<32x128xf32>
    %239 = arith.addf %234, %238 : vector<32x128xf32>
    %c1_i32_133 = arith.constant 1 : i32
    %c32_i32_134 = arith.constant 32 : i32
    %240 = arith.muli %c1_i32_133, %c32_i32_134 : i32
    %241 = tpu.assume_multiple %240, 32 : i32
    %242 = arith.index_cast %241 : i32 to index
    %c0_135 = arith.constant 0 : index
    %243 = vector.load %arg15[%242, %c0_135] : memref<256x128xf32, #tpu.memory_space<vmem>>, vector<32x128xf32>
    %244 = arith.addf %239, %243 : vector<32x128xf32>
    %c2_i32_136 = arith.constant 2 : i32
    %c32_i32_137 = arith.constant 32 : i32
    %245 = arith.muli %c2_i32_136, %c32_i32_137 : i32
    %246 = tpu.assume_multiple %245, 32 : i32
    %247 = arith.index_cast %246 : i32 to index
    %c0_138 = arith.constant 0 : index
    %248 = vector.load %arg15[%247, %c0_138] : memref<256x128xf32, #tpu.memory_space<vmem>>, vector<32x128xf32>
    %249 = arith.addf %244, %248 : vector<32x128xf32>
    %c3_i32_139 = arith.constant 3 : i32
    %c32_i32_140 = arith.constant 32 : i32
    %250 = arith.muli %c3_i32_139, %c32_i32_140 : i32
    %251 = tpu.assume_multiple %250, 32 : i32
    %252 = arith.index_cast %251 : i32 to index
    %c0_141 = arith.constant 0 : index
    %253 = vector.load %arg15[%252, %c0_141] : memref<256x128xf32, #tpu.memory_space<vmem>>, vector<32x128xf32>
    %254 = arith.addf %249, %253 : vector<32x128xf32>
    %c4_i32_142 = arith.constant 4 : i32
    %c32_i32_143 = arith.constant 32 : i32
    %255 = arith.muli %c4_i32_142, %c32_i32_143 : i32
    %256 = tpu.assume_multiple %255, 32 : i32
    %257 = arith.index_cast %256 : i32 to index
    %c0_144 = arith.constant 0 : index
    %258 = vector.load %arg15[%257, %c0_144] : memref<256x128xf32, #tpu.memory_space<vmem>>, vector<32x128xf32>
    %259 = arith.addf %254, %258 : vector<32x128xf32>
    %c5_i32_145 = arith.constant 5 : i32
    %c32_i32_146 = arith.constant 32 : i32
    %260 = arith.muli %c5_i32_145, %c32_i32_146 : i32
    %261 = tpu.assume_multiple %260, 32 : i32
    %262 = arith.index_cast %261 : i32 to index
    %c0_147 = arith.constant 0 : index
    %263 = vector.load %arg15[%262, %c0_147] : memref<256x128xf32, #tpu.memory_space<vmem>>, vector<32x128xf32>
    %264 = arith.addf %259, %263 : vector<32x128xf32>
    %c6_i32_148 = arith.constant 6 : i32
    %c32_i32_149 = arith.constant 32 : i32
    %265 = arith.muli %c6_i32_148, %c32_i32_149 : i32
    %266 = tpu.assume_multiple %265, 32 : i32
    %267 = arith.index_cast %266 : i32 to index
    %c0_150 = arith.constant 0 : index
    %268 = vector.load %arg15[%267, %c0_150] : memref<256x128xf32, #tpu.memory_space<vmem>>, vector<32x128xf32>
    %269 = arith.addf %264, %268 : vector<32x128xf32>
    %c7_i32_151 = arith.constant 7 : i32
    %c32_i32_152 = arith.constant 32 : i32
    %270 = arith.muli %c7_i32_151, %c32_i32_152 : i32
    %271 = tpu.assume_multiple %270, 32 : i32
    %272 = arith.index_cast %271 : i32 to index
    %c0_153 = arith.constant 0 : index
    %273 = vector.load %arg15[%272, %c0_153] : memref<256x128xf32, #tpu.memory_space<vmem>>, vector<32x128xf32>
    %274 = arith.addf %269, %273 : vector<32x128xf32>
    %c8_i32_154 = arith.constant 8 : i32
    %cst_155 = arith.constant 1.250000e-01 : f32
    %275 = vector.broadcast %cst_155 : f32 to vector<32x128xf32>
    %276 = arith.mulf %274, %275 : vector<32x128xf32>
    %277 = vector.extract_strided_slice %276 {offsets = [0, 0], sizes = [8, 128], strides = [1, 1]} : vector<32x128xf32> to vector<8x128xf32>
    %278 = arith.truncf %277 : vector<8x128xf32> to vector<8x128xbf16>
    %c0_156 = arith.constant 0 : index
    %c0_157 = arith.constant 0 : index
    %c0_158 = arith.constant 0 : index
    %279 = vector.load %arg10[%c0_156, %c0_157, %c0_158] : memref<4x128x128xbf16, #tpu.memory_space<vmem>>, vector<1x128x128xbf16>
    %280 = vector.shape_cast %279 : vector<1x128x128xbf16> to vector<128x128xbf16>
    %cst_159 = arith.constant dense<0.000000e+00> : vector<8x128xf32>
    %281 = tpu.matmul %278, %280, %cst_159 {dimension_numbers = #tpu.dot_dimension_numbers<[1], [0], [0], [1], [0, 0, 1, 1], [], []>} : vector<8x128xbf16>, vector<128x128xbf16>, vector<8x128xf32> -> vector<8x128xf32>
    %282 = vector.extract_strided_slice %276 {offsets = [8, 0], sizes = [8, 128], strides = [1, 1]} : vector<32x128xf32> to vector<8x128xf32>
    %283 = arith.truncf %282 : vector<8x128xf32> to vector<8x128xbf16>
    %c1_160 = arith.constant 1 : index
    %c0_161 = arith.constant 0 : index
    %c0_162 = arith.constant 0 : index
    %284 = vector.load %arg10[%c1_160, %c0_161, %c0_162] : memref<4x128x128xbf16, #tpu.memory_space<vmem>>, vector<1x128x128xbf16>
    %285 = vector.shape_cast %284 : vector<1x128x128xbf16> to vector<128x128xbf16>
    %cst_163 = arith.constant dense<0.000000e+00> : vector<8x128xf32>
    %286 = tpu.matmul %283, %285, %cst_163 {dimension_numbers = #tpu.dot_dimension_numbers<[1], [0], [0], [1], [0, 0, 1, 1], [], []>} : vector<8x128xbf16>, vector<128x128xbf16>, vector<8x128xf32> -> vector<8x128xf32>
    %287 = vector.extract_strided_slice %276 {offsets = [16, 0], sizes = [8, 128], strides = [1, 1]} : vector<32x128xf32> to vector<8x128xf32>
    %288 = arith.truncf %287 : vector<8x128xf32> to vector<8x128xbf16>
    %c2 = arith.constant 2 : index
    %c0_164 = arith.constant 0 : index
    %c0_165 = arith.constant 0 : index
    %289 = vector.load %arg10[%c2, %c0_164, %c0_165] : memref<4x128x128xbf16, #tpu.memory_space<vmem>>, vector<1x128x128xbf16>
    %290 = vector.shape_cast %289 : vector<1x128x128xbf16> to vector<128x128xbf16>
    %cst_166 = arith.constant dense<0.000000e+00> : vector<8x128xf32>
    %291 = tpu.matmul %288, %290, %cst_166 {dimension_numbers = #tpu.dot_dimension_numbers<[1], [0], [0], [1], [0, 0, 1, 1], [], []>} : vector<8x128xbf16>, vector<128x128xbf16>, vector<8x128xf32> -> vector<8x128xf32>
    %292 = vector.extract_strided_slice %276 {offsets = [24, 0], sizes = [8, 128], strides = [1, 1]} : vector<32x128xf32> to vector<8x128xf32>
    %293 = arith.truncf %292 : vector<8x128xf32> to vector<8x128xbf16>
    %c3 = arith.constant 3 : index
    %c0_167 = arith.constant 0 : index
    %c0_168 = arith.constant 0 : index
    %294 = vector.load %arg10[%c3, %c0_167, %c0_168] : memref<4x128x128xbf16, #tpu.memory_space<vmem>>, vector<1x128x128xbf16>
    %295 = vector.shape_cast %294 : vector<1x128x128xbf16> to vector<128x128xbf16>
    %cst_169 = arith.constant dense<0.000000e+00> : vector<8x128xf32>
    %296 = tpu.matmul %293, %295, %cst_169 {dimension_numbers = #tpu.dot_dimension_numbers<[1], [0], [0], [1], [0, 0, 1, 1], [], []>} : vector<8x128xbf16>, vector<128x128xbf16>, vector<8x128xf32> -> vector<8x128xf32>
    %297 = arith.addf %281, %286 : vector<8x128xf32>
    %298 = arith.addf %291, %296 : vector<8x128xf32>
    %299 = arith.addf %297, %298 : vector<8x128xf32>
    %c0_170 = arith.constant 0 : index
    %c0_171 = arith.constant 0 : index
    %300 = vector.load %arg11[%c0_170, %c0_171] : memref<1x128xf32, #tpu.memory_space<vmem>>, vector<1x128xf32>
    %301 = vector.broadcast %300 : vector<1x128xf32> to vector<8x128xf32>
    %302 = arith.addf %299, %301 : vector<8x128xf32>
    %cst_172 = arith.constant 0.000000e+00 : f32
    %303 = vector.broadcast %cst_172 : f32 to vector<8x128xf32>
    %304 = arith.cmpf oge, %302, %303 : vector<8x128xf32>
    %cst_173 = arith.constant 0.00999999977 : f32
    %305 = vector.broadcast %cst_173 : f32 to vector<8x128xf32>
    %306 = arith.mulf %305, %302 : vector<8x128xf32>
    %307 = arith.select %304, %302, %306 : vector<8x128xi1>, vector<8x128xf32>
    %308 = arith.truncf %307 : vector<8x128xf32> to vector<8x128xbf16>
    %c0_174 = arith.constant 0 : index
    %c0_175 = arith.constant 0 : index
    %309 = vector.load %arg12[%c0_174, %c0_175] : memref<128x128xbf16, #tpu.memory_space<vmem>>, vector<128x128xbf16>
    %cst_176 = arith.constant dense<0.000000e+00> : vector<8x128xf32>
    %310 = tpu.matmul %308, %309, %cst_176 {dimension_numbers = #tpu.dot_dimension_numbers<[1], [0], [0], [1], [0, 0, 1, 1], [], []>} : vector<8x128xbf16>, vector<128x128xbf16>, vector<8x128xf32> -> vector<8x128xf32>
    %c0_177 = arith.constant 0 : index
    %c0_178 = arith.constant 0 : index
    %311 = vector.load %arg13[%c0_177, %c0_178] : memref<1x128xf32, #tpu.memory_space<vmem>>, vector<1x128xf32>
    %312 = vector.broadcast %311 : vector<1x128xf32> to vector<8x128xf32>
    %313 = arith.addf %310, %312 : vector<8x128xf32>
    %c0_179 = arith.constant 0 : index
    %c0_180 = arith.constant 0 : index
    %314 = vector.load %arg14[%c0_179, %c0_180] : memref<8x128xf32, #tpu.memory_space<vmem>>, vector<8x128xf32>
    tpu.vector_store %arg14[%c0_179, %c0_180], %313 {strides = array<i32>} : memref<8x128xf32, #tpu.memory_space<vmem>>, vector<8x128xf32>,
    return
  }
  func.func @transform_0(%arg0: i32) -> (i32, i32, i32, i32) {
    %c0_i32 = arith.constant 0 : i32
    %c0_i32_0 = arith.constant 0 : i32
    %c0_i32_1 = arith.constant 0 : i32
    %c0_i32_2 = arith.constant 0 : i32
    return %c0_i32, %c0_i32_0, %arg0, %c0_i32_1 : i32, i32, i32, i32
  }
  func.func @transform_1(%arg0: i32) -> (i32, i32) {
    %c0_i32 = arith.constant 0 : i32
    %c0_i32_0 = arith.constant 0 : i32
    %c0_i32_1 = arith.constant 0 : i32
    return %c0_i32, %c0_i32_0 : i32, i32
  }
  func.func @transform_2(%arg0: i32) -> (i32, i32) {
    %c0_i32 = arith.constant 0 : i32
    %c0_i32_0 = arith.constant 0 : i32
    %c0_i32_1 = arith.constant 0 : i32
    return %c0_i32, %c0_i32_0 : i32, i32
  }
  func.func @transform_3(%arg0: i32) -> (i32, i32) {
    %c0_i32 = arith.constant 0 : i32
    %c0_i32_0 = arith.constant 0 : i32
    %c0_i32_1 = arith.constant 0 : i32
    return %c0_i32, %c0_i32_0 : i32, i32
  }
  func.func @transform_4(%arg0: i32) -> (i32, i32) {
    %c0_i32 = arith.constant 0 : i32
    %c0_i32_0 = arith.constant 0 : i32
    %c0_i32_1 = arith.constant 0 : i32
    return %c0_i32, %c0_i32_0 : i32, i32
  }
  func.func @transform_5(%arg0: i32) -> (i32, i32, i32) {
    %c0_i32 = arith.constant 0 : i32
    %c0_i32_0 = arith.constant 0 : i32
    %c0_i32_1 = arith.constant 0 : i32
    %c0_i32_2 = arith.constant 0 : i32
    return %c0_i32, %c0_i32_0, %c0_i32_1 : i32, i32, i32
  }
  func.func @transform_6(%arg0: i32) -> (i32, i32, i32) {
    %c0_i32 = arith.constant 0 : i32
    %c0_i32_0 = arith.constant 0 : i32
    %c0_i32_1 = arith.constant 0 : i32
    %c0_i32_2 = arith.constant 0 : i32
    return %c0_i32, %c0_i32_0, %c0_i32_1 : i32, i32, i32
  }
  func.func @transform_7(%arg0: i32) -> (i32, i32, i32) {
    %c0_i32 = arith.constant 0 : i32
    %c0_i32_0 = arith.constant 0 : i32
    %c0_i32_1 = arith.constant 0 : i32
    %c0_i32_2 = arith.constant 0 : i32
    return %c0_i32, %c0_i32_0, %c0_i32_1 : i32, i32, i32
  }
  func.func @transform_8(%arg0: i32) -> (i32, i32, i32) {
    %c0_i32 = arith.constant 0 : i32
    %c0_i32_0 = arith.constant 0 : i32
    %c0_i32_1 = arith.constant 0 : i32
    %c0_i32_2 = arith.constant 0 : i32
    return %c0_i32, %c0_i32_0, %c0_i32_1 : i32, i32, i32
  }
  func.func @transform_9(%arg0: i32) -> (i32, i32, i32) {
    %c0_i32 = arith.constant 0 : i32
    %c0_i32_0 = arith.constant 0 : i32
    %c0_i32_1 = arith.constant 0 : i32
    %c0_i32_2 = arith.constant 0 : i32
    return %c0_i32, %c0_i32_0, %c0_i32_1 : i32, i32, i32
  }
  func.func @transform_10(%arg0: i32) -> (i32, i32) {
    %c0_i32 = arith.constant 0 : i32
    %c0_i32_0 = arith.constant 0 : i32
    %c0_i32_1 = arith.constant 0 : i32
    return %c0_i32, %c0_i32_0 : i32, i32
  }
  func.func @transform_11(%arg0: i32) -> (i32, i32) {
    %c0_i32 = arith.constant 0 : i32
    %c0_i32_0 = arith.constant 0 : i32
    %c0_i32_1 = arith.constant 0 : i32
    return %c0_i32, %c0_i32_0 : i32, i32
  }
  func.func @transform_12(%arg0: i32) -> (i32, i32) {
    %c0_i32 = arith.constant 0 : i32
    %c0_i32_0 = arith.constant 0 : i32
    %c0_i32_1 = arith.constant 0 : i32
    return %c0_i32, %c0_i32_0 : i32, i32
  }
  func.func @transform_13(%arg0: i32) -> (i32, i32) {
    %c0_i32 = arith.constant 0 : i32
    %c0_i32_0 = arith.constant 0 : i32
    return %arg0, %c0_i32 : i32, i32
  }
}

</mosaic_0001>

<bundles_post_ra>
// kernel: tpu_custom_call.1
= control target key start
LH: loop header
LB: loop body
LE: loop exit
PB: predicated region body
PF: predicated region fallthrough
CT: control target
= control target key end

     0   :  { %s7118_s0 = inlined_call_operand.vmem [shape: f32[8,4,16,8], index: 0, kind: input, shape index: {}]   ;;  %s7119_s1 = inlined_call_operand.vmem [shape: bf16[8,128], index: 1, kind: input, shape index: {}]   ;;  %s7120_s2 = inlined_call_operand.vmem [shape: f32[1,128], index: 2, kind: input, shape index: {}]   ;;  %s7121_s3 = inlined_call_operand.vmem [shape: bf16[128,128], index: 3, kind: input, shape index: {}]   ;;  %s7122_s4 = inlined_call_operand.vmem [shape: f32[1,128], index: 4, kind: input, shape index: {}]   ;;  %s7123_s5 = inlined_call_operand.vmem [shape: f32[2,1,128], index: 5, kind: input, shape index: {}]   ;;  %s7124_s6 = inlined_call_operand.vmem [shape: bf16[2,128,128], index: 6, kind: input, shape index: {}]   ;;  %s7125_s7 = inlined_call_operand.vmem [shape: bf16[2,128,128], index: 7, kind: input, shape index: {}]   ;;  %s7126_s8 = inlined_call_operand.vmem [shape: f32[2,1,128], index: 8, kind: input, shape index: {}]   ;;  %s7127_s9 = inlined_call_operand.vmem [shape: bf16[4,128,128], index: 9, kind: input, shape index: {}]   ;;  %s7128_s10 = inlined_call_operand.vmem [shape: f32[1,128], index: 10, kind: input, shape index: {}]   ;;  %s7129_s11 = inlined_call_operand.vmem [shape: bf16[128,128], index: 11, kind: input, shape index: {}]   ;;  %s7130_s12 = inlined_call_operand.vmem [shape: f32[1,128], index: 12, kind: input, shape index: {}]   ;;  %s7131_s13 = inlined_call_operand.hbm [shape: f32[16,128], index: 13, kind: output, shape index: {}]  }
   0x1   :  { %7174 = sst [smem:[#allocation36_spill]] %s7118_s0 }
   0x2   :  { %7175 = sst [smem:[#allocation37_spill]] %s7119_s1 }
   0x3   :  { %18 = vsyncpa [#allocation6], 0 }
   0x4   :  { %20 = vsyncpa [#allocation6 + $0x1], 0  ;;  %s5364_s25 = smov 0   ;;  %s5366_s26 = smov 0  }
   0x5   :  { %s5368_s27 = smov 0   ;;  %s5370_s28 = smov 0  }
   0x6 LB: > { %s7132_s29 = sadd.s32 4294967295, %s5289_s28   ;;  %s4223_s30 = sadd.s32 4294967294, %s5289_s28   ;;  %s5289_s28 = sphi %s5370_s28, %s7283_s28   ;;  %s5285_s27 = sphi %s5368_s27, %s7282_s27   ;;  %s5281_s26 = sphi %s5366_s26, %s7281_s26   ;;  %s5277_s25 = sphi %s5364_s25, %s7280_s25  }
   0x7   : > { %s5387_s14 = sadd.s32 1, %s5289_s28   ;;  %s33_s15 = sadd.s32 1, %s5285_s27 }
   0x8   : > { %s30_s16 = ssub.s32 %s5289_s28, %s5387_s14  ;;  %p40_p0 = scmp.ne.s32.totalorder %s5285_s27, %s5281_s26 }
   0x9   : > { %p31_p1 = scmp.eq.s32.totalorder %s30_s16, 0  ;;  %p41_p2 = scmp.eq.s32.totalorder %s5289_s28, 0 }
   0xa   : > { %p322_p3 = scmp.eq.s32.totalorder %s7132_s29, 1  ;;  %p327_p4 = scmp.ne.s32.totalorder %s5281_s26, %s5277_s25 }
   0xb   : > { %s5400_s17 = scalar_select %p31_p1, %s5285_s27, %s33_s15  }
   0xc   : > { %p42_p5 = por %p41_p2, %p40_p0  ;;  %p5402_p6 = por %p322_p3, %p40_p0 }
   0xd   : > { %p328_p7 = scmp.eq.s32.totalorder %s4223_s30, 1  ;;  %p4225_p9 = scmp.ge.s32.totalorder %s5289_s28, 2 }
   0xf   : > { %p5406_p8 = por %p328_p7, %p327_p4  ;;  %380 = sbr.rel (%p4225_p9) target bundleno = 48 (0x30), region = 64 }
  0x16   : > { %383 = sbr.rel (!%p42_p5) target bundleno = 48 (0x30), region = 68  ;;  %s385_s20 = sand.u32 (%p42_p5), 1, %s5285_s27  }
  0x17   : > { %s4227_s21 = sshll.u32 (%p42_p5), %s5289_s28, 3  ;;  %s4226_s22 = sshll.u32 (%p42_p5), %s385_s20, 8 }
  0x18   : > { %s7178_s0 = sld [smem:[#allocation36_spill]] (%p42_p5)  ;;  %s5423_s30 = scalar_lea.vmem (%p42_p5), [#allocation4], %s4226_s22 }
  0x1e   : > { %s5418_s15 = scalar_lea.vmem %s7178_s0, %s4227_s21 }
  0x1f   : > { %v479_v0 = vld [vmem:[%s5418_s15] sm:$0xff]  ;;  %v481_v1 = vld [vmem:[%s5418_s15 + $0x10] sm:$0xff] }
  0x20   : > { %v483_v2 = vld [vmem:[%s5418_s15 + $0x20] sm:$0xff]  ;;  %480 = vst [vmem:[%s5423_s30] sm:$0xff] %v479_v0  ;;  %482 = vst [vmem:[%s5423_s30 + $0x8] sm:$0xff] %v481_v1  ;;  %v485_v3 = vld [vmem:[%s5418_s15 + $0x30] sm:$0xff] }
  0x21   : > { %484 = vst [vmem:[%s5423_s30 + $0x10] sm:$0xff] %v483_v2  ;;  %v487_v4 = vld [vmem:[%s5418_s15 + $0x40] sm:$0xff]  ;;  %v489_v5 = vld [vmem:[%s5418_s15 + $0x50] sm:$0xff]  ;;  %486 = vst [vmem:[%s5423_s30 + $0x18] sm:$0xff] %v485_v3 }
  0x22   : > { %488 = vst [vmem:[%s5423_s30 + $0x20] sm:$0xff] %v487_v4  ;;  %490 = vst [vmem:[%s5423_s30 + $0x28] sm:$0xff] %v489_v5  ;;  %v491_v6 = vld [vmem:[%s5418_s15 + $0x60] sm:$0xff]  ;;  %v493_v7 = vld [vmem:[%s5418_s15 + $0x70] sm:$0xff] }
  0x23   : > { %v495_v8 = vld [vmem:[%s5418_s15 + $0x80] sm:$0xff]  ;;  %492 = vst [vmem:[%s5423_s30 + $0x30] sm:$0xff] %v491_v6  ;;  %494 = vst [vmem:[%s5423_s30 + $0x38] sm:$0xff] %v493_v7  ;;  %v497_v9 = vld [vmem:[%s5418_s15 + $0x90] sm:$0xff] }
  0x24   : > { %496 = vst [vmem:[%s5423_s30 + $0x40] sm:$0xff] %v495_v8  ;;  %v499_v10 = vld [vmem:[%s5418_s15 + $0xa0] sm:$0xff]  ;;  %v501_v11 = vld [vmem:[%s5418_s15 + $0xb0] sm:$0xff]  ;;  %498 = vst [vmem:[%s5423_s30 + $0x48] sm:$0xff] %v497_v9 }
  0x25   : > { %500 = vst [vmem:[%s5423_s30 + $0x50] sm:$0xff] %v499_v10  ;;  %502 = vst [vmem:[%s5423_s30 + $0x58] sm:$0xff] %v501_v11  ;;  %v503_v12 = vld [vmem:[%s5418_s15 + $0xc0] sm:$0xff]  ;;  %v505_v13 = vld [vmem:[%s5418_s15 + $0xd0] sm:$0xff] }
  0x26   : > { %v507_v14 = vld [vmem:[%s5418_s15 + $0xe0] sm:$0xff]  ;;  %504 = vst [vmem:[%s5423_s30 + $0x60] sm:$0xff] %v503_v12  ;;  %506 = vst [vmem:[%s5423_s30 + $0x68] sm:$0xff] %v505_v13  ;;  %v509_v15 = vld [vmem:[%s5418_s15 + $0xf0] sm:$0xff] }
  0x27   : > { %508 = vst [vmem:[%s5423_s30 + $0x70] sm:$0xff] %v507_v14  ;;  %v511_v16 = vld [vmem:[%s5418_s15 + $0x100] sm:$0xff]  ;;  %v513_v17 = vld [vmem:[%s5418_s15 + $0x110] sm:$0xff]  ;;  %510 = vst [vmem:[%s5423_s30 + $0x78] sm:$0xff] %v509_v15 }
  0x28   : > { %512 = vst [vmem:[%s5423_s30 + $0x80] sm:$0xff] %v511_v16  ;;  %514 = vst [vmem:[%s5423_s30 + $0x88] sm:$0xff] %v513_v17  ;;  %v515_v18 = vld [vmem:[%s5418_s15 + $0x120] sm:$0xff]  ;;  %v517_v19 = vld [vmem:[%s5418_s15 + $0x130] sm:$0xff] }
  0x29   : > { %v519_v20 = vld [vmem:[%s5418_s15 + $0x140] sm:$0xff]  ;;  %516 = vst [vmem:[%s5423_s30 + $0x90] sm:$0xff] %v515_v18  ;;  %518 = vst [vmem:[%s5423_s30 + $0x98] sm:$0xff] %v517_v19  ;;  %v521_v21 = vld [vmem:[%s5418_s15 + $0x150] sm:$0xff] }
  0x2a   : > { %520 = vst [vmem:[%s5423_s30 + $0xa0] sm:$0xff] %v519_v20  ;;  %v523_v22 = vld [vmem:[%s5418_s15 + $0x160] sm:$0xff]  ;;  %v525_v23 = vld [vmem:[%s5418_s15 + $0x170] sm:$0xff]  ;;  %522 = vst [vmem:[%s5423_s30 + $0xa8] sm:$0xff] %v521_v21 }
  0x2b   : > { %524 = vst [vmem:[%s5423_s30 + $0xb0] sm:$0xff] %v523_v22  ;;  %526 = vst [vmem:[%s5423_s30 + $0xb8] sm:$0xff] %v525_v23  ;;  %v527_v24 = vld [vmem:[%s5418_s15 + $0x180] sm:$0xff]  ;;  %v529_v25 = vld [vmem:[%s5418_s15 + $0x190] sm:$0xff] }
  0x2c   : > { %v531_v26 = vld [vmem:[%s5418_s15 + $0x1a0] sm:$0xff]  ;;  %528 = vst [vmem:[%s5423_s30 + $0xc0] sm:$0xff] %v527_v24  ;;  %530 = vst [vmem:[%s5423_s30 + $0xc8] sm:$0xff] %v529_v25  ;;  %v533_v27 = vld [vmem:[%s5418_s15 + $0x1b0] sm:$0xff] }
  0x2d   : > { %532 = vst [vmem:[%s5423_s30 + $0xd0] sm:$0xff] %v531_v26  ;;  %v535_v28 = vld [vmem:[%s5418_s15 + $0x1c0] sm:$0xff]  ;;  %v537_v29 = vld [vmem:[%s5418_s15 + $0x1d0] sm:$0xff]  ;;  %534 = vst [vmem:[%s5423_s30 + $0xd8] sm:$0xff] %v533_v27 }
  0x2e   : > { %536 = vst [vmem:[%s5423_s30 + $0xe0] sm:$0xff] %v535_v28  ;;  %538 = vst [vmem:[%s5423_s30 + $0xe8] sm:$0xff] %v537_v29  ;;  %v539_v30 = vld [vmem:[%s5418_s15 + $0x1e0] sm:$0xff]  ;;  %v541_v31 = vld [vmem:[%s5418_s15 + $0x1f0] sm:$0xff] }
  0x2f   : > { %540 = vst [vmem:[%s5423_s30 + $0xf0] sm:$0xff] %v539_v30  ;;  %542 = vst [vmem:[%s5423_s30 + $0xf8] sm:$0xff] %v541_v31 }
  0x30 PF: > { %p4228_p10 = scmp.ge.s32.totalorder %s5289_s28, 1  ;;  %p547_p11 = scmp.lt.s32.totalorder %s5289_s28, 3 }
  0x32   : > { %p548_p12 = pnand %p4228_p10, %p547_p11 }
  0x34   : > { %551 = sbr.rel (%p548_p12) target bundleno = 2041 (0x7f9), region = 106 }
  0x3b   : > { %s7179_s1 = sld [smem:[#allocation37_spill]]  ;;  %vm703_vm0 = vcmask 1043456   ;;  %s5492_s21 = sand.u32 1, %s5281_s26   ;;  %v5019_v33 = vld [vmem:[%s7121_s3] sm:$0xff]   ;;  %v5020_v35 = vld [vmem:[%s7121_s3 + $0x8] sm:$0xff]   ;;  %vm654_vm1 = vcmask 64512  }
  0x3c   : > { %s4229_s24 = sshll.u32 %s5492_s21, 8  ;;  %4637 = vmatprep.subr.bf16.mxu1 %v5019_v33  ;;  %v5021_v53 = vld [vmem:[%s7121_s3 + $0x10] sm:$0xff]   ;;  %v5022_v56 = vld [vmem:[%s7121_s3 + $0x18] sm:$0xff]   ;;  %v5023_v57 = vld [vmem:[%s7121_s3 + $0x20] sm:$0xff]   ;;  %s4230_s20 = sshll.u32 %s5492_s21, 3 }
  0x3d   : > { %s5501_s16 = scalar_lea.vmem [#allocation4], %s4229_s24  ;;  %4638 = vmatpush3.bf16.msra.mxu1 %v5019_v33  ;;  %v5024_v23 = vld [vmem:[%s7121_s3 + $0x28] sm:$0xff]   ;;  %v5025_v24 = vld [vmem:[%s7121_s3 + $0x30] sm:$0xff]   ;;  %v5026_v25 = vld [vmem:[%s7121_s3 + $0x38] sm:$0xff]   ;;  %s7279_s24 = sadd.s32 4294967295, %s5289_s28  }
  0x3e   : > { %v598_v36 = vld [vmem:[%s5501_s16] sm:$0xff]  ;;  %v599_v37 = vld [vmem:[%s5501_s16 + $0x8] sm:$0xff]  ;;  %v600_v38 = vld [vmem:[%s5501_s16 + $0x10] sm:$0xff]  ;;  %4639 = vmatprep.subr.bf16.mxu1 %v5020_v35  ;;  %s596_s0 = scalar_lea.vmem [#allocation5], %s4230_s20  ;;  %s4145_s22 = scalar_lea.sflag [#allocation6], %s5492_s21 }
  0x3f   : > { %v630_v39 = vpack.c.bf16 %v599_v37, %v598_v36  ;;  %v601_v40 = vld [vmem:[%s5501_s16 + $0x18] sm:$0xff]  ;;  %v602_v41 = vld [vmem:[%s5501_s16 + $0x20] sm:$0xff]  ;;  %v603_v42 = vld [vmem:[%s5501_s16 + $0x28] sm:$0xff]  ;;  %s4158_s15 = sshll.u32 %s596_s0, 4  ;;  %s5293_s20 = smov [#allocation5]   ;;  %s7076_s15 = int_to_ptr.vmem [resolvable:$true] %s4158_s15 }
  0x40   : > { %v631_v43 = vpack.c.bf16 %v601_v40, %v600_v38  ;;  %v632_v44 = vpack.c.bf16 %v603_v42, %v602_v41  ;;  %v604_v45 = vld [vmem:[%s5501_s16 + $0x30] sm:$0xff]  ;;  %v605_v46 = vld [vmem:[%s5501_s16 + $0x38] sm:$0xff]  ;;  %v606_v47 = vld [vmem:[%s5501_s16 + $0x40] sm:$0xff]  ;;  %s5227_s23 = scalar_lea.vmem %s7076_s15, 128 }
  0x41   : > { %v646_v32 = vld [vmem:[%s7179_s1] sm:$0xf]  ;;  %4605 = vmatprep.mubr.msk.bf16.mxu0 %vm654_vm1, %v630_v39  ;;  %4640 = vmatpush3.bf16.msra.mxu1 %v5020_v35  ;;  %v607_v48 = vld [vmem:[%s5501_s16 + $0x48] sm:$0xff]  ;;  %v633_v49 = vpack.c.bf16 %v605_v46, %v604_v45  ;;  %v608_v51 = vld [vmem:[%s5501_s16 + $0x50] sm:$0xff]  ;;  %p5228_p13 = scmp.ne.s32.totalorder %s7076_s15, %s5227_s23 }
  0x42   : > { %4977 = vmatprep.subr.msk.bf16.mxu0 %vm703_vm0, %v646_v32  ;;  %v705_v34 = vsel %vm703_vm0, %v646_v32, 0  ;;  %v634_v50 = vpack.c.bf16 %v607_v48, %v606_v47  ;;  %v609_v52 = vld [vmem:[%s5501_s16 + $0x58] sm:$0xff]  ;;  %v610_v54 = vld [vmem:[%s5501_s16 + $0x60] sm:$0xff]  ;;  %v611_v55 = vld [vmem:[%s5501_s16 + $0x68] sm:$0xff]  ;;  %4641 = vmatprep.subr.bf16.mxu1 %v5021_v53 }
  0x43   : > { %4604 = vmatpush3.bf16.msra.mxu0 %v705_v34  ;;  %v635_v58 = vpack.c.bf16 %v609_v52, %v608_v51  ;;  %v636_v59 = vpack.c.bf16 %v611_v55, %v610_v54  ;;  %v612_v60 = vld [vmem:[%s5501_s16 + $0x70] sm:$0xff]  ;;  %v613_v61 = vld [vmem:[%s5501_s16 + $0x78] sm:$0xff]  ;;  %v614_v62 = vld [vmem:[%s5501_s16 + $0x80] sm:$0xff]  ;;  %p5229_p0 = pnand %p5228_p13, %p5402_p6 }
  0x44   : > { %v615_v63 = vld [vmem:[%s5501_s16 + $0x88] sm:$0xff]  ;;  %v637_v0 = vpack.c.bf16 %v613_v61, %v612_v60  ;;  %v616_v2 = vld [vmem:[%s5501_s16 + $0x90] sm:$0xff]  ;;  %v617_v3 = vld [vmem:[%s5501_s16 + $0x98] sm:$0xff] }
  0x45   : > { %4642 = vmatpush3.bf16.msra.mxu1 %v5021_v53  ;;  %v638_v1 = vpack.c.bf16 %v615_v63, %v614_v62  ;;  %v618_v4 = vld [vmem:[%s5501_s16 + $0xa0] sm:$0xff]  ;;  %v619_v5 = vld [vmem:[%s5501_s16 + $0xa8] sm:$0xff]  ;;  %v639_v6 = vpack.c.bf16 %v617_v3, %v616_v2  ;;  %v620_v8 = vld [vmem:[%s5501_s16 + $0xb0] sm:$0xff]  ;;  %p5230_p1 = pneg %p5229_p0 }
  0x46   : > { %4606 = vmatmul.mubr.msk.bf16.vlgmr.msra.gmra.mrb[0].mxu0 %vm654_vm1, %v631_v43  ;;  %4643 = vmatprep.subr.bf16.mxu1 %v5022_v56  ;;  %v640_v7 = vpack.c.bf16 %v619_v5, %v618_v4  ;;  %v621_v9 = vld [vmem:[%s5501_s16 + $0xb8] sm:$0xff]  ;;  %v622_v10 = vld [vmem:[%s5501_s16 + $0xc0] sm:$0xff]  ;;  %v623_v11 = vld [vmem:[%s5501_s16 + $0xc8] sm:$0xff] }
  0x47   : > { %4609 = vmatprep.mubr.msk.bf16.mxu0 %vm654_vm1, %v632_v44  ;;  %v641_v12 = vpack.c.bf16 %v621_v9, %v620_v8  ;;  %v642_v13 = vpack.c.bf16 %v623_v11, %v622_v10  ;;  %v624_v14 = vld [vmem:[%s5501_s16 + $0xd0] sm:$0xff]  ;;  %v625_v15 = vld [vmem:[%s5501_s16 + $0xd8] sm:$0xff]  ;;  %v626_v16 = vld [vmem:[%s5501_s16 + $0xe0] sm:$0xff] }
  0x48   : > { %v627_v17 = vld [vmem:[%s5501_s16 + $0xe8] sm:$0xff]  ;;  %v643_v18 = vpack.c.bf16 %v625_v15, %v624_v14  ;;  %v628_v20 = vld [vmem:[%s5501_s16 + $0xf0] sm:$0xff]  ;;  %v629_v21 = vld [vmem:[%s5501_s16 + $0xf8] sm:$0xff]  ;;  %s4418_s16 = sshll.u32 %s7279_s24, 7  ;;  %s5231_s24 = sshll.u32 %s5293_s20, 4  ;;  %s5232_s24 = int_to_ptr.vmem [resolvable:$false] %s5231_s24 }
  0x49   : > { %4644 = vmatpush3.bf16.msra.mxu1 %v5022_v56  ;;  %v644_v19 = vpack.c.bf16 %v627_v17, %v626_v16  ;;  %v645_v22 = vpack.c.bf16 %v629_v21, %v628_v20  ;;  %v5027_v26 = vld [vmem:[%s7124_s6] sm:$0xff]   ;;  %v5028_v27 = vld [vmem:[%s7124_s6 + $0x8] sm:$0xff]   ;;  %v5029_v28 = vld [vmem:[%s7124_s6 + $0x10] sm:$0xff]   ;;  %s7074_s1 = scalar_lea.hbm %s7131_s13, %s4418_s16  ;;  %s5233_s29 = scalar_lea.vmem %s5232_s24, 256 }
  0x4a   : > { %4645 = vmatprep.subr.bf16.mxu1 %v5023_v57  ;;  %4685 = vmatprep.subr.bf16.mxu0 %v5027_v26  ;;  %v5030_v29 = vld [vmem:[%s7124_s6 + $0x18] sm:$0xff]   ;;  %v5031_v30 = vld [vmem:[%s7124_s6 + $0x20] sm:$0xff]   ;;  %v5032_v31 = vld [vmem:[%s7124_s6 + $0x28] sm:$0xff]   ;;  %p5234_p2 = scmp.lt.s32.totalorder %s7076_s15, %s5232_s24  ;;  %p5235_p3 = scmp.lt.s32.totalorder %s5233_s29, %s5227_s23 }
  0x4b   : > { %4686 = vmatpush3.bf16.msra.mxu0 %v5027_v26  ;;  %v5033_v32 = vld [vmem:[%s7124_s6 + $0x30] sm:$0xff]   ;;  %v5593_v33 = vld [vmem:[%s7120_s2] ss:$0 sm:$0xff] }
  0x4c   : > { %4687 = vmatprep.subr.bf16.mxu0 %v5028_v27  ;;  %p5236_p4 = por %p5235_p3, %p5234_p2 }
  0x4d   : > { %4646 = vmatpush3.bf16.msra.mxu1 %v5023_v57 }
  0x4e   : > { %4610 = vmatmul.mubr.msk.bf16.gmra.mrb[4].mxu0 %vm654_vm1, %v633_v49  ;;  %4647 = vmatprep.subr.bf16.mxu1 %v5024_v23  ;;  %p5237_p5 = pnand %p5236_p4, %p5230_p1 }
  0x4f   : > { %4613 = vmatprep.mubr.msk.bf16.mxu0 %vm654_vm1, %v634_v50  ;;  %4688 = vmatpush3.bf16.msra.mxu0 %v5028_v27 }
  0x50   : > { %4689 = vmatprep.subr.bf16.mxu0 %v5029_v28 }
  0x51   : > { %4648 = vmatpush3.bf16.msra.mxu1 %v5024_v23 }
  0x52   : > { %4649 = vmatprep.subr.bf16.mxu1 %v5025_v24 }
  0x53   : > { %4690 = vmatpush3.bf16.msra.mxu0 %v5029_v28 }
  0x54   : > { %4691 = vmatprep.subr.bf16.mxu0 %v5030_v29 }
  0x55   : > { %4650 = vmatpush3.bf16.msra.mxu1 %v5025_v24 }
  0x56   : > { %4614 = vmatmul.mubr.msk.bf16.gmra.mrb[8].mxu0 %vm654_vm1, %v635_v58  ;;  %4651 = vmatprep.subr.bf16.mxu1 %v5026_v25 }
  0x57   : > { %4617 = vmatprep.mubr.msk.bf16.mxu0 %vm654_vm1, %v636_v59  ;;  %4692 = vmatpush3.bf16.msra.mxu0 %v5030_v29 }
  0x58   : > { %4693 = vmatprep.subr.bf16.mxu0 %v5031_v30 }
  0x59   : > { %4652 = vmatpush3.bf16.msra.mxu1 %v5026_v25 }
  0x5b   : > { %4694 = vmatpush3.bf16.msra.mxu0 %v5031_v30 }
  0x5c   : > { %4695 = vmatprep.subr.bf16.mxu0 %v5032_v31 }
  0x5e   : > { %4618 = vmatmul.mubr.msk.bf16.gmra.mrb[12].mxu0 %vm654_vm1, %v637_v0 }
  0x5f   : > { %4621 = vmatprep.mubr.msk.bf16.mxu0 %vm654_vm1, %v638_v1  ;;  %4696 = vmatpush3.bf16.msra.mxu0 %v5032_v31 }
  0x60   : > { %4697 = vmatprep.subr.bf16.mxu0 %v5033_v32 }
  0x63   : > { %4698 = vmatpush3.bf16.msra.mxu0 %v5033_v32 }
  0x66   : > { %4622 = vmatmul.mubr.msk.bf16.gmra.mrb[16].mxu0 %vm654_vm1, %v639_v6 }
  0x67   : > { %4625 = vmatprep.mubr.msk.bf16.mxu0 %vm654_vm1, %v640_v7 }
  0x6e   : > { %4626 = vmatmul.mubr.msk.bf16.gmra.mrb[20].mxu0 %vm654_vm1, %v641_v12 }
  0x6f   : > { %4629 = vmatprep.mubr.msk.bf16.mxu0 %vm654_vm1, %v642_v13 }
  0x76   : > { %4630 = vmatmul.mubr.msk.bf16.gmra.mrb[24].mxu0 %vm654_vm1, %v643_v18 }
  0x77   : > { %4633 = vmatprep.mubr.msk.bf16.mxu0 %vm654_vm1, %v644_v19 }
  0x7e   : > { %4634 = vmatmul.mubr.msk.bf16.gmra.mrb[28].mxu0 %vm654_vm1, %v645_v22 }
 0x119   : > { %v4607_v34 = vpop.f32.mrb[0].mxu0 }
 0x11a   : > { %v750_v35 = vadd.f32 %v4607_v34, %v5593_v33  ;;  %v741_v36 = vpop.f32.mrb[1].mxu0 }
 0x11b   : > { %v742_v37 = vadd.f32 %v5593_v33, %v741_v36  ;;  %v4608_v38 = vpop.f32.mrb[2].mxu0 }
 0x11c   : > { %v902_v39 = vmul.f32 0.01, %v750_v35  ;;  %v753_v40 = vadd.f32 %v4608_v38, %v5593_v33  ;;  %v744_v41 = vpop.f32.mrb[3].mxu0  ;;  %vm870_vm2 = vcmp.ge.f32.partialorder %v750_v35, 0.0 }
 0x11d   : > { %v900_v42 = vmul.f32 0.01, %v742_v37  ;;  %v745_v43 = vadd.f32 %v5593_v33, %v744_v41  ;;  %vm868_vm4 = vcmp.ge.f32.partialorder %v742_v37, 0.0 }
 0x11e   : > { %vm871_vm3 = vcmp.ge.f32.partialorder %v753_v40, 0.0  ;;  %v903_v44 = vmul.f32 0.01, %v753_v40  ;;  %v934_v46 = vsel %vm870_vm2, %v750_v35, %v902_v39 }
 0x11f   : > { %v901_v45 = vmul.f32 0.01, %v745_v43  ;;  %vm869_vm5 = vcmp.ge.f32.partialorder %v745_v43, 0.0  ;;  %v932_v49 = vsel %vm868_vm4, %v742_v37, %v900_v42 }
 0x120   : > { %v935_v47 = vsel %vm871_vm3, %v753_v40, %v903_v44 }
 0x121   : > { %v4611_v48 = vpop.f32.mrb[4].mxu0  ;;  %v933_v50 = vsel %vm869_vm5, %v745_v43, %v901_v45  ;;  %v965_v51 = vpack.c.bf16 %v935_v47, %v934_v46 }
 0x122   : > { %v766_v52 = vadd.f32 %v4611_v48, %v5593_v33  ;;  %v757_v53 = vpop.f32.mrb[5].mxu0  ;;  %v964_v54 = vpack.c.bf16 %v933_v50, %v932_v49 }
 0x123   : > { %v758_v55 = vadd.f32 %v5593_v33, %v757_v53  ;;  %v4612_v56 = vpop.f32.mrb[6].mxu0 }
 0x124   : > { %v906_v57 = vmul.f32 0.01, %v766_v52  ;;  %v769_v58 = vadd.f32 %v4612_v56, %v5593_v33  ;;  %v760_v59 = vpop.f32.mrb[7].mxu0  ;;  %4653 = vmatprep.mubr.bf16.mxu1 %v964_v54  ;;  %vm874_vm6 = vcmp.ge.f32.partialorder %v766_v52, 0.0 }
 0x125   : > { %v904_v60 = vmul.f32 0.01, %v758_v55  ;;  %v761_v61 = vadd.f32 %v5593_v33, %v760_v59  ;;  %4654 = vmatmul.mubr.bf16.vlgmr.msra.gmra.mrb[0].mxu1 %v965_v51  ;;  %vm872_vm7 = vcmp.ge.f32.partialorder %v758_v55, 0.0 }
 0x126   : > { %vm875_vm8 = vcmp.ge.f32.partialorder %v769_v58, 0.0  ;;  %v907_v62 = vmul.f32 0.01, %v769_v58  ;;  %v938_v0 = vsel %vm874_vm6, %v766_v52, %v906_v57 }
 0x127   : > { %vm873_vm9 = vcmp.ge.f32.partialorder %v761_v61, 0.0  ;;  %v905_v63 = vmul.f32 0.01, %v761_v61  ;;  %v936_v3 = vsel %vm872_vm7, %v758_v55, %v904_v60 }
 0x128   : > { %v939_v1 = vsel %vm875_vm8, %v769_v58, %v907_v62 }
 0x129   : > { %v4615_v2 = vpop.f32.mrb[8].mxu0  ;;  %v937_v4 = vsel %vm873_vm9, %v761_v61, %v905_v63  ;;  %v967_v5 = vpack.c.bf16 %v939_v1, %v938_v0 }
 0x12a   : > { %v782_v6 = vadd.f32 %v4615_v2, %v5593_v33  ;;  %v773_v7 = vpop.f32.mrb[9].mxu0  ;;  %v966_v8 = vpack.c.bf16 %v937_v4, %v936_v3 }
 0x12b   : > { %v774_v9 = vadd.f32 %v5593_v33, %v773_v7  ;;  %v4616_v10 = vpop.f32.mrb[10].mxu0 }
 0x12c   : > { %v910_v11 = vmul.f32 0.01, %v782_v6  ;;  %v785_v12 = vadd.f32 %v4616_v10, %v5593_v33  ;;  %v776_v13 = vpop.f32.mrb[11].mxu0  ;;  %4657 = vmatprep.mubr.bf16.mxu1 %v966_v8  ;;  %vm878_vm10 = vcmp.ge.f32.partialorder %v782_v6, 0.0 }
 0x12d   : > { %v908_v14 = vmul.f32 0.01, %v774_v9  ;;  %v777_v15 = vadd.f32 %v5593_v33, %v776_v13  ;;  %4658 = vmatmul.mubr.bf16.gmra.mrb[4].mxu1 %v967_v5  ;;  %vm876_vm11 = vcmp.ge.f32.partialorder %v774_v9, 0.0 }
 0x12e   : > { %vm879_vm12 = vcmp.ge.f32.partialorder %v785_v12, 0.0  ;;  %v911_v16 = vmul.f32 0.01, %v785_v12  ;;  %v942_v18 = vsel %vm878_vm10, %v782_v6, %v910_v11 }
 0x12f   : > { %vm877_vm13 = vcmp.ge.f32.partialorder %v777_v15, 0.0  ;;  %v909_v17 = vmul.f32 0.01, %v777_v15  ;;  %v940_v21 = vsel %vm876_vm11, %v774_v9, %v908_v14 }
 0x130   : > { %v943_v19 = vsel %vm879_vm12, %v785_v12, %v911_v16 }
 0x131   : > { %v4619_v20 = vpop.f32.mrb[12].mxu0  ;;  %v941_v22 = vsel %vm877_vm13, %v777_v15, %v909_v17  ;;  %v969_v23 = vpack.c.bf16 %v943_v19, %v942_v18 }
 0x132   : > { %v798_v24 = vadd.f32 %v4619_v20, %v5593_v33  ;;  %v789_v25 = vpop.f32.mrb[13].mxu0  ;;  %v968_v26 = vpack.c.bf16 %v941_v22, %v940_v21 }
 0x133   : > { %v790_v27 = vadd.f32 %v5593_v33, %v789_v25  ;;  %v4620_v28 = vpop.f32.mrb[14].mxu0 }
 0x134   : > { %v914_v29 = vmul.f32 0.01, %v798_v24  ;;  %v801_v30 = vadd.f32 %v4620_v28, %v5593_v33  ;;  %v792_v31 = vpop.f32.mrb[15].mxu0  ;;  %4661 = vmatprep.mubr.bf16.mxu1 %v968_v26  ;;  %vm882_vm14 = vcmp.ge.f32.partialorder %v798_v24, 0.0 }
 0x135   : > { %v912_v32 = vmul.f32 0.01, %v790_v27  ;;  %v793_v34 = vadd.f32 %v5593_v33, %v792_v31  ;;  %4662 = vmatmul.mubr.bf16.gmra.mrb[8].mxu1 %v969_v23  ;;  %vm880_vm15 = vcmp.ge.f32.partialorder %v790_v27, 0.0 }
 0x136   : > { %vm883_vm0 = vcmp.ge.f32.partialorder %v801_v30, 0.0  ;;  %v915_v35 = vmul.f32 0.01, %v801_v30  ;;  %v946_v37 = vsel %vm882_vm14, %v798_v24, %v914_v29 }
 0x137   : > { %vm881_vm1 = vcmp.ge.f32.partialorder %v793_v34, 0.0  ;;  %v913_v36 = vmul.f32 0.01, %v793_v34  ;;  %v944_v40 = vsel %vm880_vm15, %v790_v27, %v912_v32 }
 0x138   : > { %v947_v38 = vsel %vm883_vm0, %v801_v30, %v915_v35 }
 0x139   : > { %v4623_v39 = vpop.f32.mrb[16].mxu0  ;;  %v945_v41 = vsel %vm881_vm1, %v793_v34, %v913_v36  ;;  %v971_v42 = vpack.c.bf16 %v947_v38, %v946_v37 }
 0x13a   : > { %v814_v43 = vadd.f32 %v4623_v39, %v5593_v33  ;;  %v805_v44 = vpop.f32.mrb[17].mxu0  ;;  %v970_v45 = vpack.c.bf16 %v945_v41, %v944_v40 }
 0x13b   : > { %v806_v46 = vadd.f32 %v5593_v33, %v805_v44  ;;  %v4624_v47 = vpop.f32.mrb[18].mxu0 }
 0x13c   : > { %v918_v48 = vmul.f32 0.01, %v814_v43  ;;  %v817_v49 = vadd.f32 %v4624_v47, %v5593_v33  ;;  %v808_v50 = vpop.f32.mrb[19].mxu0  ;;  %4665 = vmatprep.mubr.bf16.mxu1 %v970_v45  ;;  %vm886_vm2 = vcmp.ge.f32.partialorder %v814_v43, 0.0 }
 0x13d   : > { %v916_v51 = vmul.f32 0.01, %v806_v46  ;;  %v809_v52 = vadd.f32 %v5593_v33, %v808_v50  ;;  %4666 = vmatmul.mubr.bf16.gmra.mrb[12].mxu1 %v971_v42  ;;  %vm884_vm3 = vcmp.ge.f32.partialorder %v806_v46, 0.0 }
 0x13e   : > { %vm887_vm4 = vcmp.ge.f32.partialorder %v817_v49, 0.0  ;;  %v919_v53 = vmul.f32 0.01, %v817_v49  ;;  %v950_v55 = vsel %vm886_vm2, %v814_v43, %v918_v48  ;;  %vm5292_vm2 = vmmov 0  }
 0x13f   : > { %vm885_vm5 = vcmp.ge.f32.partialorder %v809_v52, 0.0  ;;  %v917_v54 = vmul.f32 0.01, %v809_v52  ;;  %v948_v58 = vsel %vm884_vm3, %v806_v46, %v916_v51 }
 0x140   : > { %v951_v56 = vsel %vm887_vm4, %v817_v49, %v919_v53  ;;  %v5036_v53 = vld [vmem:[%s7125_s7 + $0x8] sm:$0xff]  }
 0x141   : > { %v4627_v57 = vpop.f32.mrb[20].mxu0  ;;  %v949_v59 = vsel %vm885_vm5, %v809_v52, %v917_v54  ;;  %v973_v60 = vpack.c.bf16 %v951_v56, %v950_v55  ;;  %v5034_v52 = vld [vmem:[%s7124_s6 + $0x38] sm:$0xff]   ;;  %v5037_v54 = vld [vmem:[%s7125_s7 + $0x10] sm:$0xff]   ;;  %v5039_v56 = vld [vmem:[%s7125_s7 + $0x20] sm:$0xff]  }
 0x142   : > { %v830_v61 = vadd.f32 %v4627_v57, %v5593_v33  ;;  %v821_v62 = vpop.f32.mrb[21].mxu0  ;;  %v972_v63 = vpack.c.bf16 %v949_v59, %v948_v58  ;;  %4699 = vmatprep.subr.bf16.mxu0 %v5034_v52  ;;  %v5038_v55 = vld [vmem:[%s7125_s7 + $0x18] sm:$0xff]   ;;  %v5040_v57 = vld [vmem:[%s7125_s7 + $0x28] sm:$0xff]   ;;  %v5041_v58 = vld [vmem:[%s7125_s7 + $0x30] sm:$0xff]  }
 0x143   : > { %v822_v0 = vadd.f32 %v5593_v33, %v821_v62  ;;  %v4628_v1 = vpop.f32.mrb[22].mxu0  ;;  %4700 = vmatpush3.bf16.msra.mxu0 %v5034_v52 }
 0x144   : > { %v922_v2 = vmul.f32 0.01, %v830_v61  ;;  %v833_v3 = vadd.f32 %v4628_v1, %v5593_v33  ;;  %v824_v4 = vpop.f32.mrb[23].mxu0  ;;  %4669 = vmatprep.mubr.bf16.mxu1 %v972_v63  ;;  %vm890_vm6 = vcmp.ge.f32.partialorder %v830_v61, 0.0 }
 0x145   : > { %v920_v5 = vmul.f32 0.01, %v822_v0  ;;  %v825_v6 = vadd.f32 %v5593_v33, %v824_v4  ;;  %4670 = vmatmul.mubr.bf16.gmra.mrb[16].mxu1 %v973_v60  ;;  %vm888_vm7 = vcmp.ge.f32.partialorder %v822_v0, 0.0  ;;  %v5654_v60 = vld [vmem:[%s7122_s4] ss:$0 sm:$0xff] }
 0x146   : > { %vm891_vm8 = vcmp.ge.f32.partialorder %v833_v3, 0.0  ;;  %v923_v7 = vmul.f32 0.01, %v833_v3  ;;  %v954_v9 = vsel %vm890_vm6, %v830_v61, %v922_v2 }
 0x147   : > { %vm889_vm9 = vcmp.ge.f32.partialorder %v825_v6, 0.0  ;;  %v921_v8 = vmul.f32 0.01, %v825_v6  ;;  %v952_v12 = vsel %vm888_vm7, %v822_v0, %v920_v5 }
 0x148   : > { %v955_v10 = vsel %vm891_vm8, %v833_v3, %v923_v7 }
 0x149   : > { %v4631_v11 = vpop.f32.mrb[24].mxu0  ;;  %v953_v13 = vsel %vm889_vm9, %v825_v6, %v921_v8  ;;  %v975_v14 = vpack.c.bf16 %v955_v10, %v954_v9 }
 0x14a   : > { %v846_v15 = vadd.f32 %v4631_v11, %v5593_v33  ;;  %v837_v16 = vpop.f32.mrb[25].mxu0  ;;  %v974_v17 = vpack.c.bf16 %v953_v13, %v952_v12 }
 0x14b   : > { %v838_v18 = vadd.f32 %v5593_v33, %v837_v16  ;;  %v4632_v19 = vpop.f32.mrb[26].mxu0 }
 0x14c   : > { %v926_v20 = vmul.f32 0.01, %v846_v15  ;;  %v849_v21 = vadd.f32 %v4632_v19, %v5593_v33  ;;  %v840_v22 = vpop.f32.mrb[27].mxu0  ;;  %4673 = vmatprep.mubr.bf16.mxu1 %v974_v17  ;;  %vm894_vm10 = vcmp.ge.f32.partialorder %v846_v15, 0.0 }
 0x14d   : > { %v924_v23 = vmul.f32 0.01, %v838_v18  ;;  %v841_v24 = vadd.f32 %v5593_v33, %v840_v22  ;;  %4674 = vmatmul.mubr.bf16.gmra.mrb[20].mxu1 %v975_v14  ;;  %vm892_vm11 = vcmp.ge.f32.partialorder %v838_v18, 0.0 }
 0x14e   : > { %vm895_vm12 = vcmp.ge.f32.partialorder %v849_v21, 0.0  ;;  %v927_v25 = vmul.f32 0.01, %v849_v21  ;;  %v958_v27 = vsel %vm894_vm10, %v846_v15, %v926_v20 }
 0x14f   : > { %vm893_vm13 = vcmp.ge.f32.partialorder %v841_v24, 0.0  ;;  %v925_v26 = vmul.f32 0.01, %v841_v24  ;;  %v956_v30 = vsel %vm892_vm11, %v838_v18, %v924_v23 }
 0x150   : > { %v959_v28 = vsel %vm895_vm12, %v849_v21, %v927_v25 }
 0x151   : > { %v4635_v29 = vpop.f32.mrb[28].mxu0  ;;  %v957_v31 = vsel %vm893_vm13, %v841_v24, %v925_v26  ;;  %v977_v32 = vpack.c.bf16 %v959_v28, %v958_v27 }
 0x152   : > { %v862_v34 = vadd.f32 %v4635_v29, %v5593_v33  ;;  %v853_v35 = vpop.f32.mrb[29].mxu0  ;;  %v976_v36 = vpack.c.bf16 %v957_v31, %v956_v30 }
 0x153   : > { %v854_v37 = vadd.f32 %v5593_v33, %v853_v35  ;;  %v4636_v38 = vpop.f32.mrb[30].mxu0 }
 0x154   : > { %v930_v39 = vmul.f32 0.01, %v862_v34  ;;  %v865_v40 = vadd.f32 %v4636_v38, %v5593_v33  ;;  %v856_v41 = vpop.f32.mrb[31].mxu0  ;;  %4677 = vmatprep.mubr.bf16.mxu1 %v976_v36  ;;  %vm898_vm14 = vcmp.ge.f32.partialorder %v862_v34, 0.0 }
 0x155   : > { %v928_v42 = vmul.f32 0.01, %v854_v37  ;;  %v857_v43 = vadd.f32 %v5593_v33, %v856_v41  ;;  %4678 = vmatmul.mubr.bf16.gmra.mrb[24].mxu1 %v977_v32  ;;  %vm896_vm15 = vcmp.ge.f32.partialorder %v854_v37, 0.0  ;;  %v5035_v33 = vld [vmem:[%s7125_s7] sm:$0xff]  }
 0x156   : > { %vm899_vm0 = vcmp.ge.f32.partialorder %v865_v40, 0.0  ;;  %v931_v44 = vmul.f32 0.01, %v865_v40  ;;  %v962_v46 = vsel %vm898_vm14, %v862_v34, %v930_v39  ;;  %4733 = vmatprep.subr.bf16.mxu1 %v5035_v33 }
 0x157   : > { %vm897_vm1 = vcmp.ge.f32.partialorder %v857_v43, 0.0  ;;  %v929_v45 = vmul.f32 0.01, %v857_v43  ;;  %v960_v48 = vsel %vm896_vm15, %v854_v37, %v928_v42  ;;  %4734 = vmatpush3.bf16.msra.mxu1 %v5035_v33 }
 0x158   : > { %v963_v47 = vsel %vm899_vm0, %v865_v40, %v931_v44  ;;  %4735 = vmatprep.subr.bf16.mxu1 %v5036_v53 }
 0x159   : > { %v961_v49 = vsel %vm897_vm1, %v857_v43, %v929_v45  ;;  %v979_v50 = vpack.c.bf16 %v963_v47, %v962_v46 }
 0x15a   : > { %v978_v51 = vpack.c.bf16 %v961_v49, %v960_v48 }
 0x15b   : > { %4736 = vmatpush3.bf16.msra.mxu1 %v5036_v53 }
 0x15c   : > { %4681 = vmatprep.mubr.bf16.mxu1 %v978_v51  ;;  %4737 = vmatprep.subr.bf16.mxu1 %v5037_v54 }
 0x15d   : > { %4682 = vmatmul.mubr.bf16.gmra.mrb[28].mxu1 %v979_v50 }
 0x15f   : > { %4738 = vmatpush3.bf16.msra.mxu1 %v5037_v54 }
 0x160   : > { %4739 = vmatprep.subr.bf16.mxu1 %v5038_v55 }
 0x163   : > { %4740 = vmatpush3.bf16.msra.mxu1 %v5038_v55 }
 0x164   : > { %4741 = vmatprep.subr.bf16.mxu1 %v5039_v56 }
 0x167   : > { %4742 = vmatpush3.bf16.msra.mxu1 %v5039_v56 }
 0x168   : > { %4743 = vmatprep.subr.bf16.mxu1 %v5040_v57 }
 0x16b   : > { %4744 = vmatpush3.bf16.msra.mxu1 %v5040_v57 }
 0x16c   : > { %4745 = vmatprep.subr.bf16.mxu1 %v5041_v58 }
 0x16f   : > { %4746 = vmatpush3.bf16.msra.mxu1 %v5041_v58 }
 0x1f8   : > { %v4655_v59 = vpop.f32.mrb[0].mxu1 }
 0x1f9   : > { %v1085_v61 = vpop.f32.mrb[1].mxu1  ;;  %v5666_v3 = vadd.f32 %v4655_v59, %v5654_v60 }
 0x1fa   : > { %v4656_v62 = vpop.f32.mrb[2].mxu1  ;;  %v5660_v1 = vadd.f32 %v5654_v60, %v1085_v61 }
 0x1fb   : > { %v5657_v63 = vadd.f32 %v4656_v62, %v5654_v60  ;;  %v1088_v0 = vpop.f32.mrb[3].mxu1 }
 0x1fc   : > { %v5663_v2 = vadd.f32 %v5654_v60, %v1088_v0 }
 0x1fd   : > { %v1279_v5 = vpack.c.bf16 %v5657_v63, %v5666_v3 }
 0x1fe   : > { %v1278_v4 = vpack.c.bf16 %v5663_v2, %v5660_v1 }
 0x200   : > { %v4659_v6 = vpop.f32.mrb[4].mxu1  ;;  %4701 = vmatprep.mubr.bf16.mxu0 %v1278_v4 }
 0x201   : > { %v1101_v7 = vpop.f32.mrb[5].mxu1  ;;  %4702 = vmatmul.mubr.bf16.vlgmr.msra.gmra.mrb[32].mxu0 %v1279_v5  ;;  %v5682_v13 = vadd.f32 %v4659_v6, %v5654_v60 }
 0x202   : > { %v4660_v8 = vpop.f32.mrb[6].mxu1  ;;  %v5676_v11 = vadd.f32 %v5654_v60, %v1101_v7 }
 0x203   : > { %v5673_v9 = vadd.f32 %v4660_v8, %v5654_v60  ;;  %v1104_v10 = vpop.f32.mrb[7].mxu1 }
 0x204   : > { %v5679_v12 = vadd.f32 %v5654_v60, %v1104_v10 }
 0x205   : > { %v1281_v15 = vpack.c.bf16 %v5673_v9, %v5682_v13 }
 0x206   : > { %v1280_v14 = vpack.c.bf16 %v5679_v12, %v5676_v11 }
 0x208   : > { %v4663_v16 = vpop.f32.mrb[8].mxu1  ;;  %4705 = vmatprep.mubr.bf16.mxu0 %v1280_v14 }
 0x209   : > { %v1117_v17 = vpop.f32.mrb[9].mxu1  ;;  %4706 = vmatmul.mubr.bf16.gmra.mrb[36].mxu0 %v1281_v15  ;;  %v5698_v23 = vadd.f32 %v4663_v16, %v5654_v60 }
 0x20a   : > { %v4664_v18 = vpop.f32.mrb[10].mxu1  ;;  %v5692_v21 = vadd.f32 %v5654_v60, %v1117_v17 }
 0x20b   : > { %v5689_v19 = vadd.f32 %v4664_v18, %v5654_v60  ;;  %v1120_v20 = vpop.f32.mrb[11].mxu1  ;;  %7182 = vst [vmem:[#allocation10_spill] sm:$0xff] %v5698_v23 }
 0x20c   : > { %7181 = vst [vmem:[#allocation9_spill] sm:$0xff] %v5692_v21  ;;  %v5695_v22 = vadd.f32 %v5654_v60, %v1120_v20 }
 0x20d   : > { %7180 = vst [vmem:[#allocation8_spill] sm:$0xff] %v5689_v19  ;;  %v1283_v25 = vpack.c.bf16 %v5689_v19, %v5698_v23 }
 0x20e   : > { %v1282_v24 = vpack.c.bf16 %v5695_v22, %v5692_v21 }
 0x210   : > { %v4667_v26 = vpop.f32.mrb[12].mxu1  ;;  %4709 = vmatprep.mubr.bf16.mxu0 %v1282_v24 }
 0x211   : > { %v1133_v27 = vpop.f32.mrb[13].mxu1  ;;  %4710 = vmatmul.mubr.bf16.gmra.mrb[40].mxu0 %v1283_v25  ;;  %v5714_v34 = vadd.f32 %v4667_v26, %v5654_v60  ;;  %v5042_v25 = vld [vmem:[%s7125_s7 + $0x38] sm:$0xff]   ;;  %v5043_v26 = vld [vmem:[%s7124_s6 + $0x40] sm:$0xff]  }
 0x212   : > { %v4668_v28 = vpop.f32.mrb[14].mxu1  ;;  %v5708_v31 = vadd.f32 %v5654_v60, %v1133_v27  ;;  %4747 = vmatprep.subr.bf16.mxu1 %v5042_v25  ;;  %4781 = vmatprep.subr.bf16.mxu0 %v5043_v26  ;;  %v5045_v27 = vld [vmem:[%s7124_s6 + $0x50] sm:$0xff]  }
 0x213   : > { %v5705_v29 = vadd.f32 %v4668_v28, %v5654_v60  ;;  %v1136_v30 = vpop.f32.mrb[15].mxu1  ;;  %7186 = vst [vmem:[#allocation14_spill] sm:$0xff] %v5714_v34  ;;  %4748 = vmatpush3.bf16.msra.mxu1 %v5042_v25  ;;  %4782 = vmatpush3.bf16.msra.mxu0 %v5043_v26  ;;  %v5046_v28 = vld [vmem:[%s7124_s6 + $0x58] sm:$0xff]  }
 0x214   : > { %7184 = vst [vmem:[#allocation12_spill] sm:$0xff] %v5708_v31  ;;  %v5711_v32 = vadd.f32 %v5654_v60, %v1136_v30  ;;  %v5802_v30 = vld [vmem:[%s7123_s5] ss:$0 sm:$0xff] }
 0x215   : > { %7183 = vst [vmem:[#allocation11_spill] sm:$0xff] %v5705_v29  ;;  %v1285_v36 = vpack.c.bf16 %v5705_v29, %v5714_v34 }
 0x216   : > { %7185 = vst [vmem:[#allocation13_spill] sm:$0xff] %v5711_v32  ;;  %v1284_v35 = vpack.c.bf16 %v5711_v32, %v5708_v31 }
 0x218   : > { %v4671_v37 = vpop.f32.mrb[16].mxu1  ;;  %4713 = vmatprep.mubr.bf16.mxu0 %v1284_v35  ;;  %v1557_v35 = vmul.f32 0.0, %v5802_v30 }
 0x219   : > { %v1149_v38 = vpop.f32.mrb[17].mxu1  ;;  %4714 = vmatmul.mubr.bf16.gmra.mrb[44].mxu0 %v1285_v36  ;;  %v5730_v44 = vadd.f32 %v4671_v37, %v5654_v60 }
 0x21a   : > { %v4672_v39 = vpop.f32.mrb[18].mxu1  ;;  %v5724_v42 = vadd.f32 %v5654_v60, %v1149_v38 }
 0x21b   : > { %v5721_v40 = vadd.f32 %v4672_v39, %v5654_v60  ;;  %v1152_v41 = vpop.f32.mrb[19].mxu1  ;;  %7190 = vst [vmem:[#allocation18_spill] sm:$0xff] %v5730_v44 }
 0x21c   : > { %7188 = vst [vmem:[#allocation16_spill] sm:$0xff] %v5724_v42  ;;  %v5727_v43 = vadd.f32 %v5654_v60, %v1152_v41 }
 0x21d   : > { %7187 = vst [vmem:[#allocation15_spill] sm:$0xff] %v5721_v40  ;;  %v1287_v46 = vpack.c.bf16 %v5721_v40, %v5730_v44 }
 0x21e   : > { %7189 = vst [vmem:[#allocation17_spill] sm:$0xff] %v5727_v43  ;;  %v1286_v45 = vpack.c.bf16 %v5727_v43, %v5724_v42 }
 0x220   : > { %v4675_v47 = vpop.f32.mrb[20].mxu1  ;;  %4717 = vmatprep.mubr.bf16.mxu0 %v1286_v45 }
 0x221   : > { %v1165_v48 = vpop.f32.mrb[21].mxu1  ;;  %4718 = vmatmul.mubr.bf16.gmra.mrb[48].mxu0 %v1287_v46  ;;  %v5746_v53 = vadd.f32 %v4675_v47, %v5654_v60 }
 0x222   : > { %v4676_v49 = vpop.f32.mrb[22].mxu1  ;;  %v5740_v52 = vadd.f32 %v5654_v60, %v1165_v48 }
 0x223   : > { %v5737_v50 = vadd.f32 %v4676_v49, %v5654_v60  ;;  %v1168_v51 = vpop.f32.mrb[23].mxu1  ;;  %7194 = vst [vmem:[#allocation22_spill] sm:$0xff] %v5746_v53 }
 0x224   : > { %7192 = vst [vmem:[#allocation20_spill] sm:$0xff] %v5740_v52  ;;  %v5743_v33 = vadd.f32 %v5654_v60, %v1168_v51 }
 0x225   : > { %7191 = vst [vmem:[#allocation19_spill] sm:$0xff] %v5737_v50  ;;  %v1289_v55 = vpack.c.bf16 %v5737_v50, %v5746_v53 }
 0x226   : > { %7193 = vst [vmem:[#allocation21_spill] sm:$0xff] %v5743_v33  ;;  %v1288_v54 = vpack.c.bf16 %v5743_v33, %v5740_v52 }
 0x228   : > { %v4679_v56 = vpop.f32.mrb[24].mxu1  ;;  %4721 = vmatprep.mubr.bf16.mxu0 %v1288_v54 }
 0x229   : > { %v1181_v57 = vpop.f32.mrb[25].mxu1  ;;  %4722 = vmatmul.mubr.bf16.gmra.mrb[52].mxu0 %v1289_v55  ;;  %v5762_v4 = vadd.f32 %v4679_v56, %v5654_v60 }
 0x22a   : > { %v4680_v58 = vpop.f32.mrb[26].mxu1  ;;  %v5756_v62 = vadd.f32 %v5654_v60, %v1181_v57 }
 0x22b   : > { %v5753_v59 = vadd.f32 %v4680_v58, %v5654_v60  ;;  %v1184_v61 = vpop.f32.mrb[27].mxu1  ;;  %7198 = vst [vmem:[#allocation26_spill] sm:$0xff] %v5762_v4 }
 0x22c   : > { %7196 = vst [vmem:[#allocation24_spill] sm:$0xff] %v5756_v62  ;;  %v5759_v0 = vadd.f32 %v5654_v60, %v1184_v61 }
 0x22d   : > { %7195 = vst [vmem:[#allocation23_spill] sm:$0xff] %v5753_v59  ;;  %v1291_v6 = vpack.c.bf16 %v5753_v59, %v5762_v4 }
 0x22e   : > { %7197 = vst [vmem:[#allocation25_spill] sm:$0xff] %v5759_v0  ;;  %v1290_v5 = vpack.c.bf16 %v5759_v0, %v5756_v62 }
 0x230   : > { %v4683_v7 = vpop.f32.mrb[28].mxu1  ;;  %4725 = vmatprep.mubr.bf16.mxu0 %v1290_v5 }
 0x231   : > { %v1197_v8 = vpop.f32.mrb[29].mxu1  ;;  %4726 = vmatmul.mubr.bf16.gmra.mrb[56].mxu0 %v1291_v6  ;;  %v5778_v18 = vadd.f32 %v4683_v7, %v5654_v60 }
 0x232   : > { %v4684_v10 = vpop.f32.mrb[30].mxu1  ;;  %v5772_v16 = vadd.f32 %v5654_v60, %v1197_v8 }
 0x233   : > { %v5769_v14 = vadd.f32 %v4684_v10, %v5654_v60  ;;  %v1200_v15 = vpop.f32.mrb[31].mxu1  ;;  %7202 = vst [vmem:[#allocation30_spill] sm:$0xff] %v5778_v18 }
 0x234   : > { %7200 = vst [vmem:[#allocation28_spill] sm:$0xff] %v5772_v16  ;;  %v5775_v17 = vadd.f32 %v5654_v60, %v1200_v15  ;;  %v5044_v60 = vld [vmem:[%s7124_s6 + $0x48] sm:$0xff]  }
 0x235   : > { %7199 = vst [vmem:[#allocation27_spill] sm:$0xff] %v5769_v14  ;;  %v1293_v24 = vpack.c.bf16 %v5769_v14, %v5778_v18  ;;  %4783 = vmatprep.subr.bf16.mxu0 %v5044_v60 }
 0x236   : > { %7201 = vst [vmem:[#allocation29_spill] sm:$0xff] %v5775_v17  ;;  %v1292_v20 = vpack.c.bf16 %v5775_v17, %v5772_v16  ;;  %4784 = vmatpush3.bf16.msra.mxu0 %v5044_v60 }
 0x237   : > { %4785 = vmatprep.subr.bf16.mxu0 %v5045_v27 }
 0x238   : > { %4729 = vmatprep.mubr.bf16.mxu0 %v1292_v20 }
 0x239   : > { %4730 = vmatmul.mubr.bf16.gmra.mrb[60].mxu0 %v1293_v24 }
 0x23a   : > { %4786 = vmatpush3.bf16.msra.mxu0 %v5045_v27 }
 0x23b   : > { %4787 = vmatprep.subr.bf16.mxu0 %v5046_v28 }
 0x23e   : > { %4788 = vmatpush3.bf16.msra.mxu0 %v5046_v28 }
 0x2d4   : > { %v4703_v36 = vpop.f32.mrb[32].mxu0 }
 0x2d5   : > { %v1392_v37 = vpop.f32.mrb[33].mxu0  ;;  %v1564_v39 = vadd.f32 %v4703_v36, %v1557_v35 }
 0x2d6   : > { %v4704_v38 = vpop.f32.mrb[34].mxu0  ;;  %v1562_v46 = vadd.f32 %v1557_v35, %v1392_v37 }
 0x2d7   : > { %v1565_v41 = vadd.f32 %v4704_v38, %v1557_v35  ;;  %v1395_v45 = vpop.f32.mrb[35].mxu0  ;;  %v1572_v51 = vmul.f32 %v5802_v30, %v1564_v39 }
 0x2d8   : > { %v1563_v47 = vadd.f32 %v1557_v35, %v1395_v45  ;;  %v1570_v55 = vmul.f32 %v5802_v30, %v1562_v46 }
 0x2d9   : > { %v1722_v48 = vpack.c.bf16 %v1565_v41, %v1564_v39  ;;  %v1573_v58 = vmul.f32 %v5802_v30, %v1565_v41 }
 0x2da   : > { %v1721_v49 = vpack.c.bf16 %v1563_v47, %v1562_v46  ;;  %v1571_v6 = vmul.f32 %v5802_v30, %v1563_v47 }
 0x2dc   : > { %v4707_v54 = vpop.f32.mrb[36].mxu0  ;;  %4749 = vmatprep.mubr.bf16.mxu1 %v1721_v49 }
 0x2dd   : > { %v1581_v56 = vadd.f32 %v4707_v54, %v1572_v51  ;;  %v1408_v57 = vpop.f32.mrb[37].mxu0  ;;  %4750 = vmatmul.mubr.bf16.vlgmr.msra.gmra.mrb[32].mxu1 %v1722_v48 }
 0x2de   : > { %v1579_v61 = vadd.f32 %v1570_v55, %v1408_v57  ;;  %v4708_v5 = vpop.f32.mrb[38].mxu0 }
 0x2df   : > { %v1582_v7 = vadd.f32 %v4708_v5, %v1573_v58  ;;  %v1411_v8 = vpop.f32.mrb[39].mxu0  ;;  %v1589_v24 = vmul.f32 %v5802_v30, %v1581_v56 }
 0x2e0   : > { %v1580_v10 = vadd.f32 %v1571_v6, %v1411_v8  ;;  %v1587_v26 = vmul.f32 %v5802_v30, %v1579_v61 }
 0x2e1   : > { %v1724_v15 = vpack.c.bf16 %v1582_v7, %v1581_v56  ;;  %v1590_v28 = vmul.f32 %v5802_v30, %v1582_v7 }
 0x2e2   : > { %v1723_v20 = vpack.c.bf16 %v1580_v10, %v1579_v61  ;;  %v1588_v37 = vmul.f32 %v5802_v30, %v1580_v10 }
 0x2e4   : > { %v4711_v25 = vpop.f32.mrb[40].mxu0  ;;  %4753 = vmatprep.mubr.bf16.mxu1 %v1723_v20 }
 0x2e5   : > { %v1598_v60 = vadd.f32 %v4711_v25, %v1589_v24  ;;  %v1424_v27 = vpop.f32.mrb[41].mxu0  ;;  %4754 = vmatmul.mubr.bf16.gmra.mrb[36].mxu1 %v1724_v15 }
 0x2e6   : > { %v1596_v35 = vadd.f32 %v1587_v26, %v1424_v27  ;;  %v4712_v36 = vpop.f32.mrb[42].mxu0 }
 0x2e7   : > { %v1599_v38 = vadd.f32 %v4712_v36, %v1590_v28  ;;  %v1427_v39 = vpop.f32.mrb[43].mxu0  ;;  %v1606_v47 = vmul.f32 %v5802_v30, %v1598_v60 }
 0x2e8   : > { %v1597_v41 = vadd.f32 %v1588_v37, %v1427_v39  ;;  %v1604_v49 = vmul.f32 %v5802_v30, %v1596_v35 }
 0x2e9   : > { %v1726_v45 = vpack.c.bf16 %v1599_v38, %v1598_v60  ;;  %v1607_v55 = vmul.f32 %v5802_v30, %v1599_v38 }
 0x2ea   : > { %v1725_v46 = vpack.c.bf16 %v1597_v41, %v1596_v35  ;;  %v1605_v58 = vmul.f32 %v5802_v30, %v1597_v41 }
 0x2ec   : > { %v4715_v48 = vpop.f32.mrb[44].mxu0  ;;  %4757 = vmatprep.mubr.bf16.mxu1 %v1725_v46 }
 0x2ed   : > { %v1615_v51 = vadd.f32 %v4715_v48, %v1606_v47  ;;  %v1440_v54 = vpop.f32.mrb[45].mxu0  ;;  %4758 = vmatmul.mubr.bf16.gmra.mrb[40].mxu1 %v1726_v45 }
 0x2ee   : > { %v1613_v56 = vadd.f32 %v1604_v49, %v1440_v54  ;;  %v4716_v57 = vpop.f32.mrb[46].mxu0 }
 0x2ef   : > { %v1616_v61 = vadd.f32 %v4716_v57, %v1607_v55  ;;  %v1443_v5 = vpop.f32.mrb[47].mxu0  ;;  %v1623_v10 = vmul.f32 %v5802_v30, %v1615_v51 }
 0x2f0   : > { %v1614_v6 = vadd.f32 %v1605_v58, %v1443_v5  ;;  %v1621_v20 = vmul.f32 %v5802_v30, %v1613_v56 }
 0x2f1   : > { %v1728_v7 = vpack.c.bf16 %v1616_v61, %v1615_v51  ;;  %v1624_v26 = vmul.f32 %v5802_v30, %v1616_v61 }
 0x2f2   : > { %v1727_v8 = vpack.c.bf16 %v1614_v6, %v1613_v56  ;;  %v1622_v28 = vmul.f32 %v5802_v30, %v1614_v6 }
 0x2f4   : > { %v4719_v15 = vpop.f32.mrb[48].mxu0  ;;  %4761 = vmatprep.mubr.bf16.mxu1 %v1727_v8 }
 0x2f5   : > { %v1632_v24 = vadd.f32 %v4719_v15, %v1623_v10  ;;  %v1456_v25 = vpop.f32.mrb[49].mxu0  ;;  %4762 = vmatmul.mubr.bf16.gmra.mrb[44].mxu1 %v1728_v7 }
 0x2f6   : > { %v1630_v60 = vadd.f32 %v1621_v20, %v1456_v25  ;;  %v4720_v27 = vpop.f32.mrb[50].mxu0 }
 0x2f7   : > { %v1633_v35 = vadd.f32 %v4720_v27, %v1624_v26  ;;  %v1459_v36 = vpop.f32.mrb[51].mxu0  ;;  %v1640_v41 = vmul.f32 %v5802_v30, %v1632_v24 }
 0x2f8   : > { %v1631_v37 = vadd.f32 %v1622_v28, %v1459_v36  ;;  %v1638_v46 = vmul.f32 %v5802_v30, %v1630_v60 }
 0x2f9   : > { %v1730_v38 = vpack.c.bf16 %v1633_v35, %v1632_v24  ;;  %v1641_v49 = vmul.f32 %v5802_v30, %v1633_v35 }
 0x2fa   : > { %v1729_v39 = vpack.c.bf16 %v1631_v37, %v1630_v60  ;;  %v1639_v55 = vmul.f32 %v5802_v30, %v1631_v37 }
 0x2fc   : > { %v4723_v45 = vpop.f32.mrb[52].mxu0  ;;  %4765 = vmatprep.mubr.bf16.mxu1 %v1729_v39 }
 0x2fd   : > { %v1649_v47 = vadd.f32 %v4723_v45, %v1640_v41  ;;  %v1472_v48 = vpop.f32.mrb[53].mxu0  ;;  %4766 = vmatmul.mubr.bf16.gmra.mrb[48].mxu1 %v1730_v38 }
 0x2fe   : > { %v1647_v51 = vadd.f32 %v1638_v46, %v1472_v48  ;;  %v4724_v54 = vpop.f32.mrb[54].mxu0 }
 0x2ff   : > { %v1650_v56 = vadd.f32 %v4724_v54, %v1641_v49  ;;  %v1475_v57 = vpop.f32.mrb[55].mxu0  ;;  %v1657_v6 = vmul.f32 %v5802_v30, %v1649_v47 }
 0x300   : > { %v1648_v58 = vadd.f32 %v1639_v55, %v1475_v57  ;;  %v1655_v8 = vmul.f32 %v5802_v30, %v1647_v51 }
 0x301   : > { %v1732_v61 = vpack.c.bf16 %v1650_v56, %v1649_v47  ;;  %v1658_v20 = vmul.f32 %v5802_v30, %v1650_v56 }
 0x302   : > { %v1731_v5 = vpack.c.bf16 %v1648_v58, %v1647_v51  ;;  %v1656_v26 = vmul.f32 %v5802_v30, %v1648_v58  ;;  %v5047_v58 = vld [vmem:[%s7124_s6 + $0x60] sm:$0xff]  }
 0x303   : > { %4789 = vmatprep.subr.bf16.mxu0 %v5047_v58 }
 0x304   : > { %v4727_v7 = vpop.f32.mrb[56].mxu0  ;;  %4769 = vmatprep.mubr.bf16.mxu1 %v1731_v5  ;;  %4790 = vmatpush3.bf16.msra.mxu0 %v5047_v58  ;;  %v5050_v5 = vld [vmem:[%s7124_s6 + $0x78] sm:$0xff]  }
 0x305   : > { %v1666_v10 = vadd.f32 %v4727_v7, %v1657_v6  ;;  %v1488_v15 = vpop.f32.mrb[57].mxu0  ;;  %4770 = vmatmul.mubr.bf16.gmra.mrb[52].mxu1 %v1732_v61  ;;  %v5048_v61 = vld [vmem:[%s7124_s6 + $0x68] sm:$0xff]   ;;  %v5051_v6 = vld [vmem:[%s7125_s7 + $0x40] sm:$0xff]  }
 0x306   : > { %v1664_v24 = vadd.f32 %v1655_v8, %v1488_v15  ;;  %v4728_v25 = vpop.f32.mrb[58].mxu0  ;;  %4791 = vmatprep.subr.bf16.mxu0 %v5048_v61  ;;  %v5052_v7 = vld [vmem:[%s7125_s7 + $0x48] sm:$0xff]   ;;  %4829 = vmatprep.subr.bf16.mxu1 %v5051_v6  ;;  %v5053_v8 = vld [vmem:[%s7125_s7 + $0x50] sm:$0xff]   ;;  %v5054_v15 = vld [vmem:[%s7125_s7 + $0x58] sm:$0xff]  }
 0x307   : > { %v1667_v60 = vadd.f32 %v4728_v25, %v1658_v20  ;;  %v1491_v27 = vpop.f32.mrb[59].mxu0  ;;  %v1674_v37 = vmul.f32 %v5802_v30, %v1666_v10  ;;  %4830 = vmatpush3.bf16.msra.mxu1 %v5051_v6 }
 0x308   : > { %v1665_v28 = vadd.f32 %v1656_v26, %v1491_v27  ;;  %v1672_v39 = vmul.f32 %v5802_v30, %v1664_v24  ;;  %4792 = vmatpush3.bf16.msra.mxu0 %v5048_v61  ;;  %4831 = vmatprep.subr.bf16.mxu1 %v5052_v7 }
 0x309   : > { %v1734_v35 = vpack.c.bf16 %v1667_v60, %v1666_v10  ;;  %v1675_v46 = vmul.f32 %v5802_v30, %v1667_v60  ;;  %v5857_v10 = vld [vmem:[%s7126_s8] ss:$0 sm:$0xff] }
 0x30a   : > { %v1733_v36 = vpack.c.bf16 %v1665_v28, %v1664_v24  ;;  %v1673_v49 = vmul.f32 %v5802_v30, %v1665_v28  ;;  %v5049_v30 = vld [vmem:[%s7124_s6 + $0x70] sm:$0xff]   ;;  %v1793_v20 = vmul.f32 %v5857_v10, %v5666_v3  ;;  %v1791_v25 = vmul.f32 %v5857_v10, %v5660_v1 }
 0x30b   : > { %4793 = vmatprep.subr.bf16.mxu0 %v5049_v30  ;;  %4832 = vmatpush3.bf16.msra.mxu1 %v5052_v7  ;;  %v1794_v27 = vmul.f32 %v5857_v10, %v5657_v63  ;;  %v5906_v58 = vmul.f32 %v5857_v10, %v5689_v19  ;;  %v5910_v61 = vmul.f32 %v5857_v10, %v5695_v22 }
 0x30c   : > { %v4731_v38 = vpop.f32.mrb[60].mxu0  ;;  %4773 = vmatprep.mubr.bf16.mxu1 %v1733_v36  ;;  %4794 = vmatpush3.bf16.msra.mxu0 %v5049_v30  ;;  %v1792_v36 = vmul.f32 %v5857_v10, %v5663_v2  ;;  %v5917_v6 = vmul.f32 %v5857_v10, %v5714_v34  ;;  %v5921_v7 = vmul.f32 %v5857_v10, %v5708_v31 }
 0x30d   : > { %v1683_v41 = vadd.f32 %v4731_v38, %v1674_v37  ;;  %v1504_v45 = vpop.f32.mrb[61].mxu0  ;;  %4774 = vmatmul.mubr.bf16.gmra.mrb[56].mxu1 %v1734_v35  ;;  %4795 = vmatprep.subr.bf16.mxu0 %v5050_v5  ;;  %v1797_v37 = vmul.f32 %v5857_v10, %v5682_v13  ;;  %v1795_v38 = vmul.f32 %v5857_v10, %v5676_v11 }
 0x30e   : > { %v1681_v47 = vadd.f32 %v1672_v39, %v1504_v45  ;;  %v4732_v48 = vpop.f32.mrb[62].mxu0  ;;  %4833 = vmatprep.subr.bf16.mxu1 %v5053_v8  ;;  %v5055_v39 = vld [vmem:[%s7125_s7 + $0x60] sm:$0xff]  }
 0x30f   : > { %v1684_v51 = vadd.f32 %v4732_v48, %v1675_v46  ;;  %v1507_v54 = vpop.f32.mrb[63].mxu0  ;;  %4834 = vmatpush3.bf16.msra.mxu1 %v5053_v8  ;;  %v1796_v48 = vmul.f32 %v5857_v10, %v5679_v12  ;;  %v5056_v8 = vld [vmem:[%s7125_s7 + $0x68] sm:$0xff]  }
 0x310   : > { %v1682_v55 = vadd.f32 %v1673_v49, %v1507_v54  ;;  %4796 = vmatpush3.bf16.msra.mxu0 %v5050_v5  ;;  %4835 = vmatprep.subr.bf16.mxu1 %v5054_v15  ;;  %v5895_v54 = vmul.f32 %v5857_v10, %v5698_v23 }
 0x311   : > { %v1736_v56 = vpack.c.bf16 %v1684_v51, %v1683_v41 }
 0x312   : > { %v1735_v57 = vpack.c.bf16 %v1682_v55, %v1681_v47  ;;  %v1798_v47 = vmul.f32 %v5857_v10, %v5673_v9  ;;  %v5899_v55 = vmul.f32 %v5857_v10, %v5692_v21 }
 0x313   : > { %4836 = vmatpush3.bf16.msra.mxu1 %v5054_v15 }
 0x314   : > { %4777 = vmatprep.mubr.bf16.mxu1 %v1735_v57  ;;  %4837 = vmatprep.subr.bf16.mxu1 %v5055_v39 }
 0x315   : > { %4778 = vmatmul.mubr.bf16.gmra.mrb[60].mxu1 %v1736_v56 }
 0x317   : > { %4838 = vmatpush3.bf16.msra.mxu1 %v5055_v39 }
 0x318   : > { %4839 = vmatprep.subr.bf16.mxu1 %v5056_v8 }
 0x31b   : > { %4840 = vmatpush3.bf16.msra.mxu1 %v5056_v8 }
 0x3b0   : > { %v4751_v24 = vpop.f32.mrb[32].mxu1 }
 0x3b1   : > { %v5866_v26 = vadd.f32 %v4751_v24, %v1793_v20  ;;  %v1905_v60 = vpop.f32.mrb[33].mxu1  ;;  %v5929_v24 = vmul.f32 %v5857_v10, %v5705_v29 }
 0x3b2   : > { %v5870_v28 = vadd.f32 %v1905_v60, %v1791_v25  ;;  %v4752_v35 = vpop.f32.mrb[34].mxu1  ;;  %v5933_v25 = vmul.f32 %v5857_v10, %v5711_v32 }
 0x3b3   : > { %v2034_v41 = vmul.f32 %v5866_v26, %v5866_v26  ;;  %v5883_v45 = vadd.f32 %v4752_v35, %v1794_v27  ;;  %v1908_v46 = vpop.f32.mrb[35].mxu1 }
 0x3b4   : > { %v2032_v49 = vmul.f32 %v5870_v28, %v5870_v28  ;;  %v5891_v51 = vadd.f32 %v1908_v46, %v1792_v36  ;;  %v5938_v36 = vmul.f32 %v5857_v10, %v5730_v44 }
 0x3b5   : > { %v2066_v56 = vmul.f32 %v2034_v41, %v5866_v26  ;;  %v2035_v57 = vmul.f32 %v5883_v45, %v5883_v45  ;;  %v5942_v41 = vmul.f32 %v5857_v10, %v5724_v42  ;;  %v5956_v42 = vmul.f32 %v5857_v10, %v5727_v43 }
 0x3b6   : > { %v2064_v30 = vmul.f32 %v2032_v49, %v5870_v28  ;;  %v2033_v5 = vmul.f32 %v5891_v51, %v5891_v51 }
 0x3b7   : > { %v2098_v20 = vmul.f32 0.044715, %v2066_v56  ;;  %v2067_v15 = vmul.f32 %v2035_v57, %v5883_v45 }
 0x3b8   : > { %v2096_v60 = vmul.f32 0.044715, %v2064_v30  ;;  %v2065_v27 = vmul.f32 %v2033_v5, %v5891_v51  ;;  %v4755_v35 = vpop.f32.mrb[36].mxu1  ;;  %v5949_v30 = vmul.f32 %v5857_v10, %v5721_v40 }
 0x3b9   : > { %v2130_v46 = vadd.f32 %v2098_v20, %v5866_v26  ;;  %v2099_v49 = vmul.f32 0.044715, %v2067_v15  ;;  %v5945_v56 = vadd.f32 %v4755_v35, %v1797_v37  ;;  %v1921_v57 = vpop.f32.mrb[37].mxu1  ;;  %v5057_v37 = vld [vmem:[%s7125_s7 + $0x70] sm:$0xff]  }
 0x3ba   : > { %v2128_v5 = vadd.f32 %v2096_v60, %v5870_v28  ;;  %v2097_v29 = vmul.f32 0.044715, %v2065_v27  ;;  %v5952_v44 = vadd.f32 %v1921_v57, %v1795_v38  ;;  %v4756_v34 = vpop.f32.mrb[38].mxu1  ;;  %4841 = vmatprep.subr.bf16.mxu1 %v5057_v37 }
 0x3bb   : > { %v2162_v20 = vmul.f32 0.7978846, %v2130_v46  ;;  %v2131_v15 = vadd.f32 %v2099_v49, %v5883_v45  ;;  %v2038_v39 = vmul.f32 %v5945_v56, %v5945_v56  ;;  %v5964_v60 = vadd.f32 %v4756_v34, %v1798_v47  ;;  %v1924_v38 = vpop.f32.mrb[39].mxu1  ;;  %4842 = vmatpush3.bf16.msra.mxu1 %v5057_v37 }
 0x3bc   : > { %v2160_v27 = vmul.f32 0.7978846, %v2128_v5  ;;  %v2129_v35 = vadd.f32 %v2097_v29, %v5891_v51  ;;  %v2036_v57 = vmul.f32 %v5952_v44, %v5952_v44  ;;  %v5969_v40 = vadd.f32 %v1924_v38, %v1796_v48 }
 0x3bd   : > { %5099 = vtanh.f32 %v2162_v20  ;;  %v2163_v43 = vmul.f32 0.7978846, %v2131_v15  ;;  %v2070_v46 = vmul.f32 %v2038_v39, %v5945_v56  ;;  %v2039_v49 = vmul.f32 %v5964_v60, %v5964_v60 }
 0x3be   : > { %5101 = vtanh.f32 %v2160_v27  ;;  %v2161_v34 = vmul.f32 0.7978846, %v2129_v35  ;;  %v2068_v47 = vmul.f32 %v2036_v57, %v5952_v44  ;;  %v2037_v29 = vmul.f32 %v5969_v40, %v5969_v40 }
 0x3bf   : > { %5103 = vtanh.f32 %v2163_v43  ;;  %v2102_v5 = vmul.f32 0.044715, %v2070_v46  ;;  %v2071_v48 = vmul.f32 %v2039_v49, %v5964_v60  ;;  %v5980_v20 = vmul.f32 %v5857_v10, %v5746_v53 }
 0x3c0   : > { %v2100_v15 = vmul.f32 0.044715, %v2068_v47  ;;  %v2069_v39 = vmul.f32 %v2037_v29, %v5969_v40  ;;  %v4759_v8 = vpop.f32.mrb[40].mxu1  ;;  %v5985_v38 = vmul.f32 %v5857_v10, %v5740_v52  ;;  %v5989_v27 = vmul.f32 %v5857_v10, %v5737_v50 }
 0x3c1   : > { %v2134_v43 = vadd.f32 %v2102_v5, %v5945_v56  ;;  %v2103_v35 = vmul.f32 0.044715, %v2071_v48  ;;  %v5993_v57 = vadd.f32 %v4759_v8, %v5895_v54  ;;  %v1937_v46 = vpop.f32.mrb[41].mxu1  ;;  %v5997_v49 = vmul.f32 %v5857_v10, %v5743_v33 }
 0x3c2   : > { %5105 = vtanh.f32 %v2161_v34  ;;  %v2132_v47 = vadd.f32 %v2100_v15, %v5952_v44  ;;  %v2101_v29 = vmul.f32 0.044715, %v2069_v39  ;;  %v6001_v53 = vadd.f32 %v1937_v46, %v5899_v55  ;;  %v4760_v50 = vpop.f32.mrb[42].mxu1 }
 0x3c3   : > { %v2166_v52 = vmul.f32 0.7978846, %v2134_v43  ;;  %v2135_v5 = vadd.f32 %v2103_v35, %v5964_v60  ;;  %v2042_v54 = vmul.f32 %v5993_v57, %v5993_v57  ;;  %v6007_v48 = vadd.f32 %v4760_v50, %v5906_v58  ;;  %v1940_v8 = vpop.f32.mrb[43].mxu1 }
 0x3c4   : > { %v2164_v33 = vmul.f32 0.7978846, %v2132_v47  ;;  %v2133_v37 = vadd.f32 %v2101_v29, %v5969_v40  ;;  %v2040_v34 = vmul.f32 %v6001_v53, %v6001_v53  ;;  %v6013_v55 = vadd.f32 %v1940_v8, %v5910_v61 }
 0x3c5   : > { %5107 = vtanh.f32 %v2166_v52  ;;  %v2167_v15 = vmul.f32 0.7978846, %v2135_v5  ;;  %v2074_v39 = vmul.f32 %v2042_v54, %v5993_v57  ;;  %v2043_v43 = vmul.f32 %v6007_v48, %v6007_v48 }
 0x3c6   : > { %5109 = vtanh.f32 %v2164_v33  ;;  %v2165_v50 = vmul.f32 0.7978846, %v2133_v37  ;;  %v2072_v58 = vmul.f32 %v2040_v34, %v6001_v53  ;;  %v2041_v35 = vmul.f32 %v6013_v55, %v6013_v55 }
 0x3c7   : > { %v5100_v46 = vpop.eup %5099  ;;  %5111 = vtanh.f32 %v2167_v15  ;;  %v2106_v47 = vmul.f32 0.044715, %v2074_v39  ;;  %v2075_v61 = vmul.f32 %v2043_v43, %v6007_v48  ;;  %v6024_v52 = vmul.f32 %v5857_v10, %v5762_v4 }
 0x3c8   : > { %v5102_v29 = vpop.eup %5101  ;;  %v2226_v5 = vadd.f32 1.0, %v5100_v46  ;;  %5113 = vtanh.f32 %v2165_v50  ;;  %v2104_v54 = vmul.f32 0.044715, %v2072_v58  ;;  %v2073_v33 = vmul.f32 %v2041_v35, %v6013_v55  ;;  %v4763_v8 = vpop.f32.mrb[44].mxu1 }
 0x3c9   : > { %v5104_v37 = vpop.eup %5103  ;;  %v2224_v34 = vadd.f32 1.0, %v5102_v29  ;;  %v2138_v32 = vadd.f32 %v2106_v47, %v5993_v57  ;;  %v2107_v31 = vmul.f32 0.044715, %v2075_v61  ;;  %v1953_v15 = vpop.f32.mrb[45].mxu1  ;;  %v6030_v39 = vmul.f32 %v5857_v10, %v5756_v62 }
 0x3ca   : > { %v2136_v43 = vadd.f32 %v2104_v54, %v6001_v53  ;;  %v2105_v4 = vmul.f32 0.044715, %v2073_v33  ;;  %v4764_v23 = vpop.f32.mrb[46].mxu1  ;;  %v6035_v50 = vmul.f32 %v5857_v10, %v5753_v59  ;;  %v6039_v58 = vmul.f32 %v5857_v10, %v5759_v0 }
 0x3cb   : > { %v2258_v35 = vmul.f32 0.5, %v2226_v5  ;;  %v2170_v46 = vmul.f32 0.7978846, %v2138_v32  ;;  %v2139_v47 = vadd.f32 %v2107_v31, %v6007_v48  ;;  %v6043_v61 = vadd.f32 %v4763_v8, %v5917_v6  ;;  %v1956_v29 = vpop.f32.mrb[47].mxu1 }
 0x3cc   : > { %v5106_v62 = vpop.eup %5105  ;;  %v2256_v54 = vmul.f32 0.5, %v2224_v34  ;;  %v2227_v33 = vadd.f32 1.0, %v5104_v37  ;;  %v2168_v19 = vmul.f32 0.7978846, %v2136_v43  ;;  %v2137_v21 = vadd.f32 %v2105_v4, %v6013_v55 }
 0x3cd   : > { %5115 = vtanh.f32 %v2170_v46  ;;  %v2171_v59 = vmul.f32 0.7978846, %v2139_v47  ;;  %v6048_v0 = vmul.f32 %v5857_v10, %v5778_v18  ;;  %v6052_v32 = vmul.f32 %v5857_v10, %v5772_v16 }
 0x3ce   : > { %5117 = vtanh.f32 %v2168_v19  ;;  %v2169_v31 = vmul.f32 0.7978846, %v2137_v21  ;;  %v6056_v6 = vmul.f32 %v5857_v10, %v5769_v14  ;;  %v6060_v5 = vmul.f32 %v5857_v10, %v5775_v17 }
 0x3cf   : > { %7203 = vst [vmem:[#allocation31_spill] sm:$0xff] %v6048_v0  ;;  %7204 = vst [vmem:[#allocation32_spill] sm:$0xff] %v6052_v32  ;;  %v5108_v4 = vpop.eup %5107  ;;  %v2290_v8 = vmul.f32 %v2258_v35, %v5866_v26  ;;  %v2225_v37 = vadd.f32 1.0, %v5106_v62  ;;  %v2046_v34 = vmul.f32 %v6043_v61, %v6043_v61  ;;  %v6066_v43 = vadd.f32 %v1953_v15, %v5921_v7 }
 0x3d0   : > { %7205 = vst [vmem:[#allocation33_spill] sm:$0xff] %v6056_v6  ;;  %7206 = vst [vmem:[#allocation34_spill] sm:$0xff] %v6060_v5  ;;  %v5110_v19 = vpop.eup %5109  ;;  %v6069_v21 = vmul.f32 %v2256_v54, %v5870_v28  ;;  %v2259_v46 = vmul.f32 0.5, %v2227_v33  ;;  %5119 = vtanh.f32 %v2171_v59  ;;  %v6072_v47 = vadd.f32 %v4764_v23, %v5929_v24  ;;  %v4767_v10 = vpop.f32.mrb[48].mxu1 }
 0x3d1   : > { %v5112_v18 = vpop.eup %5111  ;;  %v2230_v14 = vadd.f32 1.0, %v5108_v4  ;;  %v2078_v62 = vmul.f32 %v2046_v34, %v6043_v61  ;;  %v2044_v26 = vmul.f32 %v6066_v43, %v6066_v43  ;;  %v6078_v7 = vadd.f32 %v1956_v29, %v5933_v25  ;;  %v1969_v15 = vpop.f32.mrb[49].mxu1 }
 0x3d2   : > { %7207 = vst [vmem:[#allocation35_spill] sm:$0xff] %v6072_v47  ;;  %v5114_v35 = vpop.eup %5113  ;;  %v2228_v28 = vadd.f32 1.0, %v5110_v19  ;;  %5121 = vtanh.f32 %v2169_v31  ;;  %v2047_v59 = vmul.f32 %v6072_v47, %v6072_v47  ;;  %v6083_v23 = vadd.f32 %v4767_v10, %v5938_v36  ;;  %v4768_v24 = vpop.f32.mrb[50].mxu1 }
 0x3d3   : > { %v2257_v54 = vmul.f32 0.5, %v2225_v37  ;;  %v2231_v33 = vadd.f32 1.0, %v5112_v18  ;;  %v2110_v4 = vmul.f32 0.044715, %v2078_v62  ;;  %v2076_v34 = vmul.f32 %v2044_v26, %v6066_v43  ;;  %v1972_v17 = vpop.f32.mrb[51].mxu1 }
 0x3d4   : > { %v6087_v25 = vadd.f32 %v2290_v8, %v5666_v3  ;;  %v2229_v29 = vadd.f32 1.0, %v5114_v35  ;;  %v2079_v19 = vmul.f32 %v2047_v59, %v6072_v47  ;;  %v2045_v31 = vmul.f32 %v6078_v7, %v6078_v7 }
 0x3d5   : > { %v2291_v16 = vmul.f32 %v2259_v46, %v5883_v45  ;;  %v2262_v36 = vmul.f32 0.5, %v2230_v14  ;;  %v2142_v10 = vadd.f32 %v2110_v4, %v6043_v61  ;;  %v2108_v37 = vmul.f32 0.044715, %v2076_v34 }
 0x3d6   : > { %v2260_v18 = vmul.f32 0.5, %v2228_v28  ;;  %v2111_v62 = vmul.f32 0.044715, %v2079_v19  ;;  %v2077_v26 = vmul.f32 %v2045_v31, %v6078_v7  ;;  %v2050_v3 = vmul.f32 %v6083_v23, %v6083_v23 }
 0x3d7   : > { %v5116_v8 = vpop.eup %5115  ;;  %v2263_v35 = vmul.f32 0.5, %v2231_v33  ;;  %v2174_v5 = vmul.f32 0.7978846, %v2142_v10  ;;  %v2140_v59 = vadd.f32 %v2108_v37, %v6066_v43  ;;  %v6099_v6 = vadd.f32 %v1969_v15, %v5942_v41 }
 0x3d8   : > { %v5118_v45 = vpop.eup %5117  ;;  %v2261_v14 = vmul.f32 0.5, %v2229_v29  ;;  %v2143_v46 = vadd.f32 %v2111_v62, %v6072_v47  ;;  %v2109_v4 = vmul.f32 0.044715, %v2077_v26  ;;  %v2082_v28 = vmul.f32 %v2050_v3, %v6083_v23  ;;  %v4771_v34 = vpop.f32.mrb[52].mxu1 }
 0x3d9   : > { %v2234_v19 = vadd.f32 1.0, %v5116_v8  ;;  %5123 = vtanh.f32 %v2174_v5  ;;  %v2172_v31 = vmul.f32 0.7978846, %v2140_v59  ;;  %v2048_v33 = vmul.f32 %v6099_v6, %v6099_v6  ;;  %v1985_v10 = vpop.f32.mrb[53].mxu1 }
 0x3da   : > { %v5120_v32 = vpop.eup %5119  ;;  %v2289_v37 = vmul.f32 %v2257_v54, %v5891_v51  ;;  %v2232_v41 = vadd.f32 1.0, %v5118_v45  ;;  %v2175_v15 = vmul.f32 0.7978846, %v2143_v46  ;;  %v2141_v29 = vadd.f32 %v2109_v4, %v6078_v7  ;;  %v4772_v0 = vpop.f32.mrb[54].mxu1 }
 0x3db   : > { %v6108_v62 = vadd.f32 %v2291_v16, %v5657_v63  ;;  %v6111_v26 = vmul.f32 %v2262_v36, %v5945_v56  ;;  %v6114_v5 = vmul.f32 %v2260_v18, %v5952_v44  ;;  %v2114_v3 = vmul.f32 0.044715, %v2082_v28  ;;  %v1988_v8 = vpop.f32.mrb[55].mxu1 }
 0x3dc   : > { %v5122_v59 = vpop.eup %5121  ;;  %v6117_v47 = vmul.f32 %v2263_v35, %v5964_v60  ;;  %v6120_v51 = vmul.f32 %v2261_v14, %v5969_v40  ;;  %5125 = vtanh.f32 %v2172_v31  ;;  %v2173_v54 = vmul.f32 0.7978846, %v2141_v29 }
 0x3dd   : > { %v2266_v45 = vmul.f32 0.5, %v2234_v19  ;;  %v2235_v63 = vadd.f32 1.0, %v5120_v32  ;;  %v2146_v16 = vadd.f32 %v2114_v3, %v6083_v23  ;;  %v2080_v56 = vmul.f32 %v2048_v33, %v6099_v6 }
 0x3de   : > { %v2264_v36 = vmul.f32 0.5, %v2232_v41  ;;  %5127 = vtanh.f32 %v2175_v15  ;;  %v6125_v44 = vadd.f32 %v4768_v24, %v5949_v30  ;;  %v6128_v18 = vadd.f32 %v1972_v17, %v5956_v42 }
 0x3df   : > { %v2233_v60 = vadd.f32 1.0, %v5122_v59  ;;  %5129 = vtanh.f32 %v2173_v54  ;;  %v2178_v40 = vmul.f32 0.7978846, %v2146_v16  ;;  %v2112_v35 = vmul.f32 0.044715, %v2080_v56 }
 0x3e0   : > { %v2051_v14 = vmul.f32 %v6125_v44, %v6125_v44  ;;  %v2049_v32 = vmul.f32 %v6128_v18, %v6128_v18  ;;  %v6136_v46 = vadd.f32 %v6069_v21, %v5660_v1  ;;  %v6139_v30 = vadd.f32 %v2289_v37, %v5663_v2  ;;  %v6141_v24 = vpop.f32.mrb[56].mxu1 }
 0x3e1   : > { %v2144_v42 = vadd.f32 %v2112_v35, %v6099_v6  ;;  %v2421_v17 = vpack.c.bf16 %v6108_v62, %v6087_v25  ;;  %v6147_v4 = vadd.f32 %v4771_v34, %v5980_v20  ;;  %v6150_v28 = vadd.f32 %v1985_v10, %v5985_v38  ;;  %v6152_v19 = vpop.f32.mrb[57].mxu1 }
 0x3e2   : > { %v2083_v1 = vmul.f32 %v2051_v14, %v6125_v44  ;;  %v2081_v2 = vmul.f32 %v2049_v32, %v6128_v18  ;;  %v2420_v21 = vpack.c.bf16 %v6139_v30, %v6136_v46  ;;  %v6159_v31 = vadd.f32 %v4772_v0, %v5989_v27  ;;  %v6161_v33 = vpop.f32.mrb[58].mxu1 }
 0x3e3   : > { %v5124_v37 = vpop.eup %5123  ;;  %v2176_v20 = vmul.f32 0.7978846, %v2144_v42  ;;  %v2054_v38 = vmul.f32 %v6147_v4, %v6147_v4  ;;  %v2052_v34 = vmul.f32 %v6150_v28, %v6150_v28  ;;  %v6168_v10 = vadd.f32 %v1988_v8, %v5997_v49  ;;  %v6170_v41 = vpop.f32.mrb[59].mxu1 }
 0x3e4   : > { %v2238_v15 = vadd.f32 1.0, %v5124_v37  ;;  %v2115_v29 = vmul.f32 0.044715, %v2083_v1  ;;  %v2113_v3 = vmul.f32 0.044715, %v2081_v2  ;;  %4797 = vmatprep.mubr.bf16.mxu0 %v2420_v21  ;;  %v2055_v0 = vmul.f32 %v6159_v31, %v6159_v31 }
 0x3e5   : > { %v2267_v27 = vmul.f32 0.5, %v2235_v63  ;;  %5131 = vtanh.f32 %v2176_v20  ;;  %4798 = vmatmul.mubr.bf16.vlgmr.msra.gmra.mrb[64].mxu0 %v2421_v17  ;;  %v2086_v59 = vmul.f32 %v2054_v38, %v6147_v4  ;;  %v2084_v54 = vmul.f32 %v2052_v34, %v6150_v28 }
 0x3e6   : > { %v5126_v16 = vpop.eup %5125  ;;  %v2265_v56 = vmul.f32 0.5, %v2233_v60  ;;  %v2147_v49 = vadd.f32 %v2115_v29, %v6125_v44  ;;  %v2145_v8 = vadd.f32 %v2113_v3, %v6128_v18  ;;  %v2053_v35 = vmul.f32 %v6168_v10, %v6168_v10 }
 0x3e7   : > { %5133 = vtanh.f32 %v2178_v40  ;;  %v2118_v14 = vmul.f32 0.044715, %v2086_v59  ;;  %v2116_v32 = vmul.f32 0.044715, %v2084_v54  ;;  %v2087_v63 = vmul.f32 %v2055_v0, %v6159_v31 }
 0x3e8   : > { %v5128_v42 = vpop.eup %5127  ;;  %v6182_v17 = vmul.f32 %v2266_v45, %v5993_v57  ;;  %v2270_v1 = vmul.f32 0.5, %v2238_v15  ;;  %v2179_v2 = vmul.f32 0.7978846, %v2147_v49  ;;  %v2177_v21 = vmul.f32 0.7978846, %v2145_v8  ;;  %v6184_v60 = vpop.f32.mrb[60].mxu1 }
 0x3e9   : > { %v5130_v37 = vpop.eup %5129  ;;  %v2296_v20 = vmul.f32 %v2264_v36, %v6001_v53  ;;  %v2236_v38 = vadd.f32 1.0, %v5126_v16  ;;  %v2150_v34 = vadd.f32 %v2118_v14, %v6147_v4  ;;  %v2148_v40 = vadd.f32 %v2116_v32, %v6150_v28  ;;  %v6189_v29 = vpop.f32.mrb[61].mxu1 }
 0x3ea   : > { %v2299_v3 = vmul.f32 %v2267_v27, %v6007_v48  ;;  %5135 = vtanh.f32 %v2179_v2  ;;  %v2119_v57 = vmul.f32 0.044715, %v2087_v63  ;;  %v2085_v45 = vmul.f32 %v2053_v35, %v6168_v10  ;;  %v6193_v15 = vpop.f32.mrb[62].mxu1 }
 0x3eb   : > { %v2297_v0 = vmul.f32 %v2265_v56, %v6013_v55  ;;  %v2239_v59 = vadd.f32 1.0, %v5128_v42  ;;  %5137 = vtanh.f32 %v2177_v21  ;;  %v2182_v53 = vmul.f32 0.7978846, %v2150_v34  ;;  %v6196_v36 = vpop.f32.mrb[63].mxu1 }
 0x3ec   : > { %v6199_v54 = vmul.f32 %v2270_v1, %v6043_v61  ;;  %v2180_v16 = vmul.f32 0.7978846, %v2148_v40  ;;  %v2151_v49 = vadd.f32 %v2119_v57, %v6159_v31  ;;  %v2117_v48 = vmul.f32 0.044715, %v2085_v45 }
 0x3ed   : > { %v2268_v27 = vmul.f32 0.5, %v2236_v38  ;;  %5139 = vtanh.f32 %v2182_v53  ;;  %v6204_v8 = vadd.f32 %v6114_v5, %v5676_v11  ;;  %v6208_v55 = vadd.f32 %v6120_v51, %v5679_v12  ;;  %v7208_v38 = vld [vmem:[#allocation9_spill] sm:$0xff] }
 0x3ee   : > { %v2237_v56 = vadd.f32 1.0, %v5130_v37  ;;  %5141 = vtanh.f32 %v2180_v16  ;;  %v2183_v35 = vmul.f32 0.7978846, %v2151_v49  ;;  %v2149_v61 = vadd.f32 %v2117_v48, %v6168_v10  ;;  %v7210_v49 = vld [vmem:[#allocation10_spill] sm:$0xff] }
 0x3ef   : > { %v5132_v14 = vpop.eup %5131  ;;  %v2422_v32 = vpack.c.bf16 %v6208_v55, %v6204_v8  ;;  %v6215_v63 = vadd.f32 %v6111_v26, %v5682_v13  ;;  %v6219_v11 = vadd.f32 %v6117_v47, %v5673_v9  ;;  %v6223_v12 = vadd.f32 %v6141_v24, %v6024_v52 }
 0x3f0   : > { %v2271_v5 = vmul.f32 0.5, %v2239_v59  ;;  %v2240_v51 = vadd.f32 1.0, %v5132_v14  ;;  %5143 = vtanh.f32 %v2183_v35  ;;  %v2181_v42 = vmul.f32 0.7978846, %v2149_v61  ;;  %v7211_v14 = vld [vmem:[#allocation35_spill] sm:$0xff] }
 0x3f1   : > { %v5134_v1 = vpop.eup %5133  ;;  %4801 = vmatprep.mubr.bf16.mxu0 %v2422_v32  ;;  %v2423_v2 = vpack.c.bf16 %v6219_v11, %v6215_v63  ;;  %v2058_v13 = vmul.f32 %v6223_v12, %v6223_v12  ;;  %v6231_v9 = vadd.f32 %v6152_v19, %v6030_v39  ;;  %v6235_v52 = vadd.f32 %v6161_v33, %v6035_v50 }
 0x3f2   : > { %v6238_v47 = vmul.f32 %v2268_v27, %v6066_v43  ;;  %v2269_v26 = vmul.f32 0.5, %v2237_v56  ;;  %5145 = vtanh.f32 %v2181_v42  ;;  %v6242_v24 = vadd.f32 %v6170_v41, %v6039_v58  ;;  %v7209_v41 = vld [vmem:[#allocation8_spill] sm:$0xff] }
 0x3f3   : > { %4802 = vmatmul.mubr.bf16.gmra.mrb[68].mxu0 %v2423_v2  ;;  %v2090_v21 = vmul.f32 %v2058_v13, %v6223_v12  ;;  %v2056_v39 = vmul.f32 %v6231_v9, %v6231_v9  ;;  %v2059_v19 = vmul.f32 %v6235_v52, %v6235_v52  ;;  %v6250_v50 = vadd.f32 %v2297_v0, %v5695_v22 }
 0x3f4   : > { %v5136_v43 = vpop.eup %5135  ;;  %v2242_v33 = vadd.f32 1.0, %v5134_v1  ;;  %v2057_v37 = vmul.f32 %v6242_v24, %v6242_v24  ;;  %v6255_v58 = vadd.f32 %v2296_v20, %v7208_v38  ;;  %v6258_v34 = vadd.f32 %v2299_v3, %v7209_v41  ;;  %v7212_v1 = vld [vmem:[#allocation31_spill] sm:$0xff] }
 0x3f5   : > { %v5138_v40 = vpop.eup %5137  ;;  %v2272_v57 = vmul.f32 0.5, %v2240_v51  ;;  %v2122_v45 = vmul.f32 0.044715, %v2090_v21  ;;  %v2088_v59 = vmul.f32 %v2056_v39, %v6231_v9  ;;  %v2091_v53 = vmul.f32 %v2059_v19, %v6235_v52 }
 0x3f6   : > { %v2241_v22 = vadd.f32 1.0, %v5138_v40  ;;  %v2089_v0 = vmul.f32 %v2057_v37, %v6242_v24  ;;  %v2424_v16 = vpack.c.bf16 %v6250_v50, %v6255_v58  ;;  %v6267_v20 = vadd.f32 %v6182_v17, %v7210_v49  ;;  %v7214_v49 = vld [vmem:[#allocation33_spill] sm:$0xff] }
 0x3f7   : > { %v5140_v48 = vpop.eup %5139  ;;  %v2243_v3 = vadd.f32 1.0, %v5136_v43  ;;  %v2154_v27 = vadd.f32 %v2122_v45, %v6223_v12  ;;  %v2120_v56 = vmul.f32 0.044715, %v2088_v59  ;;  %v2123_v35 = vmul.f32 0.044715, %v2091_v53 }
 0x3f8   : > { %v5142_v61 = vpop.eup %5141  ;;  %v2303_v32 = vmul.f32 %v2271_v5, %v7211_v14  ;;  %v2121_v51 = vmul.f32 0.044715, %v2089_v0  ;;  %4805 = vmatprep.mubr.bf16.mxu0 %v2424_v16  ;;  %v2425_v42 = vpack.c.bf16 %v6258_v34, %v6267_v20  ;;  %v6275_v2 = vadd.f32 %v6184_v60, %v7212_v1  ;;  %v7218_v1 = vld [vmem:[#allocation13_spill] sm:$0xff] }
 0x3f9   : > { %v2273_v17 = vmul.f32 0.5, %v2241_v22  ;;  %v2244_v13 = vadd.f32 1.0, %v5142_v61  ;;  %v2186_v21 = vmul.f32 0.7978846, %v2154_v27  ;;  %v2152_v39 = vadd.f32 %v2120_v56, %v6231_v9  ;;  %v7215_v56 = vld [vmem:[#allocation34_spill] sm:$0xff] }
 0x3fa   : > { %v5144_v19 = vpop.eup %5143  ;;  %v2301_v43 = vmul.f32 %v2269_v26, %v6078_v7  ;;  %v2274_v37 = vmul.f32 0.5, %v2242_v33  ;;  %v2155_v5 = vadd.f32 %v2123_v35, %v6235_v52  ;;  %v2153_v38 = vadd.f32 %v2121_v51, %v6242_v24 }
 0x3fb   : > { %v2304_v41 = vmul.f32 %v2272_v57, %v6099_v6  ;;  %v2275_v40 = vmul.f32 0.5, %v2243_v3  ;;  %v2246_v45 = vadd.f32 1.0, %v5140_v48  ;;  %v2184_v59 = vmul.f32 0.7978846, %v2152_v39  ;;  %4806 = vmatmul.mubr.bf16.gmra.mrb[72].mxu0 %v2425_v42  ;;  %v7213_v6 = vld [vmem:[#allocation32_spill] sm:$0xff] }
 0x3fc   : > { %v5146_v60 = vpop.eup %5145  ;;  %5147 = vtanh.f32 %v2186_v21  ;;  %v2187_v53 = vmul.f32 0.7978846, %v2155_v5  ;;  %v2185_v22 = vmul.f32 0.7978846, %v2153_v38  ;;  %v2062_v0 = vmul.f32 %v6275_v2, %v6275_v2 }
 0x3fd   : > { %v2305_v7 = vmul.f32 %v2273_v17, %v6128_v18  ;;  %v2276_v26 = vmul.f32 0.5, %v2244_v13  ;;  %v2245_v33 = vadd.f32 1.0, %v5146_v60  ;;  %5149 = vtanh.f32 %v2184_v59  ;;  %v7225_v60 = vld [vmem:[#allocation17_spill] sm:$0xff] }
 0x3fe   : > { %5151 = vtanh.f32 %v2187_v53  ;;  %v2094_v16 = vmul.f32 %v2062_v0, %v6275_v2  ;;  %v6288_v57 = vadd.f32 %v6189_v29, %v7213_v6  ;;  %v6292_v48 = vadd.f32 %v6193_v15, %v7214_v49  ;;  %v7216_v29 = vld [vmem:[#allocation12_spill] sm:$0xff] }
 0x3ff   : > { %v2247_v3 = vadd.f32 1.0, %v5144_v19  ;;  %v2277_v27 = vmul.f32 0.5, %v2245_v33  ;;  %5153 = vtanh.f32 %v2185_v22  ;;  %v6296_v18 = vadd.f32 %v6196_v36, %v7215_v56  ;;  %v7220_v36 = vld [vmem:[#allocation14_spill] sm:$0xff] }
 0x400   : > { %v2126_v35 = vmul.f32 0.044715, %v2094_v16  ;;  %v2060_v61 = vmul.f32 %v6288_v57, %v6288_v57  ;;  %v2063_v14 = vmul.f32 %v6292_v48, %v6292_v48  ;;  %v6304_v51 = vadd.f32 %v6238_v47, %v7216_v29  ;;  %v7221_v47 = vld [vmem:[#allocation11_spill] sm:$0xff] }
 0x401   : > { %v2309_v15 = vmul.f32 %v2277_v27, %v6168_v10  ;;  %v2061_v42 = vmul.f32 %v6296_v18, %v6296_v18  ;;  %v6310_v17 = vadd.f32 %v2301_v43, %v7218_v1  ;;  %v6314_v13 = vadd.f32 %v6199_v54, %v7220_v36  ;;  %v7223_v43 = vld [vmem:[#allocation16_spill] sm:$0xff]  ;;  %v7229_v1 = vld [vmem:[#allocation15_spill] sm:$0xff] }
 0x402   : > { %7217 = vst [vmem:[#allocation9_spill] sm:$0xff] %v6304_v51  ;;  %v2158_v21 = vadd.f32 %v2126_v35, %v6275_v2  ;;  %v2092_v39 = vmul.f32 %v2060_v61, %v6288_v57  ;;  %v2095_v19 = vmul.f32 %v2063_v14, %v6292_v48  ;;  %v6320_v5 = vadd.f32 %v2303_v32, %v7221_v47 }
 0x403   : > { %7219 = vst [vmem:[#allocation8_spill] sm:$0xff] %v6310_v17  ;;  %v2093_v10 = vmul.f32 %v2061_v42, %v6296_v18  ;;  %v2426_v38 = vpack.c.bf16 %v6310_v17, %v6304_v51  ;;  %v6326_v59 = vadd.f32 %v2304_v41, %v7223_v43  ;;  %v6329_v54 = vadd.f32 %v2305_v7, %v7225_v60 }
 0x404   : > { %7222 = vst [vmem:[#allocation10_spill] sm:$0xff] %v6320_v5  ;;  %v2307_v53 = vmul.f32 %v2275_v40, %v6125_v44  ;;  %v2124_v22 = vmul.f32 0.044715, %v2092_v39  ;;  %v2127_v0 = vmul.f32 0.044715, %v2095_v19  ;;  %v2427_v33 = vpack.c.bf16 %v6320_v5, %v6314_v13  ;;  %v7231_v39 = vld [vmem:[#allocation20_spill] sm:$0xff] }
 0x405   : > { %7224 = vst [vmem:[#allocation35_spill] sm:$0xff] %v6326_v59  ;;  %7226 = vst [vmem:[#allocation31_spill] sm:$0xff] %v6329_v54  ;;  %v2308_v32 = vmul.f32 %v2276_v26, %v6150_v28  ;;  %v2190_v16 = vmul.f32 0.7978846, %v2158_v21  ;;  %v2125_v6 = vmul.f32 0.044715, %v2093_v10  ;;  %4809 = vmatprep.mubr.bf16.mxu0 %v2426_v38  ;;  %v2428_v49 = vpack.c.bf16 %v6329_v54, %v6326_v59 }
 0x406   : > { %v5148_v41 = vpop.eup %5147  ;;  %v2306_v27 = vmul.f32 %v2274_v37, %v6083_v23  ;;  %v2156_v7 = vadd.f32 %v2124_v22, %v6288_v57  ;;  %v2159_v44 = vadd.f32 %v2127_v0, %v6292_v48  ;;  %4810 = vmatmul.mubr.bf16.gmra.mrb[76].mxu0 %v2427_v33  ;;  %v2279_v56 = vmul.f32 0.5, %v2247_v3  ;;  %v7227_v28 = vld [vmem:[#allocation21_spill] sm:$0xff]  ;;  %v7233_v10 = vld [vmem:[#allocation18_spill] sm:$0xff] }
 0x407   : > { %v5150_v40 = vpop.eup %5149  ;;  %v2157_v35 = vadd.f32 %v2125_v6, %v6296_v18  ;;  %4813 = vmatprep.mubr.bf16.mxu0 %v2428_v49  ;;  %v6342_v26 = vadd.f32 %v2309_v15, %v7227_v28  ;;  %v6345_v36 = vadd.f32 %v2307_v53, %v7229_v1  ;;  %v2278_v37 = vmul.f32 0.5, %v2246_v45  ;;  %v7237_v49 = vld [vmem:[#allocation25_spill] sm:$0xff] }
 0x408   : > { %v5152_v61 = vpop.eup %5151  ;;  %v2248_v14 = vadd.f32 1.0, %v5150_v40  ;;  %v2188_v29 = vmul.f32 0.7978846, %v2156_v7  ;;  %v2191_v42 = vmul.f32 0.7978846, %v2159_v44  ;;  %5155 = vtanh.f32 %v2190_v16  ;;  %v7235_v16 = vld [vmem:[#allocation19_spill] sm:$0xff] }
 0x409   : > { %7228 = vst [vmem:[#allocation32_spill] sm:$0xff] %v6342_v26  ;;  %7230 = vst [vmem:[#allocation33_spill] sm:$0xff] %v6345_v36  ;;  %v5154_v23 = vpop.eup %5153  ;;  %v2189_v21 = vmul.f32 0.7978846, %v2157_v35  ;;  %v6348_v19 = vadd.f32 %v2308_v32, %v7231_v39  ;;  %v6351_v15 = vadd.f32 %v2306_v27, %v7233_v10  ;;  %v2311_v38 = vmul.f32 %v2279_v56, %v6159_v31  ;;  %v7239_v7 = vld [vmem:[#allocation24_spill] sm:$0xff]  ;;  %v7241_v56 = vld [vmem:[#allocation22_spill] sm:$0xff] }
 0x40a   : > { %v2280_v3 = vmul.f32 0.5, %v2248_v14  ;;  %v2249_v47 = vadd.f32 1.0, %v5154_v23  ;;  %5157 = vtanh.f32 %v2188_v29  ;;  %v2251_v60 = vadd.f32 1.0, %v5152_v61 }
 0x40b   : > { %7232 = vst [vmem:[#allocation34_spill] sm:$0xff] %v6348_v19  ;;  %7234 = vst [vmem:[#allocation12_spill] sm:$0xff] %v6351_v15  ;;  %5159 = vtanh.f32 %v2191_v42  ;;  %v2430_v43 = vpack.c.bf16 %v6342_v26, %v6348_v19  ;;  %v2429_v45 = vpack.c.bf16 %v6345_v36, %v6351_v15  ;;  %v2310_v0 = vmul.f32 %v2278_v37, %v6147_v4 }
 0x40c   : > { %v2281_v53 = vmul.f32 0.5, %v2249_v47  ;;  %5161 = vtanh.f32 %v2189_v21  ;;  %v2312_v22 = vmul.f32 %v2280_v3, %v6231_v9  ;;  %v2250_v33 = vadd.f32 1.0, %v5148_v41  ;;  %v7243_v3 = vld [vmem:[#allocation23_spill] sm:$0xff] }
 0x40d   : > { %v2283_v31 = vmul.f32 0.5, %v2251_v60  ;;  %v6362_v6 = vadd.f32 %v2311_v38, %v7235_v16  ;;  %v6371_v9 = vadd.f32 %v2310_v0, %v7241_v56  ;;  %v7249_v16 = vld [vmem:[#allocation27_spill] sm:$0xff] }
 0x40e   : > { %v2313_v32 = vmul.f32 %v2281_v53, %v6242_v24  ;;  %4814 = vmatmul.mubr.bf16.gmra.mrb[80].mxu0 %v2429_v45  ;;  %v6368_v44 = vadd.f32 %v2312_v22, %v7239_v7  ;;  %v2282_v40 = vmul.f32 0.5, %v2250_v33  ;;  %v7247_v22 = vld [vmem:[#allocation28_spill] sm:$0xff]  ;;  %v7248_v33 = vld [vmem:[#allocation29_spill] sm:$0xff] }
 0x40f   : > { %4817 = vmatprep.mubr.bf16.mxu0 %v2430_v43  ;;  %7236 = vst [vmem:[#allocation13_spill] sm:$0xff] %v6362_v6  ;;  %7242 = vst [vmem:[#allocation16_spill] sm:$0xff] %v6371_v9  ;;  %v2315_v35 = vmul.f32 %v2283_v31, %v6235_v52  ;;  %v2431_v28 = vpack.c.bf16 %v6362_v6, %v6371_v9  ;;  %v7245_v43 = vld [vmem:[#allocation26_spill] sm:$0xff] }
 0x410   : > { %v6365_v27 = vadd.f32 %v2313_v32, %v7237_v49  ;;  %7240 = vst [vmem:[#allocation11_spill] sm:$0xff] %v6368_v44  ;;  %v2314_v42 = vmul.f32 %v2282_v40, %v6223_v12  ;;  %v5058_v40 = vld [vmem:[%s7125_s7 + $0x78] sm:$0xff]  }
 0x411   : > { %v6380_v47 = vadd.f32 %v2315_v35, %v7243_v3  ;;  %4843 = vmatprep.subr.bf16.mxu1 %v5058_v40 }
 0x412   : > { %7238 = vst [vmem:[#allocation14_spill] sm:$0xff] %v6365_v27  ;;  %v5156_v4 = vpop.eup %5155  ;;  %v2432_v24 = vpack.c.bf16 %v6365_v27, %v6368_v44  ;;  %v6384_v60 = vadd.f32 %v2314_v42, %v7245_v43  ;;  %4844 = vmatpush3.bf16.msra.mxu1 %v5058_v40 }
 0x413   : > { %v2254_v1 = vadd.f32 1.0, %v5156_v4  ;;  %7244 = vst [vmem:[#allocation17_spill] sm:$0xff] %v6380_v47 }
 0x414   : > { %v5158_v41 = vpop.eup %5157  ;;  %7246 = vst [vmem:[#allocation21_spill] sm:$0xff] %v6384_v60  ;;  %v2433_v45 = vpack.c.bf16 %v6380_v47, %v6384_v60 }
 0x415   : > { %v5160_v61 = vpop.eup %5159  ;;  %v2252_v14 = vadd.f32 1.0, %v5158_v41  ;;  %v2286_v38 = vmul.f32 0.5, %v2254_v1 }
 0x416   : > { %v5162_v29 = vpop.eup %5161  ;;  %v2255_v23 = vadd.f32 1.0, %v5160_v61  ;;  %4818 = vmatmul.mubr.bf16.gmra.mrb[84].mxu0 %v2431_v28 }
 0x417   : > { %v2284_v37 = vmul.f32 0.5, %v2252_v14  ;;  %v2253_v21 = vadd.f32 1.0, %v5162_v29  ;;  %4821 = vmatprep.mubr.bf16.mxu0 %v2432_v24 }
 0x418   : > { %v2287_v39 = vmul.f32 0.5, %v2255_v23 }
 0x419   : > { %v2316_v52 = vmul.f32 %v2284_v37, %v6288_v57  ;;  %v2285_v10 = vmul.f32 0.5, %v2253_v21  ;;  %v2318_v57 = vmul.f32 %v2286_v38, %v6275_v2  ;;  %v6413_v2 = vld [vmem:[%s7123_s5 + $0x1] ss:$0 sm:$0xff] }
 0x41a   : > { %v2319_v12 = vmul.f32 %v2287_v39, %v6292_v48  ;;  %v7250_v48 = vld [vmem:[#allocation30_spill] sm:$0xff]  ;;  %v2700_v56 = vmul.f32 0.0, %v6413_v2 }
 0x41b   : > { %v2317_v53 = vmul.f32 %v2285_v10, %v6296_v18  ;;  %v6391_v0 = vadd.f32 %v2316_v52, %v7247_v22  ;;  %v6403_v18 = vadd.f32 %v2318_v57, %v7250_v48 }
 0x41c   : > { %v6400_v49 = vadd.f32 %v2319_v12, %v7249_v16 }
 0x41d   : > { %v6394_v32 = vadd.f32 %v2317_v53, %v7248_v33 }
 0x41e   : > { %4822 = vmatmul.mubr.bf16.gmra.mrb[88].mxu0 %v2433_v45  ;;  %v2435_v7 = vpack.c.bf16 %v6400_v49, %v6403_v18 }
 0x41f   : > { %v2434_v31 = vpack.c.bf16 %v6394_v32, %v6391_v0 }
 0x421   : > { %4825 = vmatprep.mubr.bf16.mxu0 %v2434_v31 }
 0x426   : > { %4826 = vmatmul.mubr.bf16.gmra.mrb[92].mxu0 %v2435_v7 }
 0x4b8   : > { %v4799_v4 = vpop.f32.mrb[64].mxu0 }
 0x4b9   : > { %v2535_v24 = vpop.f32.mrb[65].mxu0  ;;  %v2707_v35 = vadd.f32 %v4799_v4, %v2700_v56 }
 0x4ba   : > { %v4800_v41 = vpop.f32.mrb[66].mxu0  ;;  %v2705_v14 = vadd.f32 %v2700_v56, %v2535_v24 }
 0x4bb   : > { %v2708_v28 = vadd.f32 %v4800_v41, %v2700_v56  ;;  %v2538_v61 = vpop.f32.mrb[67].mxu0  ;;  %v2715_v23 = vmul.f32 %v6413_v2, %v2707_v35 }
 0x4bc   : > { %v2706_v29 = vadd.f32 %v2700_v56, %v2538_v61  ;;  %v2713_v21 = vmul.f32 %v6413_v2, %v2705_v14 }
 0x4bd   : > { %v2858_v42 = vpack.c.bf16 %v2708_v28, %v2707_v35  ;;  %v2716_v52 = vmul.f32 %v6413_v2, %v2708_v28 }
 0x4be   : > { %v2857_v1 = vpack.c.bf16 %v2706_v29, %v2705_v14  ;;  %v2714_v43 = vmul.f32 %v6413_v2, %v2706_v29 }
 0x4c0   : > { %4845 = vmatprep.mubr.bf16.mxu1 %v2857_v1 }
 0x4c1   : > { %4846 = vmatmul.mubr.bf16.vlgmr.msra.gmra.mrb[64].mxu1 %v2858_v42 }
 0x4c6   : > { %v4803_v37 = vpop.f32.mrb[68].mxu0 }
 0x4c7   : > { %v2723_v39 = vadd.f32 %v4803_v37, %v2715_v23  ;;  %v2551_v3 = vpop.f32.mrb[69].mxu0 }
 0x4c8   : > { %v2721_v10 = vadd.f32 %v2713_v21, %v2551_v3  ;;  %v4804_v38 = vpop.f32.mrb[70].mxu0 }
 0x4c9   : > { %v2724_v53 = vadd.f32 %v4804_v38, %v2716_v52  ;;  %v2554_v12 = vpop.f32.mrb[71].mxu0  ;;  %v2731_v57 = vmul.f32 %v6413_v2, %v2723_v39 }
 0x4ca   : > { %v2722_v45 = vadd.f32 %v2714_v43, %v2554_v12  ;;  %v2729_v16 = vmul.f32 %v6413_v2, %v2721_v10 }
 0x4cb   : > { %v2860_v22 = vpack.c.bf16 %v2724_v53, %v2723_v39  ;;  %v2732_v40 = vmul.f32 %v6413_v2, %v2724_v53 }
 0x4cc   : > { %v2859_v33 = vpack.c.bf16 %v2722_v45, %v2721_v10  ;;  %v2730_v24 = vmul.f32 %v6413_v2, %v2722_v45 }
 0x4ce   : > { %v4807_v31 = vpop.f32.mrb[72].mxu0  ;;  %4849 = vmatprep.mubr.bf16.mxu1 %v2859_v33 }
 0x4cf   : > { %v2739_v48 = vadd.f32 %v4807_v31, %v2731_v57  ;;  %v2567_v7 = vpop.f32.mrb[73].mxu0  ;;  %4850 = vmatmul.mubr.bf16.gmra.mrb[68].mxu1 %v2860_v22 }
 0x4d0   : > { %v2737_v56 = vadd.f32 %v2729_v16, %v2567_v7  ;;  %v4808_v4 = vpop.f32.mrb[74].mxu0 }
 0x4d1   : > { %v2740_v41 = vadd.f32 %v4808_v4, %v2732_v40  ;;  %v2570_v35 = vpop.f32.mrb[75].mxu0  ;;  %v2747_v29 = vmul.f32 %v6413_v2, %v2739_v48 }
 0x4d2   : > { %v2738_v28 = vadd.f32 %v2730_v24, %v2570_v35  ;;  %v2745_v1 = vmul.f32 %v6413_v2, %v2737_v56 }
 0x4d3   : > { %v2862_v61 = vpack.c.bf16 %v2740_v41, %v2739_v48  ;;  %v2748_v21 = vmul.f32 %v6413_v2, %v2740_v41 }
 0x4d4   : > { %v2861_v14 = vpack.c.bf16 %v2738_v28, %v2737_v56  ;;  %v2746_v52 = vmul.f32 %v6413_v2, %v2738_v28 }
 0x4d6   : > { %4853 = vmatprep.mubr.bf16.mxu1 %v2861_v14 }
 0x4d7   : > { %4854 = vmatmul.mubr.bf16.gmra.mrb[72].mxu1 %v2862_v61 }
 0x4d9   : > { %v4811_v42 = vpop.f32.mrb[76].mxu0 }
 0x4da   : > { %v2755_v23 = vadd.f32 %v4811_v42, %v2747_v29  ;;  %v2583_v37 = vpop.f32.mrb[77].mxu0 }
 0x4db   : > { %v2753_v39 = vadd.f32 %v2745_v1, %v2583_v37  ;;  %v4812_v3 = vpop.f32.mrb[78].mxu0 }
 0x4dc   : > { %v2756_v10 = vadd.f32 %v4812_v3, %v2748_v21  ;;  %v2586_v38 = vpop.f32.mrb[79].mxu0  ;;  %v2763_v45 = vmul.f32 %v6413_v2, %v2755_v23 }
 0x4dd   : > { %v2754_v43 = vadd.f32 %v2746_v52, %v2586_v38  ;;  %v2761_v33 = vmul.f32 %v6413_v2, %v2753_v39 }
 0x4de   : > { %v2864_v53 = vpack.c.bf16 %v2756_v10, %v2755_v23  ;;  %v2764_v16 = vmul.f32 %v6413_v2, %v2756_v10 }
 0x4df   : > { %v2863_v12 = vpack.c.bf16 %v2754_v43, %v2753_v39  ;;  %v2762_v40 = vmul.f32 %v6413_v2, %v2754_v43 }
 0x4e1   : > { %v4815_v22 = vpop.f32.mrb[80].mxu0  ;;  %4857 = vmatprep.mubr.bf16.mxu1 %v2863_v12 }
 0x4e2   : > { %v2771_v57 = vadd.f32 %v4815_v22, %v2763_v45  ;;  %v2599_v31 = vpop.f32.mrb[81].mxu0  ;;  %4858 = vmatmul.mubr.bf16.gmra.mrb[76].mxu1 %v2864_v53 }
 0x4e3   : > { %v2769_v48 = vadd.f32 %v2761_v33, %v2599_v31  ;;  %v4816_v7 = vpop.f32.mrb[82].mxu0 }
 0x4e4   : > { %v2772_v56 = vadd.f32 %v4816_v7, %v2764_v16  ;;  %v2602_v4 = vpop.f32.mrb[83].mxu0  ;;  %v2779_v28 = vmul.f32 %v6413_v2, %v2771_v57 }
 0x4e5   : > { %v2770_v24 = vadd.f32 %v2762_v40, %v2602_v4  ;;  %v2777_v14 = vmul.f32 %v6413_v2, %v2769_v48 }
 0x4e6   : > { %v2866_v41 = vpack.c.bf16 %v2772_v56, %v2771_v57  ;;  %v2780_v1 = vmul.f32 %v6413_v2, %v2772_v56 }
 0x4e7   : > { %v2865_v35 = vpack.c.bf16 %v2770_v24, %v2769_v48  ;;  %v2778_v21 = vmul.f32 %v6413_v2, %v2770_v24 }
 0x4e9   : > { %v4819_v61 = vpop.f32.mrb[84].mxu0  ;;  %4861 = vmatprep.mubr.bf16.mxu1 %v2865_v35 }
 0x4ea   : > { %v2787_v29 = vadd.f32 %v4819_v61, %v2779_v28  ;;  %v2615_v42 = vpop.f32.mrb[85].mxu0  ;;  %4862 = vmatmul.mubr.bf16.gmra.mrb[80].mxu1 %v2866_v41 }
 0x4eb   : > { %v2785_v23 = vadd.f32 %v2777_v14, %v2615_v42  ;;  %v4820_v37 = vpop.f32.mrb[86].mxu0 }
 0x4ec   : > { %v2788_v39 = vadd.f32 %v4820_v37, %v2780_v1  ;;  %v2618_v3 = vpop.f32.mrb[87].mxu0  ;;  %v2795_v43 = vmul.f32 %v6413_v2, %v2787_v29 }
 0x4ed   : > { %v2786_v52 = vadd.f32 %v2778_v21, %v2618_v3  ;;  %v2793_v12 = vmul.f32 %v6413_v2, %v2785_v23 }
 0x4ee   : > { %v2868_v10 = vpack.c.bf16 %v2788_v39, %v2787_v29  ;;  %v2796_v33 = vmul.f32 %v6413_v2, %v2788_v39 }
 0x4ef   : > { %v2867_v38 = vpack.c.bf16 %v2786_v52, %v2785_v23  ;;  %v2794_v16 = vmul.f32 %v6413_v2, %v2786_v52  ;;  %v7157_v52 = vmov 0.0  }
 0x4f0   : > { %4877 = vmatprep.subr.bf16.mxu0 %v7157_v52  ;;  %4897 = vmatprep.subr.bf16.mxu1 %v7157_v52 }
 0x4f1   : > { %v4823_v53 = vpop.f32.mrb[88].mxu0  ;;  %4865 = vmatprep.mubr.bf16.mxu1 %v2867_v38  ;;  %v5061_v38 = vld [vmem:[%s7127_s9 + $0x48] sm:$0xff]   ;;  %4893 = vmatprep.mubr.msk.bf16.mxu0 %vm5292_vm2, %v7157_v52 }
 0x4f2   : > { %v2803_v45 = vadd.f32 %v4823_v53, %v2795_v43  ;;  %v2631_v22 = vpop.f32.mrb[89].mxu0  ;;  %4866 = vmatmul.mubr.bf16.gmra.mrb[84].mxu1 %v2868_v10  ;;  %v5059_v10 = vld [vmem:[%s7127_s9 + $0x40] sm:$0xff]   ;;  %v5062_v43 = vld [vmem:[%s7127_s9 + $0xc8] sm:$0xff]   ;;  %v5063_v53 = vld [vmem:[%s7127_s9 + $0x50] sm:$0xff]  }
 0x4f3   : > { %v2801_v57 = vadd.f32 %v2793_v12, %v2631_v22  ;;  %v4824_v31 = vpop.f32.mrb[90].mxu0  ;;  %4878 = vmatpush3.bf16.msra.mxu0 %v5059_v10  ;;  %v5064_v12 = vld [vmem:[%s7127_s9 + $0xd0] sm:$0xff]   ;;  %v5066_v22 = vld [vmem:[%s7127_s9 + $0xd8] sm:$0xff]  }
 0x4f4   : > { %v2804_v48 = vadd.f32 %v4824_v31, %v2796_v33  ;;  %v2634_v7 = vpop.f32.mrb[91].mxu0  ;;  %v2811_v24 = vmul.f32 %v6413_v2, %v2803_v45  ;;  %4879 = vmatprep.subr.bf16.mxu0 %v7157_v52  ;;  %v5068_v33 = vld [vmem:[%s7127_s9 + $0xe0] sm:$0xff]   ;;  %v5074_v10 = vld [vmem:[%s7127_s9 + $0xf8] sm:$0xff]  }
 0x4f5   : > { %v2802_v40 = vadd.f32 %v2794_v16, %v2634_v7  ;;  %v2809_v35 = vmul.f32 %v6413_v2, %v2801_v57  ;;  %v5067_v31 = vld [vmem:[%s7127_s9 + $0x60] sm:$0xff]   ;;  %v5070_v16 = vld [vmem:[%s7127_s9 + $0xe8] sm:$0xff]  }
 0x4f6   : > { %v2870_v56 = vpack.c.bf16 %v2804_v48, %v2803_v45  ;;  %v2812_v14 = vmul.f32 %v6413_v2, %v2804_v48  ;;  %v5065_v45 = vld [vmem:[%s7127_s9 + $0x58] sm:$0xff]   ;;  %v5069_v48 = vld [vmem:[%s7127_s9 + $0x68] sm:$0xff]  }
 0x4f7   : > { %v2869_v4 = vpack.c.bf16 %v2802_v40, %v2801_v57  ;;  %v2810_v1 = vmul.f32 %v6413_v2, %v2802_v40  ;;  %v5060_v2 = vld [vmem:[%s7127_s9 + $0xc0] sm:$0xff]   ;;  %4880 = vmatpush3.bf16.msra.mxu0 %v5061_v38 }
 0x4f8   : > { %4898 = vmatpush3.bf16.msra.mxu1 %v5060_v2  ;;  %4881 = vmatprep.subr.bf16.mxu0 %v7157_v52  ;;  %v6484_v57 = vld [vmem:[%s7126_s8 + $0x1] ss:$0 sm:$0xff] }
 0x4f9   : > { %v4827_v41 = vpop.f32.mrb[92].mxu0  ;;  %4869 = vmatprep.mubr.bf16.mxu1 %v2869_v4  ;;  %4899 = vmatprep.subr.bf16.mxu1 %v7157_v52  ;;  %v2930_v7 = vmul.f32 %v6484_v57, %v6087_v25 }
 0x4fa   : > { %v2819_v28 = vadd.f32 %v4827_v41, %v2811_v24  ;;  %v2647_v61 = vpop.f32.mrb[93].mxu0  ;;  %4870 = vmatmul.mubr.bf16.gmra.mrb[88].mxu1 %v2870_v56  ;;  %v2928_v56 = vmul.f32 %v6484_v57, %v6136_v46  ;;  %v2931_v41 = vmul.f32 %v6484_v57, %v6108_v62 }
 0x4fb   : > { %v2817_v29 = vadd.f32 %v2809_v35, %v2647_v61  ;;  %v4828_v42 = vpop.f32.mrb[94].mxu0  ;;  %4882 = vmatpush3.bf16.msra.mxu0 %v5063_v53  ;;  %v5072_v35 = vld [vmem:[%s7127_s9 + $0xf0] sm:$0xff]  }
 0x4fc   : > { %v2820_v23 = vadd.f32 %v4828_v42, %v2812_v14  ;;  %v2650_v37 = vpop.f32.mrb[95].mxu0  ;;  %4900 = vmatpush3.bf16.msra.mxu1 %v5062_v43  ;;  %4883 = vmatprep.subr.bf16.mxu0 %v7157_v52  ;;  %v2929_v14 = vmul.f32 %v6484_v57, %v6139_v30  ;;  %v5073_v43 = vld [vmem:[%s7127_s9 + $0x78] sm:$0xff]  }
 0x4fd   : > { %v2818_v21 = vadd.f32 %v2810_v1, %v2650_v37  ;;  %4901 = vmatprep.subr.bf16.mxu1 %v7157_v52 }
 0x4fe   : > { %v2872_v39 = vpack.c.bf16 %v2820_v23, %v2819_v28 }
 0x4ff   : > { %v2871_v3 = vpack.c.bf16 %v2818_v21, %v2817_v29  ;;  %4884 = vmatpush3.bf16.msra.mxu0 %v5065_v45  ;;  %v5071_v29 = vld [vmem:[%s7127_s9 + $0x70] sm:$0xff]  }
 0x500   : > { %4902 = vmatpush3.bf16.msra.mxu1 %v5064_v12  ;;  %4885 = vmatprep.subr.bf16.mxu0 %v7157_v52 }
 0x501   : > { %4873 = vmatprep.mubr.bf16.mxu1 %v2871_v3  ;;  %4903 = vmatprep.subr.bf16.mxu1 %v7157_v52 }
 0x502   : > { %4874 = vmatmul.mubr.bf16.gmra.mrb[92].mxu1 %v2872_v39 }
 0x503   : > { %4913 = vmatprep.mubr.msk.bf16.mxu1 %vm5292_vm2, %v7157_v52  ;;  %4886 = vmatpush3.bf16.msra.mxu0 %v5067_v31 }
 0x504   : > { %4904 = vmatpush3.bf16.msra.mxu1 %v5066_v22  ;;  %4887 = vmatprep.subr.bf16.mxu0 %v7157_v52 }
 0x505   : > { %4905 = vmatprep.subr.bf16.mxu1 %v7157_v52 }
 0x507   : > { %4888 = vmatpush3.bf16.msra.mxu0 %v5069_v48 }
 0x508   : > { %4906 = vmatpush3.bf16.msra.mxu1 %v5068_v33  ;;  %4889 = vmatprep.subr.bf16.mxu0 %v7157_v52 }
 0x509   : > { %4907 = vmatprep.subr.bf16.mxu1 %v7157_v52 }
 0x50b   : > { %4890 = vmatpush3.bf16.msra.mxu0 %v5071_v29  ;;  %v2933_v29 = vmul.f32 %v6484_v57, %v6208_v55 }
 0x50c   : > { %4908 = vmatpush3.bf16.msra.mxu1 %v5070_v16  ;;  %4891 = vmatprep.subr.bf16.mxu0 %v7157_v52 }
 0x50d   : > { %4909 = vmatprep.subr.bf16.mxu1 %v7157_v52 }
 0x50f   : > { %4892 = vmatpush3.bf16.msra.mxu0 %v5073_v43  ;;  %v6575_v43 = vmul.f32 %v6484_v57, %v6314_v13 }
 0x510   : > { %4910 = vmatpush3.bf16.msra.mxu1 %v5072_v35  ;;  %4917 = vmatprep.subr.bf16.mxu0 %v7157_v52  ;;  %v2932_v35 = vmul.f32 %v6484_v57, %v6204_v8 }
 0x511   : > { %4911 = vmatprep.subr.bf16.mxu1 %v7157_v52 }
 0x514   : > { %4912 = vmatpush3.bf16.msra.mxu1 %v5074_v10 }
 0x515   : > { %4937 = vmatprep.subr.bf16.mxu1 %v7157_v52  ;;  %v6636_v52 = vmul.f32 %v6484_v57, %v6342_v26 }
 0x517   : > { %7252 = vst [vmem:[#allocation20_spill] sm:$0xff] %v6636_v52 }
 0x594   : > { %v4847_v40 = vpop.f32.mrb[64].mxu1 }
 0x595   : > { %v6505_v4 = vadd.f32 %v4847_v40, %v2930_v7  ;;  %v3042_v24 = vpop.f32.mrb[65].mxu1 }
 0x596   : > { %v6512_v28 = vadd.f32 %v3042_v24, %v2928_v56  ;;  %v4848_v61 = vpop.f32.mrb[66].mxu1  ;;  %v2934_v56 = vmul.f32 %v6484_v57, %v6215_v63 }
 0x597   : > { %v3171_v42 = vmul.f32 %v6505_v4, %v6505_v4  ;;  %v6522_v1 = vadd.f32 %v4848_v61, %v2931_v41  ;;  %v3045_v23 = vpop.f32.mrb[67].mxu1  ;;  %v2935_v61 = vmul.f32 %v6484_v57, %v6219_v11 }
 0x598   : > { %v3169_v37 = vmul.f32 %v6512_v28, %v6512_v28  ;;  %v6527_v21 = vadd.f32 %v3045_v23, %v2929_v14 }
 0x599   : > { %v3203_v39 = vmul.f32 %v3171_v42, %v6505_v4  ;;  %v3172_v3 = vmul.f32 %v6522_v1, %v6522_v1  ;;  %v2938_v42 = vmul.f32 %v6484_v57, %v6267_v20 }
 0x59a   : > { %v3201_v2 = vmul.f32 %v3169_v37, %v6512_v28  ;;  %v3170_v38 = vmul.f32 %v6527_v21, %v6527_v21 }
 0x59b   : > { %v3235_v53 = vmul.f32 0.044715, %v3203_v39  ;;  %v3204_v12 = vmul.f32 %v3172_v3, %v6522_v1  ;;  %v2936_v39 = vmul.f32 %v6484_v57, %v6255_v58  ;;  %v6565_v3 = vmul.f32 %v6484_v57, %v6258_v34 }
 0x59c   : > { %v3233_v45 = vmul.f32 0.044715, %v3201_v2  ;;  %v3202_v22 = vmul.f32 %v3170_v38, %v6527_v21  ;;  %v6571_v38 = vmul.f32 %v6484_v57, %v6250_v50 }
 0x59d   : > { %v3267_v33 = vadd.f32 %v3235_v53, %v6505_v4  ;;  %v3236_v31 = vmul.f32 0.044715, %v3204_v12 }
 0x59e   : > { %v3265_v16 = vadd.f32 %v3233_v45, %v6512_v28  ;;  %v3234_v48 = vmul.f32 0.044715, %v3202_v22  ;;  %v6581_v45 = vmul.f32 %v6484_v57, %v6304_v51  ;;  %v6585_v22 = vmul.f32 %v6484_v57, %v6320_v5 }
 0x59f   : > { %v3299_v7 = vmul.f32 0.7978846, %v3267_v33  ;;  %v3268_v40 = vadd.f32 %v3236_v31, %v6522_v1 }
 0x5a0   : > { %v3297_v24 = vmul.f32 0.7978846, %v3265_v16  ;;  %v3266_v41 = vadd.f32 %v3234_v48, %v6527_v21  ;;  %v6593_v48 = vmul.f32 %v6484_v57, %v6310_v17 }
 0x5a1   : > { %5163 = vtanh.f32 %v3299_v7  ;;  %v3300_v14 = vmul.f32 0.7978846, %v3268_v40  ;;  %v6597_v7 = vmul.f32 %v6484_v57, %v6351_v15 }
 0x5a2   : > { %5165 = vtanh.f32 %v3297_v24  ;;  %v3298_v23 = vmul.f32 0.7978846, %v3266_v41  ;;  %v4851_v37 = vpop.f32.mrb[68].mxu1  ;;  %v6605_v24 = vmul.f32 %v6484_v57, %v6326_v59  ;;  %v6609_v41 = vmul.f32 %v6484_v57, %v6345_v36 }
 0x5a3   : > { %5167 = vtanh.f32 %v3300_v14  ;;  %v6567_v10 = vadd.f32 %v4851_v37, %v2934_v56  ;;  %v3058_v2 = vpop.f32.mrb[69].mxu1  ;;  %v6616_v14 = vmul.f32 %v6484_v57, %v6329_v54  ;;  %v6645_v36 = vmul.f32 %v6484_v57, %v6368_v44 }
 0x5a4   : > { %5169 = vtanh.f32 %v3298_v23  ;;  %v6577_v53 = vadd.f32 %v3058_v2, %v2932_v35  ;;  %v4852_v12 = vpop.f32.mrb[70].mxu1  ;;  %v6627_v2 = vmul.f32 %v6484_v57, %v6348_v19 }
 0x5a5   : > { %v3175_v33 = vmul.f32 %v6567_v10, %v6567_v10  ;;  %v6589_v31 = vadd.f32 %v4852_v12, %v2935_v61  ;;  %v3061_v16 = vpop.f32.mrb[71].mxu1  ;;  %v6631_v12 = vmul.f32 %v6484_v57, %v6362_v6  ;;  %7254 = vst [vmem:[#allocation19_spill] sm:$0xff] %v6645_v36 }
 0x5a6   : > { %v3173_v40 = vmul.f32 %v6577_v53, %v6577_v53  ;;  %v6601_v56 = vadd.f32 %v3061_v16, %v2933_v29  ;;  %v6620_v29 = vmul.f32 %v6484_v57, %v6371_v9 }
 0x5a7   : > { %v3207_v35 = vmul.f32 %v3175_v33, %v6567_v10  ;;  %v3176_v61 = vmul.f32 %v6589_v31, %v6589_v31  ;;  %7251 = vst [vmem:[#allocation15_spill] sm:$0xff] %v6631_v12 }
 0x5a8   : > { %v3205_v23 = vmul.f32 %v3173_v40, %v6577_v53  ;;  %v3174_v37 = vmul.f32 %v6601_v56, %v6601_v56  ;;  %v6640_v40 = vmul.f32 %v6484_v57, %v6384_v60 }
 0x5a9   : > { %v3239_v33 = vmul.f32 0.044715, %v3207_v35  ;;  %v3208_v16 = vmul.f32 %v3176_v61, %v6589_v31  ;;  %v6649_v35 = vmul.f32 %v6484_v57, %v6380_v47 }
 0x5aa   : > { %7253 = vst [vmem:[#allocation18_spill] sm:$0xff] %v6640_v40  ;;  %v3237_v9 = vmul.f32 0.044715, %v3205_v23  ;;  %v3206_v54 = vmul.f32 %v3174_v37, %v6601_v56  ;;  %v4855_v19 = vpop.f32.mrb[72].mxu1  ;;  %v6656_v23 = vmul.f32 %v6484_v57, %v6365_v27 }
 0x5ab   : > { %7255 = vst [vmem:[#allocation25_spill] sm:$0xff] %v6649_v35  ;;  %v5164_v61 = vpop.eup %5163  ;;  %v3271_v26 = vadd.f32 %v3239_v33, %v6567_v10  ;;  %v3240_v6 = vmul.f32 0.044715, %v3208_v16  ;;  %v6652_v59 = vadd.f32 %v4855_v19, %v2938_v42  ;;  %v3074_v60 = vpop.f32.mrb[73].mxu1 }
 0x5ac   : > { %7256 = vst [vmem:[#allocation24_spill] sm:$0xff] %v6656_v23  ;;  %v5166_v37 = vpop.eup %5165  ;;  %v3363_v15 = vadd.f32 1.0, %v5164_v61  ;;  %v3269_v44 = vadd.f32 %v3237_v9, %v6577_v53  ;;  %v3238_v17 = vmul.f32 0.044715, %v3206_v54  ;;  %v6659_v5 = vadd.f32 %v3074_v60, %v2936_v39  ;;  %v4856_v47 = vpop.f32.mrb[74].mxu1 }
 0x5ad   : > { %v5168_v35 = vpop.eup %5167  ;;  %v3361_v36 = vadd.f32 1.0, %v5166_v37  ;;  %v3303_v40 = vmul.f32 0.7978846, %v3271_v26  ;;  %v3272_v33 = vadd.f32 %v3240_v6, %v6589_v31  ;;  %v3179_v19 = vmul.f32 %v6652_v59, %v6652_v59  ;;  %v3077_v42 = vpop.f32.mrb[75].mxu1 }
 0x5ae   : > { %v5170_v16 = vpop.eup %5169  ;;  %v3395_v27 = vmul.f32 0.5, %v3363_v15  ;;  %v3364_v23 = vadd.f32 1.0, %v5168_v35  ;;  %v3301_v52 = vmul.f32 0.7978846, %v3269_v44  ;;  %v3270_v61 = vadd.f32 %v3238_v17, %v6601_v56 }
 0x5af   : > { %v3393_v9 = vmul.f32 0.5, %v3361_v36  ;;  %v3362_v54 = vadd.f32 1.0, %v5170_v16  ;;  %5171 = vtanh.f32 %v3303_v40  ;;  %v3304_v60 = vmul.f32 0.7978846, %v3272_v33 }
 0x5b0   : > { %v3427_v39 = vmul.f32 %v3395_v27, %v6505_v4  ;;  %v3396_v37 = vmul.f32 0.5, %v3364_v23  ;;  %5173 = vtanh.f32 %v3301_v52  ;;  %v3302_v26 = vmul.f32 0.7978846, %v3270_v61 }
 0x5b1   : > { %v3425_v6 = vmul.f32 %v3393_v9, %v6512_v28  ;;  %v3394_v12 = vmul.f32 0.5, %v3362_v54  ;;  %5175 = vtanh.f32 %v3304_v60  ;;  %v3211_v51 = vmul.f32 %v3179_v19, %v6652_v59 }
 0x5b2   : > { %v3428_v15 = vmul.f32 %v3396_v37, %v6522_v1  ;;  %5177 = vtanh.f32 %v3302_v26  ;;  %v3177_v17 = vmul.f32 %v6659_v5, %v6659_v5  ;;  %v6673_v36 = vmul.f32 %v6484_v57, %v6403_v18 }
 0x5b3   : > { %v3426_v27 = vmul.f32 %v3394_v12, %v6527_v21  ;;  %v3243_v44 = vmul.f32 0.044715, %v3211_v51  ;;  %v6677_v52 = vadd.f32 %v4856_v47, %v6565_v3  ;;  %v6681_v4 = vmul.f32 %v6484_v57, %v6391_v0 }
 0x5b4   : > { %v3209_v28 = vmul.f32 %v3177_v17, %v6659_v5  ;;  %v6685_v1 = vadd.f32 %v3077_v42, %v6571_v38  ;;  %v6689_v40 = vmul.f32 %v6484_v57, %v6400_v49  ;;  %v6693_v21 = vmul.f32 %v6484_v57, %v6394_v32 }
 0x5b5   : > { %v6696_v51 = vadd.f32 %v3427_v39, %v6087_v25  ;;  %v6699_v47 = vadd.f32 %v3425_v6, %v6136_v46  ;;  %v3275_v3 = vadd.f32 %v3243_v44, %v6652_v59  ;;  %v3180_v38 = vmul.f32 %v6677_v52, %v6677_v52  ;;  %v4859_v12 = vpop.f32.mrb[76].mxu1 }
 0x5b6   : > { %v6705_v35 = vadd.f32 %v3428_v15, %v6108_v62  ;;  %v3241_v23 = vmul.f32 0.044715, %v3209_v28  ;;  %v3178_v57 = vmul.f32 %v6685_v1, %v6685_v1  ;;  %v6710_v33 = vadd.f32 %v4859_v12, %v6575_v43  ;;  %v3090_v25 = vpop.f32.mrb[77].mxu1 }
 0x5b7   : > { %v6713_v46 = vadd.f32 %v3426_v27, %v6139_v30  ;;  %v3307_v19 = vmul.f32 0.7978846, %v3275_v3  ;;  %v3212_v42 = vmul.f32 %v3180_v38, %v6677_v52  ;;  %v6717_v16 = vadd.f32 %v3090_v25, %v6581_v45  ;;  %v4860_v61 = vpop.f32.mrb[78].mxu1 }
 0x5b8   : > { %v3273_v62 = vadd.f32 %v3241_v23, %v6659_v5  ;;  %v3210_v9 = vmul.f32 %v3178_v57, %v6685_v1  ;;  %v3183_v54 = vmul.f32 %v6710_v33, %v6710_v33  ;;  %v6724_v43 = vadd.f32 %v4860_v61, %v6585_v22  ;;  %v3093_v60 = vpop.f32.mrb[79].mxu1 }
 0x5b9   : > { %v5172_v30 = vpop.eup %5171  ;;  %5179 = vtanh.f32 %v3307_v19  ;;  %v3244_v39 = vmul.f32 0.044715, %v3212_v42  ;;  %v3181_v37 = vmul.f32 %v6717_v16, %v6717_v16  ;;  %v6729_v45 = vadd.f32 %v3093_v60, %v6593_v48 }
 0x5ba   : > { %v5174_v26 = vpop.eup %5173  ;;  %v3367_v6 = vadd.f32 1.0, %v5172_v30  ;;  %v3305_v15 = vmul.f32 0.7978846, %v3273_v62  ;;  %v3242_v17 = vmul.f32 0.044715, %v3210_v9  ;;  %v3215_v27 = vmul.f32 %v3183_v54, %v6710_v33 }
 0x5bb   : > { %v5176_v44 = vpop.eup %5175  ;;  %v3365_v28 = vadd.f32 1.0, %v5174_v26  ;;  %v3276_v22 = vadd.f32 %v3244_v39, %v6677_v52  ;;  %v3213_v3 = vmul.f32 %v3181_v37, %v6717_v16  ;;  %v3184_v38 = vmul.f32 %v6724_v43, %v6724_v43 }
 0x5bc   : > { %v5178_v12 = vpop.eup %5177  ;;  %v3399_v23 = vmul.f32 0.5, %v3367_v6  ;;  %v3368_v57 = vadd.f32 1.0, %v5176_v44  ;;  %5181 = vtanh.f32 %v3305_v15  ;;  %v3274_v48 = vadd.f32 %v3242_v17, %v6685_v1 }
 0x5bd   : > { %v3397_v25 = vmul.f32 0.5, %v3365_v28  ;;  %v3366_v19 = vadd.f32 1.0, %v5178_v12  ;;  %v3308_v42 = vmul.f32 0.7978846, %v3276_v22  ;;  %v3247_v61 = vmul.f32 0.044715, %v3215_v27 }
 0x5be   : > { %v3431_v62 = vmul.f32 %v3399_v23, %v6567_v10  ;;  %v3400_v9 = vmul.f32 0.5, %v3368_v57  ;;  %v3306_v54 = vmul.f32 0.7978846, %v3274_v48  ;;  %v3245_v60 = vmul.f32 0.044715, %v3213_v3  ;;  %v4863_v30 = vpop.f32.mrb[80].mxu1 }
 0x5bf   : > { %v3429_v39 = vmul.f32 %v3397_v25, %v6577_v53  ;;  %v3398_v37 = vmul.f32 0.5, %v3366_v19  ;;  %5183 = vtanh.f32 %v3308_v42  ;;  %v3279_v26 = vadd.f32 %v3247_v61, %v6710_v33  ;;  %v3106_v6 = vpop.f32.mrb[81].mxu1 }
 0x5c0   : > { %v3463_v15 = vadd.f32 %v3431_v62, %v6215_v63  ;;  %v3432_v17 = vmul.f32 %v3400_v9, %v6589_v31  ;;  %5185 = vtanh.f32 %v3306_v54  ;;  %v3277_v27 = vadd.f32 %v3245_v60, %v6717_v16  ;;  %v4864_v44 = vpop.f32.mrb[82].mxu1 }
 0x5c1   : > { %v3461_v10 = vadd.f32 %v3429_v39, %v6204_v8  ;;  %v3430_v28 = vmul.f32 %v3398_v37, %v6601_v56  ;;  %v3311_v22 = vmul.f32 0.7978846, %v3279_v26  ;;  %v3216_v53 = vmul.f32 %v3184_v38, %v6724_v43  ;;  %v3109_v3 = vpop.f32.mrb[83].mxu1 }
 0x5c2   : > { %v3536_v12 = vadd.f32 %v3463_v15, %v6696_v51  ;;  %v3464_v23 = vadd.f32 %v3432_v17, %v6219_v11  ;;  %v3309_v57 = vmul.f32 0.7978846, %v3277_v27  ;;  %v3182_v63 = vmul.f32 %v6729_v45, %v6729_v45 }
 0x5c3   : > { %v5180_v31 = vpop.eup %5179  ;;  %v3534_v48 = vadd.f32 %v3461_v10, %v6699_v47  ;;  %v3462_v25 = vadd.f32 %v3430_v28, %v6208_v55  ;;  %5187 = vtanh.f32 %v3311_v22  ;;  %v3248_v8 = vmul.f32 0.044715, %v3216_v53 }
 0x5c4   : > { %v6753_v56 = vadd.f32 %v3464_v23, %v6705_v35  ;;  %v3371_v38 = vadd.f32 1.0, %v5180_v31  ;;  %5189 = vtanh.f32 %v3309_v57  ;;  %v3214_v51 = vmul.f32 %v3182_v63, %v6729_v45 }
 0x5c5   : > { %v6757_v11 = vadd.f32 %v3462_v25, %v6713_v46  ;;  %v3280_v19 = vadd.f32 %v3248_v8, %v6724_v43  ;;  %v6761_v42 = vadd.f32 %v4863_v30, %v6597_v7  ;;  %v6764_v47 = vadd.f32 %v3106_v6, %v6605_v24  ;;  %v6766_v55 = vpop.f32.mrb[84].mxu1 }
 0x5c6   : > { %v5182_v61 = vpop.eup %5181  ;;  %v3403_v35 = vmul.f32 0.5, %v3371_v38  ;;  %v3246_v62 = vmul.f32 0.044715, %v3214_v51  ;;  %v6769_v9 = vadd.f32 %v4864_v44, %v6609_v41  ;;  %v6772_v54 = vadd.f32 %v3109_v3, %v6616_v14  ;;  %v6774_v46 = vpop.f32.mrb[85].mxu1 }
 0x5c7   : > { %v3369_v60 = vadd.f32 1.0, %v5182_v61  ;;  %v3312_v39 = vmul.f32 0.7978846, %v3280_v19  ;;  %v3187_v7 = vmul.f32 %v6761_v42, %v6761_v42  ;;  %v3185_v24 = vmul.f32 %v6764_v47, %v6764_v47  ;;  %v6780_v30 = vpop.f32.mrb[86].mxu1 }
 0x5c8   : > { %v3435_v37 = vmul.f32 %v3403_v35, %v6652_v59  ;;  %v3278_v41 = vadd.f32 %v3246_v62, %v6729_v45  ;;  %v3188_v14 = vmul.f32 %v6769_v9, %v6769_v9  ;;  %v3186_v26 = vmul.f32 %v6772_v54, %v6772_v54  ;;  %v3125_v6 = vpop.f32.mrb[87].mxu1 }
 0x5c9   : > { %v5184_v15 = vpop.eup %5183  ;;  %v3401_v17 = vmul.f32 0.5, %v3369_v60  ;;  %5191 = vtanh.f32 %v3312_v39  ;;  %v3219_v27 = vmul.f32 %v3187_v7, %v6761_v42  ;;  %v3217_v44 = vmul.f32 %v3185_v24, %v6764_v47 }
 0x5ca   : > { %v5186_v10 = vpop.eup %5185  ;;  %v3467_v28 = vadd.f32 %v3435_v37, %v6267_v20  ;;  %v3372_v59 = vadd.f32 1.0, %v5184_v15  ;;  %v3310_v22 = vmul.f32 0.7978846, %v3278_v41  ;;  %v3220_v53 = vmul.f32 %v3188_v14, %v6769_v9 }
 0x5cb   : > { %v3433_v3 = vmul.f32 %v3401_v17, %v6659_v5  ;;  %v3370_v23 = vadd.f32 1.0, %v5186_v10  ;;  %v3251_v57 = vmul.f32 0.044715, %v3219_v27  ;;  %v3249_v63 = vmul.f32 0.044715, %v3217_v44 }
 0x5cc   : > { %v3545_v31 = vadd.f32 %v3536_v12, %v3467_v28  ;;  %v3404_v25 = vmul.f32 0.5, %v3372_v59  ;;  %5193 = vtanh.f32 %v3310_v22  ;;  %v3252_v8 = vmul.f32 0.044715, %v3220_v53 }
 0x5cd   : > { %v5188_v38 = vpop.eup %5187  ;;  %v3465_v51 = vadd.f32 %v3433_v3, %v6255_v58  ;;  %v3402_v19 = vmul.f32 0.5, %v3370_v23  ;;  %v3283_v61 = vadd.f32 %v3251_v57, %v6761_v42  ;;  %v3281_v20 = vadd.f32 %v3249_v63, %v6764_v47  ;;  %v4871_v35 = vpop.f32.mrb[88].mxu1  ;;  %v7258_v63 = vld [vmem:[#allocation15_spill] sm:$0xff] }
 0x5ce   : > { %v5190_v62 = vpop.eup %5189  ;;  %v3436_v60 = vmul.f32 %v3404_v25, %v6677_v52  ;;  %v3375_v5 = vadd.f32 1.0, %v5188_v38  ;;  %v3284_v39 = vadd.f32 %v3252_v8, %v6769_v9  ;;  %v3218_v12 = vmul.f32 %v3186_v26, %v6772_v54  ;;  %v3138_v7 = vpop.f32.mrb[89].mxu1 }
 0x5cf   : > { %v3543_v24 = vadd.f32 %v3534_v48, %v3465_v51  ;;  %v3434_v37 = vmul.f32 %v3402_v19, %v6685_v1  ;;  %v3373_v41 = vadd.f32 1.0, %v5190_v62  ;;  %v3315_v58 = vmul.f32 0.7978846, %v3283_v61  ;;  %v6800_v14 = vpop.f32.mrb[90].mxu1 }
 0x5d0   : > { %v3468_v15 = vadd.f32 %v3436_v60, %v6258_v34  ;;  %v3407_v17 = vmul.f32 0.5, %v3375_v5  ;;  %v3313_v27 = vmul.f32 0.7978846, %v3281_v20  ;;  %v3316_v44 = vmul.f32 0.7978846, %v3284_v39  ;;  %v6803_v10 = vpop.f32.mrb[91].mxu1 }
 0x5d1   : > { %v3466_v52 = vadd.f32 %v3434_v37, %v6250_v50  ;;  %v3405_v28 = vmul.f32 0.5, %v3373_v41  ;;  %5195 = vtanh.f32 %v3315_v58  ;;  %v3250_v26 = vmul.f32 0.044715, %v3218_v12  ;;  %v7260_v37 = vld [vmem:[#allocation18_spill] sm:$0xff]  ;;  %v7261_v58 = vld [vmem:[#allocation19_spill] sm:$0xff] }
 0x5d2   : > { %v3546_v48 = vadd.f32 %v6753_v56, %v3468_v15  ;;  %v3439_v1 = vmul.f32 %v3407_v17, %v6710_v33  ;;  %5197 = vtanh.f32 %v3313_v27  ;;  %v6810_v59 = vadd.f32 %v6766_v55, %v6620_v29  ;;  %v7257_v29 = vld [vmem:[#allocation9_spill] sm:$0xff]  ;;  %v7262_v17 = vld [vmem:[#allocation10_spill] sm:$0xff] }
 0x5d3   : > { %v5192_v34 = vpop.eup %5191  ;;  %v3544_v22 = vadd.f32 %v6757_v11, %v3466_v52  ;;  %v3437_v53 = vmul.f32 %v3405_v28, %v6717_v16  ;;  %5199 = vtanh.f32 %v3316_v44  ;;  %v3282_v50 = vadd.f32 %v3250_v26, %v6772_v54  ;;  %v7259_v16 = vld [vmem:[#allocation20_spill] sm:$0xff] }
 0x5d4   : > { %v3471_v3 = vadd.f32 %v3439_v1, %v6314_v13  ;;  %v3376_v23 = vadd.f32 1.0, %v5192_v34  ;;  %v3191_v56 = vmul.f32 %v6810_v59, %v6810_v59  ;;  %v6820_v33 = vadd.f32 %v6774_v46, %v6627_v2 }
 0x5d5   : > { %v3469_v55 = vadd.f32 %v3437_v53, %v7257_v29  ;;  %v3314_v57 = vmul.f32 0.7978846, %v3282_v50  ;;  %v6825_v11 = vadd.f32 %v6780_v30, %v7258_v63  ;;  %v6828_v25 = vadd.f32 %v3125_v6, %v7259_v16  ;;  %v6830_v8 = vpop.f32.mrb[92].mxu1  ;;  %v7263_v29 = vld [vmem:[#allocation8_spill] sm:$0xff] }
 0x5d6   : > { %v5194_v13 = vpop.eup %5193  ;;  %v6832_v38 = vadd.f32 %v3545_v31, %v3471_v3  ;;  %v3408_v51 = vmul.f32 0.5, %v3376_v23  ;;  %v3223_v19 = vmul.f32 %v3191_v56, %v6810_v59  ;;  %v3189_v2 = vmul.f32 %v6820_v33, %v6820_v33  ;;  %v6837_v46 = vpop.f32.mrb[93].mxu1 }
 0x5d7   : > { %v3552_v61 = vadd.f32 %v3543_v24, %v3469_v55  ;;  %v3374_v20 = vadd.f32 1.0, %v5194_v13  ;;  %5201 = vtanh.f32 %v3314_v57  ;;  %v3192_v30 = vmul.f32 %v6825_v11, %v6825_v11  ;;  %v6841_v6 = vpop.f32.mrb[94].mxu1 }
 0x5d8   : > { %v3440_v62 = vmul.f32 %v3408_v51, %v6724_v43  ;;  %v3255_v31 = vmul.f32 0.044715, %v3223_v19  ;;  %v3221_v60 = vmul.f32 %v3189_v2, %v6820_v33  ;;  %v3190_v5 = vmul.f32 %v6828_v25, %v6828_v25  ;;  %v6847_v39 = vpop.f32.mrb[95].mxu1 }
 0x5d9   : > { %v3406_v12 = vmul.f32 0.5, %v3374_v20  ;;  %v3224_v24 = vmul.f32 %v3192_v30, %v6825_v11  ;;  %v6851_v41 = vadd.f32 %v4871_v35, %v7260_v37  ;;  %v6854_v15 = vadd.f32 %v3138_v7, %v7261_v58  ;;  %v7264_v37 = vld [vmem:[#allocation12_spill] sm:$0xff] }
 0x5da   : > { %v3472_v27 = vadd.f32 %v3440_v62, %v7262_v17  ;;  %v3287_v43 = vadd.f32 %v3255_v31, %v6810_v59  ;;  %v3253_v44 = vmul.f32 0.044715, %v3221_v60  ;;  %v3222_v52 = vmul.f32 %v3190_v5, %v6828_v25 }
 0x5db   : > { %v5196_v28 = vpop.eup %5195  ;;  %v3438_v26 = vmul.f32 %v3406_v12, %v6729_v45  ;;  %v3256_v1 = vmul.f32 0.044715, %v3224_v24  ;;  %v3195_v34 = vmul.f32 %v6851_v41, %v6851_v41  ;;  %v3193_v35 = vmul.f32 %v6854_v15, %v6854_v15 }
 0x5dc   : > { %v5198_v53 = vpop.eup %5197  ;;  %v3555_v7 = vadd.f32 %v3546_v48, %v3472_v27  ;;  %v3379_v50 = vadd.f32 1.0, %v5196_v28  ;;  %v3319_v3 = vmul.f32 0.7978846, %v3287_v43  ;;  %v3285_v23 = vadd.f32 %v3253_v44, %v6820_v33  ;;  %v7265_v43 = vld [vmem:[#allocation35_spill] sm:$0xff] }
 0x5dd   : > { %v5200_v56 = vpop.eup %5199  ;;  %v3470_v55 = vadd.f32 %v3438_v26, %v7263_v29  ;;  %v3377_v57 = vadd.f32 1.0, %v5198_v53  ;;  %v3288_v63 = vadd.f32 %v3256_v1, %v6825_v11  ;;  %v3254_v45 = vmul.f32 0.044715, %v3222_v52  ;;  %v7266_v52 = vld [vmem:[#allocation25_spill] sm:$0xff] }
 0x5de   : > { %v3411_v16 = vmul.f32 0.5, %v3379_v50  ;;  %v3380_v13 = vadd.f32 1.0, %v5200_v56  ;;  %5203 = vtanh.f32 %v3319_v3  ;;  %v3317_v51 = vmul.f32 0.7978846, %v3285_v23  ;;  %v7267_v26 = vld [vmem:[#allocation33_spill] sm:$0xff]  ;;  %v7268_v3 = vld [vmem:[#allocation24_spill] sm:$0xff] }
 0x5df   : > { %v3553_v19 = vadd.f32 %v3544_v22, %v3470_v55  ;;  %v3409_v2 = vmul.f32 0.5, %v3377_v57  ;;  %v3320_v20 = vmul.f32 0.7978846, %v3288_v63  ;;  %v3286_v48 = vadd.f32 %v3254_v45, %v6828_v25  ;;  %v7269_v45 = vld [vmem:[#allocation31_spill] sm:$0xff] }
 0x5e0   : > { %v3443_v30 = vmul.f32 %v3411_v16, %v6761_v42  ;;  %v3412_v62 = vmul.f32 0.5, %v3380_v13  ;;  %5205 = vtanh.f32 %v3317_v51  ;;  %v3227_v31 = vmul.f32 %v3195_v34, %v6851_v41 }
 0x5e1   : > { %v5202_v60 = vpop.eup %5201  ;;  %v3441_v5 = vmul.f32 %v3409_v2, %v6764_v47  ;;  %5207 = vtanh.f32 %v3320_v20  ;;  %v3318_v12 = vmul.f32 0.7978846, %v3286_v48  ;;  %v3225_v24 = vmul.f32 %v3193_v35, %v6854_v15 }
 0x5e2   : > { %v3475_v58 = vadd.f32 %v3443_v30, %v7264_v37  ;;  %v3444_v22 = vmul.f32 %v3412_v62, %v6769_v9  ;;  %v3378_v17 = vadd.f32 1.0, %v5202_v60  ;;  %v3259_v27 = vmul.f32 0.044715, %v3227_v31 }
 0x5e3   : > { %v3473_v44 = vadd.f32 %v3441_v5, %v7265_v43  ;;  %5209 = vtanh.f32 %v3318_v12  ;;  %v3257_v42 = vmul.f32 0.044715, %v3225_v24  ;;  %v6877_v28 = vadd.f32 %v6800_v14, %v7266_v52 }
 0x5e4   : > { %v6880_v47 = vadd.f32 %v6832_v38, %v3475_v58  ;;  %v3476_v1 = vadd.f32 %v3444_v22, %v7267_v26  ;;  %v3410_v34 = vmul.f32 0.5, %v3378_v17  ;;  %v3291_v35 = vadd.f32 %v3259_v27, %v6851_v41 }
 0x5e5   : > { %v6884_v53 = vadd.f32 %v3552_v61, %v3473_v44  ;;  %v3289_v9 = vadd.f32 %v3257_v42, %v6854_v15  ;;  %v3196_v50 = vmul.f32 %v6877_v28, %v6877_v28  ;;  %v6891_v23 = vadd.f32 %v6803_v10, %v7268_v3  ;;  %v7270_v42 = vld [vmem:[#allocation16_spill] sm:$0xff] }
 0x5e6   : > { %v3564_v14 = vadd.f32 %v3555_v7, %v3476_v1  ;;  %v3442_v38 = vmul.f32 %v3410_v34, %v6772_v54  ;;  %v3323_v56 = vmul.f32 0.7978846, %v3291_v35  ;;  %v6896_v29 = vadd.f32 %v6830_v8, %v6673_v36 }
 0x5e7   : > { %v3321_v55 = vmul.f32 0.7978846, %v3289_v9  ;;  %v3228_v61 = vmul.f32 %v3196_v50, %v6877_v28  ;;  %v3194_v57 = vmul.f32 %v6891_v23, %v6891_v23  ;;  %v6903_v63 = vadd.f32 %v6837_v46, %v6681_v4  ;;  %v7271_v50 = vld [vmem:[#allocation34_spill] sm:$0xff] }
 0x5e8   : > { %v5204_v10 = vpop.eup %5203  ;;  %v3474_v7 = vadd.f32 %v3442_v38, %v7269_v45  ;;  %5211 = vtanh.f32 %v3323_v56  ;;  %v3199_v54 = vmul.f32 %v6896_v29, %v6896_v29  ;;  %v6910_v36 = vadd.f32 %v6841_v6, %v6689_v40 }
 0x5e9   : > { %v3383_v8 = vadd.f32 1.0, %v5204_v10  ;;  %5213 = vtanh.f32 %v3321_v55  ;;  %v3260_v16 = vmul.f32 0.044715, %v3228_v61  ;;  %v3226_v13 = vmul.f32 %v3194_v57, %v6891_v23  ;;  %v7272_v61 = vld [vmem:[#allocation13_spill] sm:$0xff] }
 0x5ea   : > { %v5206_v51 = vpop.eup %5205  ;;  %v3562_v2 = vadd.f32 %v3553_v19, %v3474_v7  ;;  %v3231_v4 = vmul.f32 %v3199_v54, %v6896_v29  ;;  %v3197_v46 = vmul.f32 %v6903_v63, %v6903_v63  ;;  %v3200_v20 = vmul.f32 %v6910_v36, %v6910_v36 }
 0x5eb   : > { %v5208_v48 = vpop.eup %5207  ;;  %v3415_v30 = vmul.f32 0.5, %v3383_v8  ;;  %v3381_v62 = vadd.f32 1.0, %v5206_v51  ;;  %v3292_v40 = vadd.f32 %v3260_v16, %v6877_v28  ;;  %v3258_v6 = vmul.f32 0.044715, %v3226_v13  ;;  %v7273_v13 = vld [vmem:[#allocation32_spill] sm:$0xff] }
 0x5ec   : > { %v3384_v31 = vadd.f32 1.0, %v5208_v48  ;;  %v3263_v60 = vmul.f32 0.044715, %v3231_v4  ;;  %v3229_v5 = vmul.f32 %v3197_v46, %v6903_v63  ;;  %v3232_v19 = vmul.f32 %v3200_v20, %v6910_v36 }
 0x5ed   : > { %v5210_v12 = vpop.eup %5209  ;;  %v3447_v24 = vmul.f32 %v3415_v30, %v6810_v59  ;;  %v3413_v37 = vmul.f32 0.5, %v3381_v62  ;;  %v3324_v58 = vmul.f32 0.7978846, %v3292_v40  ;;  %v3290_v22 = vadd.f32 %v3258_v6, %v6891_v23 }
 0x5ee   : > { %v3416_v17 = vmul.f32 0.5, %v3384_v31  ;;  %v3382_v27 = vadd.f32 1.0, %v5210_v12  ;;  %v3295_v43 = vadd.f32 %v3263_v60, %v6896_v29  ;;  %v3261_v44 = vmul.f32 0.044715, %v3229_v5  ;;  %v7275_v60 = vld [vmem:[#allocation11_spill] sm:$0xff] }
 0x5ef   : > { %v3479_v52 = vadd.f32 %v3447_v24, %v7270_v42  ;;  %v3445_v26 = vmul.f32 %v3413_v37, %v6820_v33  ;;  %5215 = vtanh.f32 %v3324_v58  ;;  %v3322_v1 = vmul.f32 0.7978846, %v3290_v22  ;;  %v7276_v42 = vld [vmem:[#allocation17_spill] sm:$0xff] }
 0x5f0   : > { %v3448_v34 = vmul.f32 %v3416_v17, %v6825_v11  ;;  %v3414_v35 = vmul.f32 0.5, %v3382_v27  ;;  %v3327_v9 = vmul.f32 0.7978846, %v3295_v43  ;;  %v3293_v59 = vadd.f32 %v3261_v44, %v6903_v63 }
 0x5f1   : > { %v3477_v3 = vadd.f32 %v3445_v26, %v7271_v50  ;;  %5217 = vtanh.f32 %v3322_v1  ;;  %v3264_v38 = vmul.f32 0.044715, %v3232_v19  ;;  %v6931_v56 = vadd.f32 %v6847_v39, %v6693_v21 }
 0x5f2   : > { %v5212_v55 = vpop.eup %5211  ;;  %v3480_v57 = vadd.f32 %v3448_v34, %v7272_v61  ;;  %v3446_v33 = vmul.f32 %v3414_v35, %v6828_v25  ;;  %5219 = vtanh.f32 %v3327_v9  ;;  %v3325_v10 = vmul.f32 0.7978846, %v3293_v59  ;;  %v7277_v59 = vld [vmem:[#allocation14_spill] sm:$0xff] }
 0x5f3   : > { %v5214_v11 = vpop.eup %5213  ;;  %v3387_v45 = vadd.f32 1.0, %v5212_v55  ;;  %v3296_v7 = vadd.f32 %v3264_v38, %v6910_v36  ;;  %v3198_v54 = vmul.f32 %v6931_v56, %v6931_v56  ;;  %v3572_v8 = vadd.f32 %v6880_v47, %v3479_v52 }
 0x5f4   : > { %v3573_v16 = vadd.f32 %v3564_v14, %v3480_v57  ;;  %v3478_v21 = vadd.f32 %v3446_v33, %v7273_v13  ;;  %v3385_v39 = vadd.f32 1.0, %v5214_v11  ;;  %5221 = vtanh.f32 %v3325_v10  ;;  %v7274_v14 = vld [vmem:[#allocation21_spill] sm:$0xff] }
 0x5f5   : > { %v3419_v51 = vmul.f32 0.5, %v3387_v45  ;;  %v3328_v4 = vmul.f32 0.7978846, %v3296_v7  ;;  %v3230_v25 = vmul.f32 %v3198_v54, %v6931_v56  ;;  %v3570_v46 = vadd.f32 %v6884_v53, %v3477_v3 }
 0x5f6   : > { %v3571_v20 = vadd.f32 %v3562_v2, %v3478_v21  ;;  %v3417_v48 = vmul.f32 0.5, %v3385_v39 }
 0x5f7   : > { %v3451_v30 = vmul.f32 %v3419_v51, %v6851_v41  ;;  %5223 = vtanh.f32 %v3328_v4  ;;  %v3262_v62 = vmul.f32 0.044715, %v3230_v25  ;;  %v5078_v51 = vld [vmem:[%s7127_s9 + $0x8] sm:$0xff]   ;;  %v5081_v4 = vld [vmem:[%s7127_s9 + $0x98] sm:$0xff]   ;;  %v5080_v25 = vld [vmem:[%s7127_s9 + $0x10] sm:$0xff]  }
 0x5f8   : > { %v3449_v40 = vmul.f32 %v3417_v48, %v6854_v15  ;;  %v5085_v48 = vld [vmem:[%s7127_s9 + $0xa8] sm:$0xff]  }
 0x5f9   : > { %v5216_v47 = vpop.eup %5215  ;;  %v3483_v6 = vadd.f32 %v3451_v30, %v7274_v14  ;;  %v3294_v31 = vadd.f32 %v3262_v62, %v6931_v56  ;;  %v5084_v30 = vld [vmem:[%s7127_s9 + $0x20] sm:$0xff]   ;;  %v5087_v62 = vld [vmem:[%s7127_s9 + $0xb0] sm:$0xff]  }
 0x5fa   : > { %v3481_v5 = vadd.f32 %v3449_v40, %v7275_v60  ;;  %v3388_v19 = vadd.f32 1.0, %v5216_v47  ;;  %v5086_v40 = vld [vmem:[%s7127_s9 + $0x28] sm:$0xff]   ;;  %v5089_v47 = vld [vmem:[%s7127_s9 + $0xb8] sm:$0xff]  }
 0x5fb   : > { %v5218_v12 = vpop.eup %5217  ;;  %v3326_v24 = vmul.f32 0.7978846, %v3294_v31  ;;  %v3581_v37 = vadd.f32 %v3572_v8, %v3483_v6  ;;  %v5088_v6 = vld [vmem:[%s7127_s9 + $0x30] sm:$0xff]   ;;  %v5090_v60 = vld [vmem:[%s7127_s9 + $0x38] sm:$0xff]  }
 0x5fc   : > { %v5220_v53 = vpop.eup %5219  ;;  %v3420_v2 = vmul.f32 0.5, %v3388_v19  ;;  %v3386_v58 = vadd.f32 1.0, %v5218_v12  ;;  %v3579_v22 = vadd.f32 %v3570_v46, %v3481_v5  ;;  %v5083_v46 = vld [vmem:[%s7127_s9 + $0xa0] sm:$0xff]  }
 0x5fd   : > { %v3391_v41 = vadd.f32 1.0, %v5220_v53  ;;  %5225 = vtanh.f32 %v3326_v24  ;;  %v5091_v12 = vld [vmem:[%s7129_s11] sm:$0xff]   ;;  %v5092_v24 = vld [vmem:[%s7129_s11 + $0x8] sm:$0xff]   ;;  %v5094_v53 = vld [vmem:[%s7129_s11 + $0x18] sm:$0xff]  }
 0x5fe   : > { %v5222_v17 = vpop.eup %5221  ;;  %v3452_v15 = vmul.f32 %v3420_v2, %v6877_v28  ;;  %v3418_v27 = vmul.f32 0.5, %v3386_v58  ;;  %v5095_v2 = vld [vmem:[%s7129_s11 + $0x20] sm:$0xff]   ;;  %v5096_v58 = vld [vmem:[%s7129_s11 + $0x28] sm:$0xff]  }
 0x5ff   : > { %v3423_v43 = vmul.f32 0.5, %v3391_v41  ;;  %v3389_v44 = vadd.f32 1.0, %v5222_v17  ;;  %v5098_v41 = vld [vmem:[%s7129_s11 + $0x38] sm:$0xff]  }
 0x600   : > { %v3484_v52 = vadd.f32 %v3452_v15, %v7276_v42  ;;  %v3450_v26 = vmul.f32 %v3418_v27, %v6891_v23 }
 0x601   : > { %v5224_v1 = vpop.eup %5223  ;;  %v3455_v34 = vmul.f32 %v3423_v43, %v6896_v29  ;;  %v3421_v35 = vmul.f32 0.5, %v3389_v44 }
 0x602   : > { %v3582_v9 = vadd.f32 %v3573_v16, %v3484_v52  ;;  %v3482_v50 = vadd.f32 %v3450_v26, %v7277_v59  ;;  %v3392_v3 = vadd.f32 1.0, %v5224_v1 }
 0x603   : > { %v3453_v38 = vmul.f32 %v3421_v35, %v6903_v63  ;;  %v3487_v55 = vadd.f32 %v3455_v34, %v6403_v18  ;;  %v5075_v18 = vld [vmem:[%s7127_s9 + $0x80] sm:$0xff]  }
 0x604   : > { %v3580_v28 = vadd.f32 %v3571_v20, %v3482_v50  ;;  %v3424_v61 = vmul.f32 0.5, %v3392_v3  ;;  %v5082_v20 = vld [vmem:[%s7127_s9 + $0x18] sm:$0xff]  }
 0x605   : > { %v3590_v57 = vadd.f32 %v3581_v37, %v3487_v55  ;;  %v3485_v33 = vadd.f32 %v3453_v38, %v6391_v0  ;;  %v5093_v37 = vld [vmem:[%s7129_s11 + $0x10] sm:$0xff]   ;;  %v4407_v55 = vld [vmem:[%s7128_s10] ss:$0 sm:$0xff] }
 0x606   : > { %v3456_v10 = vmul.f32 %v3424_v61, %v6910_v36  ;;  %v7278_v36 = vmov 0.0  }
 0x607   : > { %v5226_v23 = vpop.eup %5225  ;;  %v6956_v11 = vadd.f32 %v3579_v22, %v3485_v33  ;;  %v3594_v14 = vmul.f32 0.125, %v3590_v57  ;;  %v5097_v22 = vld [vmem:[%s7129_s11 + $0x30] sm:$0xff]  }
 0x608   : > { %v3488_v29 = vadd.f32 %v3456_v10, %v6400_v49  ;;  %v3390_v45 = vadd.f32 1.0, %v5226_v23  ;;  %v5077_v49 = vld [vmem:[%s7127_s9 + $0x88] sm:$0xff]  }
 0x609   : > { %v3719_v31 = vpack.c.bf16 %v3594_v14, %v3594_v14  ;;  %v3592_v5 = vmul.f32 0.125, %v6956_v11 }
 0x60a   : > { %v3591_v7 = vadd.f32 %v3582_v9, %v3488_v29  ;;  %v3422_v54 = vmul.f32 0.5, %v3390_v45  ;;  %v4408_v29 = vld [vmem:[%s7130_s12] ss:$0 sm:$0xff] }
 0x60b   : > { %v3596_v19 = vpack.c.bf16 %v3592_v5, %v3592_v5 }
 0x60c   : > { %v3454_v8 = vmul.f32 %v3422_v54, %v6931_v56  ;;  %v3595_v63 = vmul.f32 0.125, %v3591_v7  ;;  %v5076_v56 = vld [vmem:[%s7127_s9] sm:$0xff]  }
 0x60e   : > { %v3486_v16 = vadd.f32 %v3454_v8, %v6394_v32  ;;  %v3737_v0 = vpack.c.bf16 %v3595_v63, %v3595_v63  ;;  %v5079_v32 = vld [vmem:[%s7127_s9 + $0x90] sm:$0xff]  }
 0x610   : > { %v3589_v13 = vadd.f32 %v3580_v28, %v3486_v16  ;;  %4914 = vmatmul.mubr.bf16.vlgmr.msra.gmra.mrb[96].mxu1 %v3737_v0 }
 0x611   : > { %4938 = vmatpush3.bf16.msra.mxu1 %v5075_v18  ;;  %4953 = vmatprep.mubr.msk.bf16.mxu1 %vm5292_vm2, %v7278_v36 }
 0x612   : > { %v3593_v21 = vmul.f32 0.125, %v3589_v13  ;;  %4939 = vmatprep.subr.bf16.mxu1 %v7278_v36 }
 0x614   : > { %v3613_v39 = vpack.c.bf16 %v3593_v21, %v3593_v21 }
 0x615   : > { %4940 = vmatpush3.bf16.msra.mxu1 %v5077_v49 }
 0x616   : > { %4894 = vmatmul.mubr.bf16.vlgmr.msra.gmra.mrb[96].mxu0 %v3613_v39  ;;  %4941 = vmatprep.subr.bf16.mxu1 %v7278_v36 }
 0x617   : > { %4918 = vmatpush3.bf16.msra.mxu0 %v5076_v56  ;;  %4933 = vmatprep.mubr.msk.bf16.mxu0 %vm5292_vm2, %v7278_v36 }
 0x618   : > { %4919 = vmatprep.subr.bf16.mxu0 %v7278_v36 }
 0x619   : > { %4942 = vmatpush3.bf16.msra.mxu1 %v5079_v32 }
 0x61a   : > { %4943 = vmatprep.subr.bf16.mxu1 %v7278_v36 }
 0x61b   : > { %4920 = vmatpush3.bf16.msra.mxu0 %v5078_v51 }
 0x61c   : > { %4921 = vmatprep.subr.bf16.mxu0 %v7278_v36 }
 0x61d   : > { %4944 = vmatpush3.bf16.msra.mxu1 %v5081_v4 }
 0x61e   : > { %4945 = vmatprep.subr.bf16.mxu1 %v7278_v36 }
 0x61f   : > { %4922 = vmatpush3.bf16.msra.mxu0 %v5080_v25 }
 0x620   : > { %4923 = vmatprep.subr.bf16.mxu0 %v7278_v36 }
 0x621   : > { %4946 = vmatpush3.bf16.msra.mxu1 %v5083_v46 }
 0x622   : > { %4947 = vmatprep.subr.bf16.mxu1 %v7278_v36 }
 0x623   : > { %4924 = vmatpush3.bf16.msra.mxu0 %v5082_v20 }
 0x624   : > { %4925 = vmatprep.subr.bf16.mxu0 %v7278_v36 }
 0x625   : > { %4948 = vmatpush3.bf16.msra.mxu1 %v5085_v48 }
 0x626   : > { %4949 = vmatprep.subr.bf16.mxu1 %v7278_v36 }
 0x627   : > { %4926 = vmatpush3.bf16.msra.mxu0 %v5084_v30 }
 0x628   : > { %4927 = vmatprep.subr.bf16.mxu0 %v7278_v36 }
 0x629   : > { %4950 = vmatpush3.bf16.msra.mxu1 %v5087_v62 }
 0x62a   : > { %4951 = vmatprep.subr.bf16.mxu1 %v7278_v36 }
 0x62b   : > { %4928 = vmatpush3.bf16.msra.mxu0 %v5086_v40 }
 0x62c   : > { %4929 = vmatprep.subr.bf16.mxu0 %v7278_v36 }
 0x62d   : > { %4952 = vmatpush3.bf16.msra.mxu1 %v5089_v47 }
 0x62f   : > { %4930 = vmatpush3.bf16.msra.mxu0 %v5088_v6 }
 0x630   : > { %4931 = vmatprep.subr.bf16.mxu0 %v7278_v36  ;;  %4954 = vmatmul.mubr.bf16.vlgmr.msra.gmra.mrb[100].mxu1 %v3719_v31 }
 0x633   : > { %4932 = vmatpush3.bf16.msra.mxu0 %v5090_v60 }
 0x634   : > { %4957 = vmatprep.subr.bf16.mxu0 %v7278_v36 }
 0x636   : > { %4934 = vmatmul.mubr.bf16.vlgmr.msra.gmra.mrb[100].mxu0 %v3596_v19 }
 0x637   : > { %4973 = vmatprep.mubr.msk.bf16.mxu0 %vm5292_vm2, %v7278_v36  ;;  %4958 = vmatpush3.bf16.msra.mxu0 %v5091_v12 }
 0x638   : > { %4959 = vmatprep.subr.bf16.mxu0 %v7278_v36 }
 0x63b   : > { %4960 = vmatpush3.bf16.msra.mxu0 %v5092_v24 }
 0x63c   : > { %4961 = vmatprep.subr.bf16.mxu0 %v7278_v36 }
 0x63f   : > { %4962 = vmatpush3.bf16.msra.mxu0 %v5093_v37 }
 0x640   : > { %4963 = vmatprep.subr.bf16.mxu0 %v7278_v36 }
 0x643   : > { %4964 = vmatpush3.bf16.msra.mxu0 %v5094_v53 }
 0x644   : > { %4965 = vmatprep.subr.bf16.mxu0 %v7278_v36 }
 0x647   : > { %4966 = vmatpush3.bf16.msra.mxu0 %v5095_v2 }
 0x648   : > { %4967 = vmatprep.subr.bf16.mxu0 %v7278_v36 }
 0x64b   : > { %4968 = vmatpush3.bf16.msra.mxu0 %v5096_v58 }
 0x64c   : > { %4969 = vmatprep.subr.bf16.mxu0 %v7278_v36 }
 0x64f   : > { %4970 = vmatpush3.bf16.msra.mxu0 %v5097_v22 }
 0x650   : > { %4971 = vmatprep.subr.bf16.mxu0 %v7278_v36 }
 0x653   : > { %4972 = vmatpush3.bf16.msra.mxu0 %v5098_v41 }
 0x6e3   : > { %v3837_v17 = vpop.f32.mrb[96].mxu1 }
 0x6e4   : > { %v4915_v15 = vpop.f32.mrb[97].mxu1 }
 0x6e5   : > { %v3840_v27 = vpop.f32.mrb[98].mxu1 }
 0x6e6   : > { %v4916_v43 = vpop.f32.mrb[99].mxu1 }
 0x6e9   : > { %v3713_v44 = vpop.f32.mrb[96].mxu0 }
 0x6ea   : > { %v4895_v42 = vpop.f32.mrb[97].mxu0 }
 0x6eb   : > { %v3716_v52 = vpop.f32.mrb[98].mxu0 }
 0x6ec   : > { %v4896_v26 = vpop.f32.mrb[99].mxu0 }
 0x703   : > { %v4013_v1 = vpop.f32.mrb[100].mxu1 }
 0x704   : > { %v4014_v34 = vadd.f32 %v4013_v1, %v3837_v17  ;;  %v4955_v35 = vpop.f32.mrb[101].mxu1 }
 0x705   : > { %v4016_v9 = vpop.f32.mrb[102].mxu1 }
 0x706   : > { %v4956_v59 = vpop.f32.mrb[103].mxu1 }
 0x709   : > { %v3925_v50 = vpop.f32.mrb[100].mxu0 }
 0x70a   : > { %v3926_v3 = vadd.f32 %v3925_v50, %v3713_v44  ;;  %v4935_v38 = vpop.f32.mrb[101].mxu0 }
 0x70b   : > { %v3928_v28 = vpop.f32.mrb[102].mxu0 }
 0x70c   : > { %v4019_v61 = vadd.f32 %v4014_v34, %v3926_v3  ;;  %v4936_v57 = vpop.f32.mrb[103].mxu0 }
 0x70e   : > { %v4027_v33 = vadd.f32 %v4407_v55, %v4019_v61 }
 0x710   : > { %vm4028_vm3 = vcmp.ge.f32.partialorder %v4027_v33, 0.0  ;;  %v4029_v10 = vmul.f32 0.01, %v4027_v33 }
 0x712   : > { %v4030_v23 = vsel %vm4028_vm3, %v4027_v33, %v4029_v10 }
 0x713   : > { %v4031_v11 = vpack.c.bf16 %v4030_v23, %v4030_v23 }
 0x715   : > { %4974 = vmatmul.mubr.bf16.vlgmr.msra.gmra.mrb[104].mxu0 %v4031_v11 }
 0x7e8   : > { %v4137_v45 = vpop.f32.mrb[104].mxu0 }
 0x7e9   : > { %v4138_v7 = vadd.f32 %v4408_v29, %v4137_v45  ;;  %v4975_v54 = vpop.f32.mrb[105].mxu0 }
 0x7ea   : > { %v4140_v8 = vpop.f32.mrb[106].mxu0 }
 0x7eb   : > { %4143 = vst [vmem:[%s596_s0] sm:$0xff] %v4138_v7  ;;  %v4976_v63 = vpop.f32.mrb[107].mxu0 }
 0x7ec   : > { %5240 = shalt.err (!%p5237_p5)
}
 0x7ed   : > { %s5241_s21 = scalar_lea.hbm %s7074_s1, 128  ;;  %s5245_s30 = scalar_lea.hbm %s7131_s13, 256 }
 0x7ee   : > { %p5242_p7 = scmp.ne.s32.totalorder %s7074_s1, %s5241_s21  ;;  %p5246_p12 = scmp.lt.u32.totalorder %s7074_s1, %s7131_s13 }
 0x7ef   : > { %p5247_p13 = scmp.lt.u32.totalorder %s5245_s30, %s5241_s21  ;;  %p5249_p1 = scmp.lt.u32.totalorder %s5241_s21, %s7074_s1 }
 0x7f0   : > { %p5243_p10 = pnand %p5242_p7, %p5402_p6 }
 0x7f1   : > { %p5248_p0 = por %p5247_p13, %p5246_p12 }
 0x7f2   : > { %p5244_p11 = pneg %p5243_p10 }
 0x7f3   : > { %p5250_p2 = por %p5249_p1, %p5248_p0 }
 0x7f5   : > { %p5251_p3 = pnand %p5250_p2, %p5244_p11 }
 0x7f7   : > { %5254 = shalt.err (!%p5251_p3)
}
 0x7f8   : > { %4978 = dma.vmem_to_hbm [thread:$0]  (%p5402_p6), %s7076_s15, 128, %s7074_s1, %s4145_s22  }
 0x7f9 PF: > { %s4170_s23 = sand.u32 1, %s5277_s25   ;;  %p4981_p4 = pnand %p4225_p9, %p5406_p8 }
 0x7fa   : > { %s4171_s29 = scalar_lea.sflag [#allocation6], %s4170_s23 }
 0x7fb   : > { %5272 = dma.done.wait (!%p4981_p4), %s4171_s29, 128  }
 0x7fc   : > { %5274 = vsyncadd (!%p4981_p4), %s4171_s29, 4294967168  ;;  %p23_p5 = scmp.ge.s32.totalorder %s5387_s14, 4   ;;  %s7280_s25 = smov %s5281_s26 }
 0x7fd   : > { %s7281_s26 = smov %s5285_s27  ;;  %s7282_s27 = smov %s5400_s17 }
 0x7fe   : > { %s7283_s28 = smov %s5387_s14  ;;  %25 = sbr.rel (!%p23_p5) target bundleno = 6 (0x6), region = 171 }
 0x805   :  { %4176 = vsyncpa [#allocation6], 1 }
 0x806   :  { %4178 = vsyncpa [#allocation6 + $0x1], 1 }

</bundles_post_ra>
